<compile_context>
chip_gen: v7x
topology: tpu7x:2x2x1
jax: 0.10.0
libtpu: 0.0.40
codegen_flags: <defaults>
</compile_context>

<pallas_src>
import functools

import jax
import jax.numpy as jnp
from jax.experimental import pallas as pl
from jax.experimental.pallas import tpu as pltpu


def _round_up(x, m):
    return (x + m - 1) // m * m


def _bn_fold(gamma, beta, mean, var, eps=1e-5):
    inv = gamma / jnp.sqrt(var + eps)
    return inv.astype(jnp.float32), (beta - mean * inv).astype(jnp.float32)


# ---------------------------------------------------------------------------
# Pallas kernels
# ---------------------------------------------------------------------------

def _mm_ep_kernel(*refs, has_add, has_bn, relu6):
    # refs: a, b, bias, [addend], [scale, shift], out
    a_ref, b_ref, bias_ref = refs[0], refs[1], refs[2]
    i = 3
    add_ref = None
    if has_add:
        add_ref = refs[i]
        i += 1
    scale_ref = shift_ref = None
    if has_bn:
        scale_ref, shift_ref = refs[i], refs[i + 1]
        i += 2
    o_ref = refs[i]

    acc = jnp.dot(a_ref[...], b_ref[...], preferred_element_type=jnp.float32)
    acc = acc + bias_ref[...]
    if has_add:
        acc = acc + add_ref[...]
    if has_bn:
        acc = acc * scale_ref[...] + shift_ref[...]
    if relu6:
        acc = jnp.clip(acc, 0.0, 6.0)
    o_ref[...] = acc.astype(o_ref.dtype)


def matmul_ep(a, b, bias, *, addend=None, scale=None, shift=None,
              relu6=False, out_dtype=jnp.float32, block_m=512):
    """out = epilogue(a @ b + bias).  a:[M,K], b:[K,N], bias:[N].

    Tiled over M (software pipelined, "parallel"); bf16 MXU operands, f32
    accumulation.  Optional fused epilogue: +addend[M,N], folded-BN
    (*scale[N] + shift[N]) and ReLU6.  K/N kept whole per block (small here).
    """
    M, K = a.shape
    K2, N = b.shape
    assert K == K2
    has_add = addend is not None
    has_bn = scale is not None

    bm = min(block_m, _round_up(M, 16))
    Mp = _round_up(M, bm)

    a = a.astype(jnp.bfloat16)
    if Mp != M:
        a = jnp.pad(a, ((0, Mp - M), (0, 0)))
    b = b.astype(jnp.bfloat16)

    args = [a, b, bias.reshape(1, N).astype(jnp.float32)]
    in_specs = [
        pl.BlockSpec((bm, K), lambda i: (i, 0)),
        pl.BlockSpec((K, N), lambda i: (0, 0)),
        pl.BlockSpec((1, N), lambda i: (0, 0)),
    ]
    if has_add:
        ad = addend.astype(jnp.float32)
        if Mp != M:
            ad = jnp.pad(ad, ((0, Mp - M), (0, 0)))
        args.append(ad)
        in_specs.append(pl.BlockSpec((bm, N), lambda i: (i, 0)))
    if has_bn:
        args.append(scale.reshape(1, N).astype(jnp.float32))
        args.append(shift.reshape(1, N).astype(jnp.float32))
        in_specs.append(pl.BlockSpec((1, N), lambda i: (0, 0)))
        in_specs.append(pl.BlockSpec((1, N), lambda i: (0, 0)))

    out = pl.pallas_call(
        functools.partial(_mm_ep_kernel, has_add=has_add, has_bn=has_bn,
                          relu6=relu6),
        out_shape=jax.ShapeDtypeStruct((Mp, N), out_dtype),
        grid=(Mp // bm,),
        in_specs=in_specs,
        out_specs=pl.BlockSpec((bm, N), lambda i: (i, 0)),
        compiler_params=pltpu.CompilerParams(
            dimension_semantics=("parallel",),
            # tiles are sized well under the v7x 64-MiB VMEM; keep default scope
            vmem_limit_bytes=32 * 1024 * 1024),
    )(*args)
    return out[:M] if Mp != M else out


def _scale_shift_relu6_kernel(x_ref, s_ref, b_ref, o_ref):
    y = x_ref[...].astype(jnp.float32) * s_ref[...] + b_ref[...]
    o_ref[...] = jnp.clip(y, 0.0, 6.0).astype(o_ref.dtype)


def bn_relu6(x, gamma, beta, mean, var, *, out_dtype=jnp.bfloat16, block_m=1024):
    """BatchNorm2d (running stats folded) + ReLU6 on an NHWC tensor, tiled over rows."""
    B, H, W, C = x.shape
    scale, bias = _bn_fold(gamma, beta, mean, var)
    M = B * H * W
    bm = min(block_m, _round_up(M, 16))
    Mp = _round_up(M, bm)
    xf = x.reshape(M, C).astype(jnp.float32)
    if Mp != M:
        xf = jnp.pad(xf, ((0, Mp - M), (0, 0)))
    out = pl.pallas_call(
        _scale_shift_relu6_kernel,
        out_shape=jax.ShapeDtypeStruct((Mp, C), out_dtype),
        grid=(Mp // bm,),
        in_specs=[pl.BlockSpec((bm, C), lambda i: (i, 0)),
                  pl.BlockSpec((1, C), lambda i: (0, 0)),
                  pl.BlockSpec((1, C), lambda i: (0, 0))],
        out_specs=pl.BlockSpec((bm, C), lambda i: (i, 0)),
        compiler_params=pltpu.CompilerParams(dimension_semantics=("parallel",)),
    )(xf, scale.reshape(1, C), bias.reshape(1, C))
    out = out[:M] if Mp != M else out
    return out.reshape(B, H, W, C)


def _mha_kernel(q_ref, k_ref, v_ref, o_ref, *, scale):
    # blocks: [1, heads, S, dh] -- all heads of one batch element per grid step
    q = q_ref[0]
    k = k_ref[0]
    v = v_ref[0]
    s = jnp.einsum('hqd,hkd->hqk', q, k,
                   preferred_element_type=jnp.float32) * scale
    s = s - jnp.max(s, axis=-1, keepdims=True)
    p = jnp.exp(s)
    denom = jnp.sum(p, axis=-1, keepdims=True)
    p = p * pl.reciprocal(denom, approx=True)
    o_ref[0] = jnp.einsum('hqk,hkd->hqd', p.astype(v.dtype), v,
                          preferred_element_type=jnp.float32).astype(o_ref.dtype)


# ---------------------------------------------------------------------------
# Module pieces (glue in plain JAX, heavy compute in Pallas kernels)
# ---------------------------------------------------------------------------

def mha(top_x, p, heads):
    """Spatial multi-head self-attention at the input (half) resolution.

    # TODO(synk): the original MultiHeadAttention class was not provided; this
    # implements standard spatial MHA (1x1 q/k/v projections, softmax(QK^T/
    # sqrt(d))V, output projection).  layer_type='UP' (2x nearest upsample) is
    # fused downstream into the deconv epilogue instead of being materialized.
    """
    B, H, W, Cin = top_x.shape
    Cout = p['wq'].shape[1]
    S = H * W
    dh = Cout // heads
    xf = top_x.reshape(B * S, Cin)

    # fused q/k/v projection: one GEMM, LHS read once, N = 3*Cout lanes
    wqkv = jnp.concatenate([p['wq'], p['wk'], p['wv']], axis=1)
    bqkv = jnp.concatenate([p['bq'], p['bk'], p['bv']], axis=0)
    qkv = matmul_ep(xf, wqkv, bqkv, out_dtype=jnp.float32)        # [B*S, 3*Cout]
    qkv = qkv.reshape(B, S, 3, heads, dh)
    qkv = jnp.transpose(qkv, (2, 0, 3, 1, 4))                     # [3, B, heads, S, dh]
    qh, kh_, vh = qkv[0], qkv[1], qkv[2]

    scale = 1.0 / float(dh) ** 0.5
    attn = pl.pallas_call(
        functools.partial(_mha_kernel, scale=scale),
        out_shape=jax.ShapeDtypeStruct((B, heads, S, dh), jnp.float32),
        grid=(B,),
        in_specs=[pl.BlockSpec((1, heads, S, dh), lambda i: (i, 0, 0, 0))] * 3,
        out_specs=pl.BlockSpec((1, heads, S, dh), lambda i: (i, 0, 0, 0)),
        compiler_params=pltpu.CompilerParams(dimension_semantics=("parallel",)),
    )(qh, kh_, vh)

    attn = jnp.transpose(attn, (0, 2, 1, 3)).reshape(B * S, Cout)
    att = matmul_ep(attn, p['wo'], p['bo'], out_dtype=jnp.float32)
    return att.reshape(B, H, W, Cout)


def deconv_add_bn_relu6(top_x, att, skip, w, b, gamma, beta, mean, var):
    """ConvTranspose2d(Cin, Cout, 3, stride=2, padding=1, output_padding=1)
    via 4-phase subpixel decomposition, fused with (+att nearest-upsampled,
    +skip), folded BatchNorm2d and ReLU6 -- a single tiled matmul.

    top_x: [B,H,W,Cin] (bf16), att: [B,H,W,Cout], skip: [B,2H,2W,Cout].
    Returns bn_res: [B, 2H, 2W, Cout].
    """
    B, H, W, Cin = top_x.shape
    Cin_w, Cout, kh, kw = w.shape
    assert (Cin_w, kh, kw) == (Cin, 3, 3)

    # shifted half-res inputs (out-of-range taps contribute zero)
    xp = jnp.pad(top_x, ((0, 0), (0, 1), (0, 1), (0, 0)))
    x00 = xp[:, :H, :W, :]
    x01 = xp[:, :H, 1:W + 1, :]
    x10 = xp[:, 1:H + 1, :W, :]
    x11 = xp[:, 1:H + 1, 1:W + 1, :]
    lhs = jnp.concatenate([x00, x01, x10, x11], axis=-1).reshape(B * H * W, 4 * Cin)

    wm = lambda r, s: w[:, :, r, s].astype(jnp.float32)            # [Cin, Cout]
    z = jnp.zeros((Cin, Cout), jnp.float32)
    # column blocks = output phases (di,dj) in order (0,0),(0,1),(1,0),(1,1)
    w4 = jnp.concatenate([
        jnp.concatenate([wm(1, 1), wm(1, 2), wm(2, 1), wm(2, 2)], axis=1),  # x[i,  j  ]
        jnp.concatenate([z,        wm(1, 0), z,        wm(2, 0)], axis=1),  # x[i,  j+1]
        jnp.concatenate([z,        z,        wm(0, 1), wm(0, 2)], axis=1),  # x[i+1,j  ]
        jnp.concatenate([z,        z,        z,        wm(0, 0)], axis=1),  # x[i+1,j+1]
    ], axis=0)                                                     # [4*Cin, 4*Cout]
    b4 = jnp.tile(b.astype(jnp.float32), 4)

    # per-phase addend: att (same half-res value for all 4 phases == nearest
    # 2x upsample) + the matching stride-2 slice of skip
    addend = jnp.concatenate(
        [att + skip[:, di::2, dj::2, :] for di in (0, 1) for dj in (0, 1)],
        axis=-1).reshape(B * H * W, 4 * Cout)

    scale, shift = _bn_fold(gamma, beta, mean, var)
    out = matmul_ep(lhs, w4, b4, addend=addend,
                    scale=jnp.tile(scale, 4), shift=jnp.tile(shift, 4),
                    relu6=True, out_dtype=jnp.bfloat16)            # [B*H*W, 4*Cout]

    # interleave phases back to full resolution
    out = out.reshape(B, H, W, 2, 2, Cout)
    out = jnp.transpose(out, (0, 1, 3, 2, 4, 5)).reshape(B, 2 * H, 2 * W, Cout)
    return out


def _im2col(x, kh, kw, pad):
    """x: [B,H,W,C] -> patches [B*Ho*Wo, kh*kw*C] (row layout ((i*kw+j)*C + c))."""
    B, H, W, C = x.shape
    xp = jnp.pad(x, ((0, 0), (pad, pad), (pad, pad), (0, 0)))
    Ho = H + 2 * pad - kh + 1
    Wo = W + 2 * pad - kw + 1
    cols = [xp[:, i:i + Ho, j:j + Wo, :] for i in range(kh) for j in range(kw)]
    patches = jnp.concatenate(cols, axis=-1)
    return patches.reshape(B * Ho * Wo, kh * kw * C), (B, Ho, Wo)


def conv2d_3x3(x, w, b, *, scale=None, shift=None, relu6=False,
               out_dtype=jnp.float32):
    """3x3 / stride-1 / pad-1 conv, PyTorch weight [Cout, Cin, 3, 3]; optional
    fused folded-BN + ReLU6 epilogue.  Patches travel as bf16.
    # TODO(synk): patches are still materialized (im2col); a fully streaming
    # 9-tap accumulation needs manual DMA for element-shifted windows.
    """
    Cout, Cin, kh, kw = w.shape
    patches, (B, Ho, Wo) = _im2col(x.astype(jnp.bfloat16), kh, kw, 1)
    w_mat = jnp.transpose(w, (2, 3, 1, 0)).reshape(kh * kw * Cin, Cout)
    out = matmul_ep(patches, w_mat, b, scale=scale, shift=shift,
                    relu6=relu6, out_dtype=out_dtype)
    return out.reshape(B, Ho, Wo, Cout)


# ---------------------------------------------------------------------------
# Block_D forward
# ---------------------------------------------------------------------------

def block_d_forward(x_nchw, skip_nchw, p, heads):
    x = jnp.transpose(x_nchw, (0, 2, 3, 1))            # NCHW -> NHWC
    skip = jnp.transpose(skip_nchw, (0, 2, 3, 1)).astype(jnp.float32)

    # top_x = bn_relu(x)
    top_x = bn_relu6(x, p['bn1_gamma'], p['bn1_beta'], p['bn1_mean'], p['bn1_var'])

    # att = self.att(top_x)  (at half resolution; upsample fused below)
    att = mha(top_x, p, heads)

    # shortcut = deconv1(top_x); (shortcut + att + skip) -> bn_relu2
    # all fused into one 4-phase subpixel matmul with epilogue
    bn_res = deconv_add_bn_relu6(top_x, att, skip, p['deconv_w'], p['deconv_b'],
                                 p['bn2_gamma'], p['bn2_beta'],
                                 p['bn2_mean'], p['bn2_var'])

    # res_: conv -> BN -> ReLU6 (fused epilogue) -> conv
    s3, sh3 = _bn_fold(p['bn3_gamma'], p['bn3_beta'], p['bn3_mean'], p['bn3_var'])
    h = conv2d_3x3(bn_res, p['res_conv1_w'], p['res_conv1_b'],
                   scale=s3, shift=sh3, relu6=True, out_dtype=jnp.bfloat16)
    out = conv2d_3x3(h, p['res_conv2_w'], p['res_conv2_b'], out_dtype=jnp.float32)

    return jnp.transpose(out, (0, 3, 1, 2))            # NHWC -> NCHW


def init_params(key, cin, cout):
    ks = jax.random.split(key, 26)
    n = lambda k, s, sc=0.1: sc * jax.random.normal(k, s, jnp.float32)
    p = {}
    # bn_relu(chanIn)
    p['bn1_gamma'] = 1.0 + n(ks[0], (cin,))
    p['bn1_beta'] = n(ks[1], (cin,))
    p['bn1_mean'] = n(ks[2], (cin,))
    p['bn1_var'] = 1.0 + 0.1 * jnp.abs(jax.random.normal(ks[3], (cin,), jnp.float32))
    # deconv1 = ConvTranspose2d(cin, cout, 3, 2, padding=1, output_padding=1)
    p['deconv_w'] = n(ks[4], (cin, cout, 3, 3))
    p['deconv_b'] = n(ks[5], (cout,))
    # attention projections
    p['wq'] = n(ks[6], (cin, cout)); p['bq'] = n(ks[7], (cout,))
    p['wk'] = n(ks[8], (cin, cout)); p['bk'] = n(ks[9], (cout,))
    p['wv'] = n(ks[10], (cin, cout)); p['bv'] = n(ks[11], (cout,))
    p['wo'] = n(ks[12], (cout, cout)); p['bo'] = n(ks[13], (cout,))
    # bn_relu2(chanOut)
    p['bn2_gamma'] = 1.0 + n(ks[14], (cout,))
    p['bn2_beta'] = n(ks[15], (cout,))
    p['bn2_mean'] = n(ks[16], (cout,))
    p['bn2_var'] = 1.0 + 0.1 * jnp.abs(jax.random.normal(ks[17], (cout,), jnp.float32))
    # res_(chanOut, chanOut): Conv2d -> BN -> ReLU6 -> Conv2d
    p['res_conv1_w'] = n(ks[18], (cout, cout, 3, 3))
    p['res_conv1_b'] = n(ks[19], (cout,))
    p['bn3_gamma'] = 1.0 + n(ks[20], (cout,))
    p['bn3_beta'] = n(ks[21], (cout,))
    p['bn3_mean'] = n(ks[22], (cout,))
    p['bn3_var'] = 1.0 + 0.1 * jnp.abs(jax.random.normal(ks[23], (cout,), jnp.float32))
    p['res_conv2_w'] = n(ks[24], (cout, cout, 3, 3))
    p['res_conv2_b'] = n(ks[25], (cout,))
    return p


if __name__ == "__main__":
    B, CIN, COUT, H, W, HEADS = 2, 16, 16, 8, 8, 2

    key = jax.random.PRNGKey(0)
    kp, kx, kskip = jax.random.split(key, 3)
    params = init_params(kp, CIN, COUT)

    # PyTorch NCHW inputs: x [B, chanIn, H, W], skip [B, chanOut, 2H, 2W]
    x = jax.random.normal(kx, (B, CIN, H, W), jnp.float32)
    skip = jax.random.normal(kskip, (B, COUT, 2 * H, 2 * W), jnp.float32)

    fwd = jax.jit(block_d_forward, static_argnums=(3,))
    out = fwd(x, skip, params, HEADS)
    out = jax.block_until_ready(out)

    assert out.shape == (B, COUT, 2 * H, 2 * W), out.shape
    assert bool(jnp.all(jnp.isfinite(out)))
    print("KERNEL_OK")
</pallas_src>

<mosaic_0001>
module attributes {stable_mosaic.version = 11 : i64} {
  func.func @_scale_shift_relu6_kernel(%arg0: i32, %arg1: memref<128x16xf32, #tpu.memory_space<vmem>>, %arg2: memref<1x16xf32, #tpu.memory_space<vmem>>, %arg3: memref<1x16xf32, #tpu.memory_space<vmem>>, %arg4: memref<128x16xbf16, #tpu.memory_space<vmem>>) attributes {dimension_semantics = [#tpu.dimension_semantics<parallel>], iteration_bounds = array<i64: 1>, scalar_prefetch = 0 : i64, scratch_operands = 0 : i64, tpu.core_type = #tpu.core_type<tc>, window_params = [{transform_indices = @transform_0, window_bounds = array<i64: 128, 16>}, {pipeline_mode = #tpu.pipeline_mode<synchronous>, transform_indices = @transform_1, window_bounds = array<i64: 1, 16>}, {pipeline_mode = #tpu.pipeline_mode<synchronous>, transform_indices = @transform_2, window_bounds = array<i64: 1, 16>}, {transform_indices = @transform_3, window_bounds = array<i64: 128, 16>}]} {
    %c0 = arith.constant 0 : index
    %c0_0 = arith.constant 0 : index
    %0 = vector.load %arg1[%c0, %c0_0] : memref<128x16xf32, #tpu.memory_space<vmem>>, vector<128x16xf32>
    %c0_1 = arith.constant 0 : index
    %c0_2 = arith.constant 0 : index
    %1 = vector.load %arg2[%c0_1, %c0_2] : memref<1x16xf32, #tpu.memory_space<vmem>>, vector<1x16xf32>
    %2 = vector.broadcast %1 : vector<1x16xf32> to vector<128x16xf32>
    %3 = arith.mulf %0, %2 : vector<128x16xf32>
    %c0_3 = arith.constant 0 : index
    %c0_4 = arith.constant 0 : index
    %4 = vector.load %arg3[%c0_3, %c0_4] : memref<1x16xf32, #tpu.memory_space<vmem>>, vector<1x16xf32>
    %5 = vector.broadcast %4 : vector<1x16xf32> to vector<128x16xf32>
    %6 = arith.addf %3, %5 : vector<128x16xf32>
    %cst = arith.constant 0.000000e+00 : f32
    %cst_5 = arith.constant 6.000000e+00 : f32
    %7 = vector.broadcast %cst : f32 to vector<128x16xf32>
    %8 = arith.maximumf %7, %6 : vector<128x16xf32>
    %9 = vector.broadcast %cst_5 : f32 to vector<128x16xf32>
    %10 = arith.minimumf %9, %8 : vector<128x16xf32>
    %11 = arith.truncf %10 : vector<128x16xf32> to vector<128x16xbf16>
    %c0_6 = arith.constant 0 : index
    %c0_7 = arith.constant 0 : index
    %12 = vector.load %arg4[%c0_6, %c0_7] : memref<128x16xbf16, #tpu.memory_space<vmem>>, vector<128x16xbf16>
    tpu.vector_store %arg4[%c0_6, %c0_7], %11 {strides = array<i32>} : memref<128x16xbf16, #tpu.memory_space<vmem>>, vector<128x16xbf16>,
    return
  }
  func.func @transform_0(%arg0: i32) -> (i32, i32) {
    %c0_i32 = arith.constant 0 : i32
    %c0_i32_0 = arith.constant 0 : i32
    return %arg0, %c0_i32 : i32, i32
  }
  func.func @transform_1(%arg0: i32) -> (i32, i32) {
    %c0_i32 = arith.constant 0 : i32
    %c0_i32_0 = arith.constant 0 : i32
    %c0_i32_1 = arith.constant 0 : i32
    return %c0_i32, %c0_i32_0 : i32, i32
  }
  func.func @transform_2(%arg0: i32) -> (i32, i32) {
    %c0_i32 = arith.constant 0 : i32
    %c0_i32_0 = arith.constant 0 : i32
    %c0_i32_1 = arith.constant 0 : i32
    return %c0_i32, %c0_i32_0 : i32, i32
  }
  func.func @transform_3(%arg0: i32) -> (i32, i32) {
    %c0_i32 = arith.constant 0 : i32
    %c0_i32_0 = arith.constant 0 : i32
    return %arg0, %c0_i32 : i32, i32
  }
}

module attributes {stable_mosaic.version = 11 : i64} {
  func.func @_mm_ep_kernel(%arg0: i32, %arg1: memref<128x16xbf16, #tpu.memory_space<vmem>>, %arg2: memref<16x48xbf16, #tpu.memory_space<vmem>>, %arg3: memref<1x48xf32, #tpu.memory_space<vmem>>, %arg4: memref<128x48xf32, #tpu.memory_space<vmem>>) attributes {dimension_semantics = [#tpu.dimension_semantics<parallel>], iteration_bounds = array<i64: 1>, scalar_prefetch = 0 : i64, scratch_operands = 0 : i64, tpu.core_type = #tpu.core_type<tc>, window_params = [{transform_indices = @transform_0, window_bounds = array<i64: 128, 16>}, {pipeline_mode = #tpu.pipeline_mode<synchronous>, transform_indices = @transform_1, window_bounds = array<i64: 16, 48>}, {pipeline_mode = #tpu.pipeline_mode<synchronous>, transform_indices = @transform_2, window_bounds = array<i64: 1, 48>}, {transform_indices = @transform_3, window_bounds = array<i64: 128, 48>}]} {
    %c0 = arith.constant 0 : index
    %c0_0 = arith.constant 0 : index
    %0 = vector.load %arg1[%c0, %c0_0] : memref<128x16xbf16, #tpu.memory_space<vmem>>, vector<128x16xbf16>
    %c0_1 = arith.constant 0 : index
    %c0_2 = arith.constant 0 : index
    %1 = vector.load %arg2[%c0_1, %c0_2] : memref<16x48xbf16, #tpu.memory_space<vmem>>, vector<16x48xbf16>
    %cst = arith.constant dense<0.000000e+00> : vector<128x48xf32>
    %2 = tpu.matmul %0, %1, %cst {dimension_numbers = #tpu.dot_dimension_numbers<[1], [0], [0], [1], [0, 0, 1, 1], [], []>} : vector<128x16xbf16>, vector<16x48xbf16>, vector<128x48xf32> -> vector<128x48xf32>
    %c0_3 = arith.constant 0 : index
    %c0_4 = arith.constant 0 : index
    %3 = vector.load %arg3[%c0_3, %c0_4] : memref<1x48xf32, #tpu.memory_space<vmem>>, vector<1x48xf32>
    %4 = vector.broadcast %3 : vector<1x48xf32> to vector<128x48xf32>
    %5 = arith.addf %2, %4 : vector<128x48xf32>
    %c0_5 = arith.constant 0 : index
    %c0_6 = arith.constant 0 : index
    %6 = vector.load %arg4[%c0_5, %c0_6] : memref<128x48xf32, #tpu.memory_space<vmem>>, vector<128x48xf32>
    tpu.vector_store %arg4[%c0_5, %c0_6], %5 {strides = array<i32>} : memref<128x48xf32, #tpu.memory_space<vmem>>, vector<128x48xf32>,
    return
  }
  func.func @transform_0(%arg0: i32) -> (i32, i32) {
    %c0_i32 = arith.constant 0 : i32
    %c0_i32_0 = arith.constant 0 : i32
    return %arg0, %c0_i32 : i32, i32
  }
  func.func @transform_1(%arg0: i32) -> (i32, i32) {
    %c0_i32 = arith.constant 0 : i32
    %c0_i32_0 = arith.constant 0 : i32
    %c0_i32_1 = arith.constant 0 : i32
    return %c0_i32, %c0_i32_0 : i32, i32
  }
  func.func @transform_2(%arg0: i32) -> (i32, i32) {
    %c0_i32 = arith.constant 0 : i32
    %c0_i32_0 = arith.constant 0 : i32
    %c0_i32_1 = arith.constant 0 : i32
    return %c0_i32, %c0_i32_0 : i32, i32
  }
  func.func @transform_3(%arg0: i32) -> (i32, i32) {
    %c0_i32 = arith.constant 0 : i32
    %c0_i32_0 = arith.constant 0 : i32
    return %arg0, %c0_i32 : i32, i32
  }
}

module attributes {stable_mosaic.version = 11 : i64} {
  func.func @_mha_kernel(%arg0: i32, %arg1: memref<1x2x64x8xf32, #tpu.memory_space<vmem>>, %arg2: memref<1x2x64x8xf32, #tpu.memory_space<vmem>>, %arg3: memref<1x2x64x8xf32, #tpu.memory_space<vmem>>, %arg4: memref<1x2x64x8xf32, #tpu.memory_space<vmem>>) attributes {dimension_semantics = [#tpu.dimension_semantics<parallel>], iteration_bounds = array<i64: 2>, scalar_prefetch = 0 : i64, scratch_operands = 0 : i64, tpu.core_type = #tpu.core_type<tc>, window_params = [{transform_indices = @transform_0, window_bounds = array<i64: 1, 2, 64, 8>}, {transform_indices = @transform_1, window_bounds = array<i64: 1, 2, 64, 8>}, {transform_indices = @transform_2, window_bounds = array<i64: 1, 2, 64, 8>}, {transform_indices = @transform_3, window_bounds = array<i64: 1, 2, 64, 8>}]} {
    %c0 = arith.constant 0 : index
    %c0_0 = arith.constant 0 : index
    %c0_1 = arith.constant 0 : index
    %c0_2 = arith.constant 0 : index
    %0 = vector.load %arg1[%c0, %c0_0, %c0_1, %c0_2] : memref<1x2x64x8xf32, #tpu.memory_space<vmem>>, vector<1x2x64x8xf32>
    %1 = vector.shape_cast %0 : vector<1x2x64x8xf32> to vector<2x64x8xf32>
    %c0_3 = arith.constant 0 : index
    %c0_4 = arith.constant 0 : index
    %c0_5 = arith.constant 0 : index
    %c0_6 = arith.constant 0 : index
    %2 = vector.load %arg2[%c0_3, %c0_4, %c0_5, %c0_6] : memref<1x2x64x8xf32, #tpu.memory_space<vmem>>, vector<1x2x64x8xf32>
    %3 = vector.shape_cast %2 : vector<1x2x64x8xf32> to vector<2x64x8xf32>
    %c0_7 = arith.constant 0 : index
    %c0_8 = arith.constant 0 : index
    %c0_9 = arith.constant 0 : index
    %c0_10 = arith.constant 0 : index
    %4 = vector.load %arg3[%c0_7, %c0_8, %c0_9, %c0_10] : memref<1x2x64x8xf32, #tpu.memory_space<vmem>>, vector<1x2x64x8xf32>
    %5 = vector.shape_cast %4 : vector<1x2x64x8xf32> to vector<2x64x8xf32>
    "tpu.trace_start"() <{level = 10 : i32, message = "hqd,hkd->hqk"}> : () -> ()
    %cst = arith.constant dense<0.000000e+00> : vector<2x64x64xf32>
    %6 = tpu.matmul %1, %3, %cst {dimension_numbers = #tpu.dot_dimension_numbers<[2], [2], [1], [1], [0, 0, 0, 1, 1, 1], [0], [0]>} : vector<2x64x8xf32>, vector<2x64x8xf32>, vector<2x64x64xf32> -> vector<2x64x64xf32>
    "tpu.trace_stop"() : () -> ()
    %cst_11 = arith.constant 0.353553385 : f32
    %7 = vector.broadcast %cst_11 : f32 to vector<2x64x64xf32>
    %8 = arith.mulf %6, %7 : vector<2x64x64xf32>
    %cst_12 = arith.constant dense<0xFF800000> : vector<2x64xf32>
    %9 = vector.multi_reduction <maximumf>, %8, %cst_12 [2] : vector<2x64x64xf32> to vector<2x64xf32>
    %10 = vector.shape_cast %9 : vector<2x64xf32> to vector<2x64x1xf32>
    %11 = vector.broadcast %10 : vector<2x64x1xf32> to vector<2x64x64xf32>
    %12 = arith.subf %8, %11 : vector<2x64x64xf32>
    %13 = math.exp %12 : vector<2x64x64xf32>
    %cst_13 = arith.constant dense<0.000000e+00> : vector<2x64xf32>
    %14 = vector.multi_reduction <add>, %13, %cst_13 [2] : vector<2x64x64xf32> to vector<2x64xf32>
    %15 = vector.shape_cast %14 : vector<2x64xf32> to vector<2x64x1xf32>
    %16 = tpu.reciprocal %15 {approx = true} : vector<2x64x1xf32> -> vector<2x64x1xf32>
    %17 = vector.broadcast %16 : vector<2x64x1xf32> to vector<2x64x64xf32>
    %18 = arith.mulf %13, %17 : vector<2x64x64xf32>
    "tpu.trace_start"() <{level = 10 : i32, message = "hqk,hkd->hqd"}> : () -> ()
    %cst_14 = arith.constant dense<0.000000e+00> : vector<2x64x8xf32>
    %19 = tpu.matmul %18, %5, %cst_14 {dimension_numbers = #tpu.dot_dimension_numbers<[2], [1], [1], [2], [0, 0, 0, 1, 1, 2], [0], [0]>} : vector<2x64x64xf32>, vector<2x64x8xf32>, vector<2x64x8xf32> -> vector<2x64x8xf32>
    "tpu.trace_stop"() : () -> ()
    %c0_15 = arith.constant 0 : index
    %c0_16 = arith.constant 0 : index
    %c0_17 = arith.constant 0 : index
    %c0_18 = arith.constant 0 : index
    %20 = vector.load %arg4[%c0_15, %c0_16, %c0_17, %c0_18] : memref<1x2x64x8xf32, #tpu.memory_space<vmem>>, vector<1x2x64x8xf32>
    %21 = vector.shape_cast %20 : vector<1x2x64x8xf32> to vector<2x64x8xf32>
    %22 = vector.shape_cast %19 : vector<2x64x8xf32> to vector<1x2x64x8xf32>
    tpu.vector_store %arg4[%c0_15, %c0_16, %c0_17, %c0_18], %22 {strides = array<i32>} : memref<1x2x64x8xf32, #tpu.memory_space<vmem>>, vector<1x2x64x8xf32>,
    return
  }
  func.func @transform_0(%arg0: i32) -> (i32, i32, i32, i32) {
    %c0_i32 = arith.constant 0 : i32
    %c0_i32_0 = arith.constant 0 : i32
    %c0_i32_1 = arith.constant 0 : i32
    %c0_i32_2 = arith.constant 0 : i32
    return %arg0, %c0_i32, %c0_i32_0, %c0_i32_1 : i32, i32, i32, i32
  }
  func.func @transform_1(%arg0: i32) -> (i32, i32, i32, i32) {
    %c0_i32 = arith.constant 0 : i32
    %c0_i32_0 = arith.constant 0 : i32
    %c0_i32_1 = arith.constant 0 : i32
    %c0_i32_2 = arith.constant 0 : i32
    return %arg0, %c0_i32, %c0_i32_0, %c0_i32_1 : i32, i32, i32, i32
  }
  func.func @transform_2(%arg0: i32) -> (i32, i32, i32, i32) {
    %c0_i32 = arith.constant 0 : i32
    %c0_i32_0 = arith.constant 0 : i32
    %c0_i32_1 = arith.constant 0 : i32
    %c0_i32_2 = arith.constant 0 : i32
    return %arg0, %c0_i32, %c0_i32_0, %c0_i32_1 : i32, i32, i32, i32
  }
  func.func @transform_3(%arg0: i32) -> (i32, i32, i32, i32) {
    %c0_i32 = arith.constant 0 : i32
    %c0_i32_0 = arith.constant 0 : i32
    %c0_i32_1 = arith.constant 0 : i32
    %c0_i32_2 = arith.constant 0 : i32
    return %arg0, %c0_i32, %c0_i32_0, %c0_i32_1 : i32, i32, i32, i32
  }
}

module attributes {stable_mosaic.version = 11 : i64} {
  func.func @_mm_ep_kernel(%arg0: i32, %arg1: memref<128x16xbf16, #tpu.memory_space<vmem>>, %arg2: memref<16x16xbf16, #tpu.memory_space<vmem>>, %arg3: memref<1x16xf32, #tpu.memory_space<vmem>>, %arg4: memref<128x16xf32, #tpu.memory_space<vmem>>) attributes {dimension_semantics = [#tpu.dimension_semantics<parallel>], iteration_bounds = array<i64: 1>, scalar_prefetch = 0 : i64, scratch_operands = 0 : i64, tpu.core_type = #tpu.core_type<tc>, window_params = [{transform_indices = @transform_0, window_bounds = array<i64: 128, 16>}, {pipeline_mode = #tpu.pipeline_mode<synchronous>, transform_indices = @transform_1, window_bounds = array<i64: 16, 16>}, {pipeline_mode = #tpu.pipeline_mode<synchronous>, transform_indices = @transform_2, window_bounds = array<i64: 1, 16>}, {transform_indices = @transform_3, window_bounds = array<i64: 128, 16>}]} {
    %c0 = arith.constant 0 : index
    %c0_0 = arith.constant 0 : index
    %0 = vector.load %arg1[%c0, %c0_0] : memref<128x16xbf16, #tpu.memory_space<vmem>>, vector<128x16xbf16>
    %c0_1 = arith.constant 0 : index
    %c0_2 = arith.constant 0 : index
    %1 = vector.load %arg2[%c0_1, %c0_2] : memref<16x16xbf16, #tpu.memory_space<vmem>>, vector<16x16xbf16>
    %cst = arith.constant dense<0.000000e+00> : vector<128x16xf32>
    %2 = tpu.matmul %0, %1, %cst {dimension_numbers = #tpu.dot_dimension_numbers<[1], [0], [0], [1], [0, 0, 1, 1], [], []>} : vector<128x16xbf16>, vector<16x16xbf16>, vector<128x16xf32> -> vector<128x16xf32>
    %c0_3 = arith.constant 0 : index
    %c0_4 = arith.constant 0 : index
    %3 = vector.load %arg3[%c0_3, %c0_4] : memref<1x16xf32, #tpu.memory_space<vmem>>, vector<1x16xf32>
    %4 = vector.broadcast %3 : vector<1x16xf32> to vector<128x16xf32>
    %5 = arith.addf %2, %4 : vector<128x16xf32>
    %c0_5 = arith.constant 0 : index
    %c0_6 = arith.constant 0 : index
    %6 = vector.load %arg4[%c0_5, %c0_6] : memref<128x16xf32, #tpu.memory_space<vmem>>, vector<128x16xf32>
    tpu.vector_store %arg4[%c0_5, %c0_6], %5 {strides = array<i32>} : memref<128x16xf32, #tpu.memory_space<vmem>>, vector<128x16xf32>,
    return
  }
  func.func @transform_0(%arg0: i32) -> (i32, i32) {
    %c0_i32 = arith.constant 0 : i32
    %c0_i32_0 = arith.constant 0 : i32
    return %arg0, %c0_i32 : i32, i32
  }
  func.func @transform_1(%arg0: i32) -> (i32, i32) {
    %c0_i32 = arith.constant 0 : i32
    %c0_i32_0 = arith.constant 0 : i32
    %c0_i32_1 = arith.constant 0 : i32
    return %c0_i32, %c0_i32_0 : i32, i32
  }
  func.func @transform_2(%arg0: i32) -> (i32, i32) {
    %c0_i32 = arith.constant 0 : i32
    %c0_i32_0 = arith.constant 0 : i32
    %c0_i32_1 = arith.constant 0 : i32
    return %c0_i32, %c0_i32_0 : i32, i32
  }
  func.func @transform_3(%arg0: i32) -> (i32, i32) {
    %c0_i32 = arith.constant 0 : i32
    %c0_i32_0 = arith.constant 0 : i32
    return %arg0, %c0_i32 : i32, i32
  }
}

module attributes {stable_mosaic.version = 11 : i64} {
  func.func @_mm_ep_kernel(%arg0: i32, %arg1: memref<128x64xbf16, #tpu.memory_space<vmem>>, %arg2: memref<64x64xbf16, #tpu.memory_space<vmem>>, %arg3: memref<1x64xf32, #tpu.memory_space<vmem>>, %arg4: memref<128x64xf32, #tpu.memory_space<vmem>>, %arg5: memref<1x64xf32, #tpu.memory_space<vmem>>, %arg6: memref<1x64xf32, #tpu.memory_space<vmem>>, %arg7: memref<128x64xbf16, #tpu.memory_space<vmem>>) attributes {dimension_semantics = [#tpu.dimension_semantics<parallel>], iteration_bounds = array<i64: 1>, scalar_prefetch = 0 : i64, scratch_operands = 0 : i64, tpu.core_type = #tpu.core_type<tc>, window_params = [{transform_indices = @transform_0, window_bounds = array<i64: 128, 64>}, {pipeline_mode = #tpu.pipeline_mode<synchronous>, transform_indices = @transform_1, window_bounds = array<i64: 64, 64>}, {pipeline_mode = #tpu.pipeline_mode<synchronous>, transform_indices = @transform_2, window_bounds = array<i64: 1, 64>}, {transform_indices = @transform_3, window_bounds = array<i64: 128, 64>}, {pipeline_mode = #tpu.pipeline_mode<synchronous>, transform_indices = @transform_4, window_bounds = array<i64: 1, 64>}, {pipeline_mode = #tpu.pipeline_mode<synchronous>, transform_indices = @transform_5, window_bounds = array<i64: 1, 64>}, {transform_indices = @transform_6, window_bounds = array<i64: 128, 64>}]} {
    %c0 = arith.constant 0 : index
    %c0_0 = arith.constant 0 : index
    %0 = vector.load %arg1[%c0, %c0_0] : memref<128x64xbf16, #tpu.memory_space<vmem>>, vector<128x64xbf16>
    %c0_1 = arith.constant 0 : index
    %c0_2 = arith.constant 0 : index
    %1 = vector.load %arg2[%c0_1, %c0_2] : memref<64x64xbf16, #tpu.memory_space<vmem>>, vector<64x64xbf16>
    %cst = arith.constant dense<0.000000e+00> : vector<128x64xf32>
    %2 = tpu.matmul %0, %1, %cst {dimension_numbers = #tpu.dot_dimension_numbers<[1], [0], [0], [1], [0, 0, 1, 1], [], []>} : vector<128x64xbf16>, vector<64x64xbf16>, vector<128x64xf32> -> vector<128x64xf32>
    %c0_3 = arith.constant 0 : index
    %c0_4 = arith.constant 0 : index
    %3 = vector.load %arg3[%c0_3, %c0_4] : memref<1x64xf32, #tpu.memory_space<vmem>>, vector<1x64xf32>
    %4 = vector.broadcast %3 : vector<1x64xf32> to vector<128x64xf32>
    %5 = arith.addf %2, %4 : vector<128x64xf32>
    %c0_5 = arith.constant 0 : index
    %c0_6 = arith.constant 0 : index
    %6 = vector.load %arg4[%c0_5, %c0_6] : memref<128x64xf32, #tpu.memory_space<vmem>>, vector<128x64xf32>
    %7 = arith.addf %5, %6 : vector<128x64xf32>
    %c0_7 = arith.constant 0 : index
    %c0_8 = arith.constant 0 : index
    %8 = vector.load %arg5[%c0_7, %c0_8] : memref<1x64xf32, #tpu.memory_space<vmem>>, vector<1x64xf32>
    %9 = vector.broadcast %8 : vector<1x64xf32> to vector<128x64xf32>
    %10 = arith.mulf %7, %9 : vector<128x64xf32>
    %c0_9 = arith.constant 0 : index
    %c0_10 = arith.constant 0 : index
    %11 = vector.load %arg6[%c0_9, %c0_10] : memref<1x64xf32, #tpu.memory_space<vmem>>, vector<1x64xf32>
    %12 = vector.broadcast %11 : vector<1x64xf32> to vector<128x64xf32>
    %13 = arith.addf %10, %12 : vector<128x64xf32>
    %cst_11 = arith.constant 0.000000e+00 : f32
    %cst_12 = arith.constant 6.000000e+00 : f32
    %14 = vector.broadcast %cst_11 : f32 to vector<128x64xf32>
    %15 = arith.maximumf %14, %13 : vector<128x64xf32>
    %16 = vector.broadcast %cst_12 : f32 to vector<128x64xf32>
    %17 = arith.minimumf %16, %15 : vector<128x64xf32>
    %18 = arith.truncf %17 : vector<128x64xf32> to vector<128x64xbf16>
    %c0_13 = arith.constant 0 : index
    %c0_14 = arith.constant 0 : index
    %19 = vector.load %arg7[%c0_13, %c0_14] : memref<128x64xbf16, #tpu.memory_space<vmem>>, vector<128x64xbf16>
    tpu.vector_store %arg7[%c0_13, %c0_14], %18 {strides = array<i32>} : memref<128x64xbf16, #tpu.memory_space<vmem>>, vector<128x64xbf16>,
    return
  }
  func.func @transform_0(%arg0: i32) -> (i32, i32) {
    %c0_i32 = arith.constant 0 : i32
    %c0_i32_0 = arith.constant 0 : i32
    return %arg0, %c0_i32 : i32, i32
  }
  func.func @transform_1(%arg0: i32) -> (i32, i32) {
    %c0_i32 = arith.constant 0 : i32
    %c0_i32_0 = arith.constant 0 : i32
    %c0_i32_1 = arith.constant 0 : i32
    return %c0_i32, %c0_i32_0 : i32, i32
  }
  func.func @transform_2(%arg0: i32) -> (i32, i32) {
    %c0_i32 = arith.constant 0 : i32
    %c0_i32_0 = arith.constant 0 : i32
    %c0_i32_1 = arith.constant 0 : i32
    return %c0_i32, %c0_i32_0 : i32, i32
  }
  func.func @transform_3(%arg0: i32) -> (i32, i32) {
    %c0_i32 = arith.constant 0 : i32
    %c0_i32_0 = arith.constant 0 : i32
    return %arg0, %c0_i32 : i32, i32
  }
  func.func @transform_4(%arg0: i32) -> (i32, i32) {
    %c0_i32 = arith.constant 0 : i32
    %c0_i32_0 = arith.constant 0 : i32
    %c0_i32_1 = arith.constant 0 : i32
    return %c0_i32, %c0_i32_0 : i32, i32
  }
  func.func @transform_5(%arg0: i32) -> (i32, i32) {
    %c0_i32 = arith.constant 0 : i32
    %c0_i32_0 = arith.constant 0 : i32
    %c0_i32_1 = arith.constant 0 : i32
    return %c0_i32, %c0_i32_0 : i32, i32
  }
  func.func @transform_6(%arg0: i32) -> (i32, i32) {
    %c0_i32 = arith.constant 0 : i32
    %c0_i32_0 = arith.constant 0 : i32
    return %arg0, %c0_i32 : i32, i32
  }
}

module attributes {stable_mosaic.version = 11 : i64} {
  func.func @_mm_ep_kernel(%arg0: i32, %arg1: memref<512x144xbf16, #tpu.memory_space<vmem>>, %arg2: memref<144x16xbf16, #tpu.memory_space<vmem>>, %arg3: memref<1x16xf32, #tpu.memory_space<vmem>>, %arg4: memref<1x16xf32, #tpu.memory_space<vmem>>, %arg5: memref<1x16xf32, #tpu.memory_space<vmem>>, %arg6: memref<512x16xbf16, #tpu.memory_space<vmem>>) attributes {dimension_semantics = [#tpu.dimension_semantics<parallel>], iteration_bounds = array<i64: 1>, scalar_prefetch = 0 : i64, scratch_operands = 0 : i64, tpu.core_type = #tpu.core_type<tc>, window_params = [{transform_indices = @transform_0, window_bounds = array<i64: 512, 144>}, {pipeline_mode = #tpu.pipeline_mode<synchronous>, transform_indices = @transform_1, window_bounds = array<i64: 144, 16>}, {pipeline_mode = #tpu.pipeline_mode<synchronous>, transform_indices = @transform_2, window_bounds = array<i64: 1, 16>}, {pipeline_mode = #tpu.pipeline_mode<synchronous>, transform_indices = @transform_3, window_bounds = array<i64: 1, 16>}, {pipeline_mode = #tpu.pipeline_mode<synchronous>, transform_indices = @transform_4, window_bounds = array<i64: 1, 16>}, {transform_indices = @transform_5, window_bounds = array<i64: 512, 16>}]} {
    %c0 = arith.constant 0 : index
    %c0_0 = arith.constant 0 : index
    %0 = vector.load %arg1[%c0, %c0_0] : memref<512x144xbf16, #tpu.memory_space<vmem>>, vector<512x144xbf16>
    %c0_1 = arith.constant 0 : index
    %c0_2 = arith.constant 0 : index
    %1 = vector.load %arg2[%c0_1, %c0_2] : memref<144x16xbf16, #tpu.memory_space<vmem>>, vector<144x16xbf16>
    %cst = arith.constant dense<0.000000e+00> : vector<512x16xf32>
    %2 = tpu.matmul %0, %1, %cst {dimension_numbers = #tpu.dot_dimension_numbers<[1], [0], [0], [1], [0, 0, 1, 1], [], []>} : vector<512x144xbf16>, vector<144x16xbf16>, vector<512x16xf32> -> vector<512x16xf32>
    %c0_3 = arith.constant 0 : index
    %c0_4 = arith.constant 0 : index
    %3 = vector.load %arg3[%c0_3, %c0_4] : memref<1x16xf32, #tpu.memory_space<vmem>>, vector<1x16xf32>
    %4 = vector.broadcast %3 : vector<1x16xf32> to vector<512x16xf32>
    %5 = arith.addf %2, %4 : vector<512x16xf32>
    %c0_5 = arith.constant 0 : index
    %c0_6 = arith.constant 0 : index
    %6 = vector.load %arg4[%c0_5, %c0_6] : memref<1x16xf32, #tpu.memory_space<vmem>>, vector<1x16xf32>
    %7 = vector.broadcast %6 : vector<1x16xf32> to vector<512x16xf32>
    %8 = arith.mulf %5, %7 : vector<512x16xf32>
    %c0_7 = arith.constant 0 : index
    %c0_8 = arith.constant 0 : index
    %9 = vector.load %arg5[%c0_7, %c0_8] : memref<1x16xf32, #tpu.memory_space<vmem>>, vector<1x16xf32>
    %10 = vector.broadcast %9 : vector<1x16xf32> to vector<512x16xf32>
    %11 = arith.addf %8, %10 : vector<512x16xf32>
    %cst_9 = arith.constant 0.000000e+00 : f32
    %cst_10 = arith.constant 6.000000e+00 : f32
    %12 = vector.broadcast %cst_9 : f32 to vector<512x16xf32>
    %13 = arith.maximumf %12, %11 : vector<512x16xf32>
    %14 = vector.broadcast %cst_10 : f32 to vector<512x16xf32>
    %15 = arith.minimumf %14, %13 : vector<512x16xf32>
    %16 = arith.truncf %15 : vector<512x16xf32> to vector<512x16xbf16>
    %c0_11 = arith.constant 0 : index
    %c0_12 = arith.constant 0 : index
    %17 = vector.load %arg6[%c0_11, %c0_12] : memref<512x16xbf16, #tpu.memory_space<vmem>>, vector<512x16xbf16>
    tpu.vector_store %arg6[%c0_11, %c0_12], %16 {strides = array<i32>} : memref<512x16xbf16, #tpu.memory_space<vmem>>, vector<512x16xbf16>,
    return
  }
  func.func @transform_0(%arg0: i32) -> (i32, i32) {
    %c0_i32 = arith.constant 0 : i32
    %c0_i32_0 = arith.constant 0 : i32
    return %arg0, %c0_i32 : i32, i32
  }
  func.func @transform_1(%arg0: i32) -> (i32, i32) {
    %c0_i32 = arith.constant 0 : i32
    %c0_i32_0 = arith.constant 0 : i32
    %c0_i32_1 = arith.constant 0 : i32
    return %c0_i32, %c0_i32_0 : i32, i32
  }
  func.func @transform_2(%arg0: i32) -> (i32, i32) {
    %c0_i32 = arith.constant 0 : i32
    %c0_i32_0 = arith.constant 0 : i32
    %c0_i32_1 = arith.constant 0 : i32
    return %c0_i32, %c0_i32_0 : i32, i32
  }
  func.func @transform_3(%arg0: i32) -> (i32, i32) {
    %c0_i32 = arith.constant 0 : i32
    %c0_i32_0 = arith.constant 0 : i32
    %c0_i32_1 = arith.constant 0 : i32
    return %c0_i32, %c0_i32_0 : i32, i32
  }
  func.func @transform_4(%arg0: i32) -> (i32, i32) {
    %c0_i32 = arith.constant 0 : i32
    %c0_i32_0 = arith.constant 0 : i32
    %c0_i32_1 = arith.constant 0 : i32
    return %c0_i32, %c0_i32_0 : i32, i32
  }
  func.func @transform_5(%arg0: i32) -> (i32, i32) {
    %c0_i32 = arith.constant 0 : i32
    %c0_i32_0 = arith.constant 0 : i32
    return %arg0, %c0_i32 : i32, i32
  }
}

module attributes {stable_mosaic.version = 11 : i64} {
  func.func @_mm_ep_kernel(%arg0: i32, %arg1: memref<512x144xbf16, #tpu.memory_space<vmem>>, %arg2: memref<144x16xbf16, #tpu.memory_space<vmem>>, %arg3: memref<1x16xf32, #tpu.memory_space<vmem>>, %arg4: memref<512x16xf32, #tpu.memory_space<vmem>>) attributes {dimension_semantics = [#tpu.dimension_semantics<parallel>], iteration_bounds = array<i64: 1>, scalar_prefetch = 0 : i64, scratch_operands = 0 : i64, tpu.core_type = #tpu.core_type<tc>, window_params = [{transform_indices = @transform_0, window_bounds = array<i64: 512, 144>}, {pipeline_mode = #tpu.pipeline_mode<synchronous>, transform_indices = @transform_1, window_bounds = array<i64: 144, 16>}, {pipeline_mode = #tpu.pipeline_mode<synchronous>, transform_indices = @transform_2, window_bounds = array<i64: 1, 16>}, {transform_indices = @transform_3, window_bounds = array<i64: 512, 16>}]} {
    %c0 = arith.constant 0 : index
    %c0_0 = arith.constant 0 : index
    %0 = vector.load %arg1[%c0, %c0_0] : memref<512x144xbf16, #tpu.memory_space<vmem>>, vector<512x144xbf16>
    %c0_1 = arith.constant 0 : index
    %c0_2 = arith.constant 0 : index
    %1 = vector.load %arg2[%c0_1, %c0_2] : memref<144x16xbf16, #tpu.memory_space<vmem>>, vector<144x16xbf16>
    %cst = arith.constant dense<0.000000e+00> : vector<512x16xf32>
    %2 = tpu.matmul %0, %1, %cst {dimension_numbers = #tpu.dot_dimension_numbers<[1], [0], [0], [1], [0, 0, 1, 1], [], []>} : vector<512x144xbf16>, vector<144x16xbf16>, vector<512x16xf32> -> vector<512x16xf32>
    %c0_3 = arith.constant 0 : index
    %c0_4 = arith.constant 0 : index
    %3 = vector.load %arg3[%c0_3, %c0_4] : memref<1x16xf32, #tpu.memory_space<vmem>>, vector<1x16xf32>
    %4 = vector.broadcast %3 : vector<1x16xf32> to vector<512x16xf32>
    %5 = arith.addf %2, %4 : vector<512x16xf32>
    %c0_5 = arith.constant 0 : index
    %c0_6 = arith.constant 0 : index
    %6 = vector.load %arg4[%c0_5, %c0_6] : memref<512x16xf32, #tpu.memory_space<vmem>>, vector<512x16xf32>
    tpu.vector_store %arg4[%c0_5, %c0_6], %5 {strides = array<i32>} : memref<512x16xf32, #tpu.memory_space<vmem>>, vector<512x16xf32>,
    return
  }
  func.func @transform_0(%arg0: i32) -> (i32, i32) {
    %c0_i32 = arith.constant 0 : i32
    %c0_i32_0 = arith.constant 0 : i32
    return %arg0, %c0_i32 : i32, i32
  }
  func.func @transform_1(%arg0: i32) -> (i32, i32) {
    %c0_i32 = arith.constant 0 : i32
    %c0_i32_0 = arith.constant 0 : i32
    %c0_i32_1 = arith.constant 0 : i32
    return %c0_i32, %c0_i32_0 : i32, i32
  }
  func.func @transform_2(%arg0: i32) -> (i32, i32) {
    %c0_i32 = arith.constant 0 : i32
    %c0_i32_0 = arith.constant 0 : i32
    %c0_i32_1 = arith.constant 0 : i32
    return %c0_i32, %c0_i32_0 : i32, i32
  }
  func.func @transform_3(%arg0: i32) -> (i32, i32) {
    %c0_i32 = arith.constant 0 : i32
    %c0_i32_0 = arith.constant 0 : i32
    return %arg0, %c0_i32 : i32, i32
  }
}

</mosaic_0001>

<bundles_post_ra>
// kernel: block_d_forward.7
= control target key start
LH: loop header
LB: loop body
LE: loop exit
PB: predicated region body
PF: predicated region fallthrough
CT: control target
= control target key end

     0   :  { %8 = vsyncpa [#allocation3], 0  ;;  %s269_s12 = smov [#allocation2]   ;;  %s410_s0 = inlined_call_operand.hbm [shape: f32[128,16], index: 0, kind: input, shape index: {}]   ;;  %s411_s1 = inlined_call_operand.vmem [shape: f32[1,16], index: 1, kind: input, shape index: {}]   ;;  %s412_s2 = inlined_call_operand.vmem [shape: f32[1,16], index: 2, kind: input, shape index: {}]   ;;  %s413_s3 = inlined_call_operand.vmem [shape: bf16[128,16], index: 3, kind: output, shape index: {}]  }
   0x1   :  { %s14_s13 = sshll.u32 %s269_s12, 4  ;;  %s245_s16 = scalar_lea.hbm %s410_s0, 2048  ;;  %s15_s13 = int_to_ptr.vmem [resolvable:$true] %s14_s13 }
   0x2   :  { %p246_p0 = scmp.ne.s32.totalorder %s410_s0, %s245_s16  ;;  %p249_p1 = scmp.lt.u32.totalorder %s245_s16, %s410_s0 }
   0x4   :  { %p251_p2 = pnand %p249_p1, %p246_p0 }
   0x6   :  { %254 = shalt.err (!%p251_p2)
}
   0x7   :  { %s255_s21 = scalar_lea.vmem %s15_s13, 2048  ;;  %p260_p4 = scmp.lt.s32.totalorder %s15_s13, %s15_s13 }
   0x8   :  { %p256_p3 = scmp.ne.s32.totalorder %s15_s13, %s255_s21  ;;  %p261_p5 = scmp.lt.s32.totalorder %s255_s21, %s255_s21 }
   0xa   :  { %p262_p6 = por %p261_p5, %p260_p4 }
   0xc   :  { %p263_p7 = pnand %p262_p6, %p256_p3 }
   0xe   :  { %266 = shalt.err (!%p263_p7)
}
   0xf   :  { %s270_s22 = smov 128   ;;  %s271_s23 = smov 8  }
  0x10   :  { %20 = dma.hbm_to_vmem [thread:$0]  %s410_s0, 2048, %s15_s13, [#allocation3], %s270_s22, %s270_s22, %s271_s23  }
  0x11   :  { %267 = dma.done.wait [#allocation3], 2048  }
  0x12   :  { %268 = vsyncadd [#allocation3], 4294965248  ;;  %v28_v0 = vld [vmem:[#allocation2] sm:$0xff]  ;;  %v29_v4 = vld [vmem:[#allocation2 + $0x8] sm:$0xff]  ;;  %vm186_vm0 = vcmask 125952  }
  0x13   :  { %v307_v1 = vld [vmem:[%s411_s1] ss:$0 sm:$0xff]  ;;  %v30_v5 = vld [vmem:[#allocation2 + $0x10] sm:$0xff]  ;;  %v31_v6 = vld [vmem:[#allocation2 + $0x18] sm:$0xff] }
  0x14   :  { %v312_v2 = vld [vmem:[%s412_s2] ss:$0 sm:$0xff]  ;;  %v51_v3 = vmul.f32 %v307_v1, %v28_v0  ;;  %v52_v7 = vmul.f32 %v307_v1, %v29_v4  ;;  %v53_v8 = vmul.f32 %v307_v1, %v30_v5  ;;  %v54_v9 = vmul.f32 %v307_v1, %v31_v6  ;;  %v33_v11 = vld [vmem:[#allocation2 + $0x28] sm:$0xff]  ;;  %v34_v12 = vld [vmem:[#allocation2 + $0x30] sm:$0xff] }
  0x15   :  { %v32_v10 = vld [vmem:[#allocation2 + $0x20] sm:$0xff]  ;;  %v56_v15 = vmul.f32 %v307_v1, %v33_v11  ;;  %v57_v16 = vmul.f32 %v307_v1, %v34_v12  ;;  %v35_v17 = vld [vmem:[#allocation2 + $0x38] sm:$0xff]  ;;  %v37_v43 = vld [vmem:[#allocation2 + $0x48] sm:$0xff] }
  0x16   :  { %v74_v13 = vadd.f32 %v312_v2, %v51_v3  ;;  %v55_v14 = vmul.f32 %v307_v1, %v32_v10  ;;  %v75_v18 = vadd.f32 %v312_v2, %v52_v7  ;;  %v76_v19 = vadd.f32 %v312_v2, %v53_v8  ;;  %v36_v38 = vld [vmem:[#allocation2 + $0x40] sm:$0xff]  ;;  %v38_v44 = vld [vmem:[#allocation2 + $0x50] sm:$0xff]  ;;  %v39_v45 = vld [vmem:[#allocation2 + $0x58] sm:$0xff] }
  0x17   :  { %v77_v20 = vadd.f32 %v312_v2, %v54_v9  ;;  %v58_v21 = vmul.f32 %v307_v1, %v35_v17  ;;  %v79_v24 = vadd.f32 %v312_v2, %v56_v15  ;;  %v80_v25 = vadd.f32 %v312_v2, %v57_v16  ;;  %v40_v50 = vld [vmem:[#allocation2 + $0x60] sm:$0xff]  ;;  %v41_v51 = vld [vmem:[#allocation2 + $0x68] sm:$0xff]  ;;  %v42_v52 = vld [vmem:[#allocation2 + $0x70] sm:$0xff] }
  0x18   :  { %v90_v22 = vmax.f32 %v74_v13, 0.0  ;;  %v78_v23 = vadd.f32 %v312_v2, %v55_v14  ;;  %v91_v26 = vmax.f32 %v75_v18, 0.0  ;;  %v92_v27 = vmax.f32 %v76_v19, 0.0  ;;  %v43_v57 = vld [vmem:[#allocation2 + $0x78] sm:$0xff] }
  0x19   :  { %v93_v28 = vmax.f32 %v77_v20, 0.0  ;;  %v81_v29 = vadd.f32 %v312_v2, %v58_v21  ;;  %v95_v32 = vmax.f32 %v79_v24, 0.0  ;;  %v96_v33 = vmax.f32 %v80_v25, 0.0 }
  0x1a   :  { %v106_v30 = vmin.f32 %v90_v22, 6.0  ;;  %v94_v31 = vmax.f32 %v78_v23, 0.0  ;;  %v107_v34 = vmin.f32 %v91_v26, 6.0  ;;  %v108_v35 = vmin.f32 %v92_v27, 6.0 }
  0x1b   :  { %v109_v36 = vmin.f32 %v93_v28, 6.0  ;;  %v97_v37 = vmax.f32 %v81_v29, 0.0  ;;  %v111_v41 = vmin.f32 %v95_v32, 6.0  ;;  %v112_v42 = vmin.f32 %v96_v33, 6.0 }
  0x1c   :  { %v226_v39 = vpack.c.bf16 %v106_v30, %v106_v30  ;;  %v110_v40 = vmin.f32 %v94_v31, 6.0  ;;  %v227_v46 = vpack.c.bf16 %v107_v34, %v107_v34  ;;  %v228_v47 = vpack.c.bf16 %v108_v35, %v108_v35 }
  0x1d   :  { %v229_v48 = vpack.c.bf16 %v109_v36, %v109_v36  ;;  %v113_v49 = vmin.f32 %v97_v37, 6.0  ;;  %v231_v54 = vpack.c.bf16 %v111_v41, %v111_v41  ;;  %v232_v55 = vpack.c.bf16 %v112_v42, %v112_v42 }
  0x1e   :  { %187 = vst.msk [vmem:[%s413_s3] sm:$0xf] %vm186_vm0, %v226_v39  ;;  %v230_v53 = vpack.c.bf16 %v110_v40, %v110_v40  ;;  %v59_v56 = vmul.f32 %v307_v1, %v36_v38  ;;  %188 = vst.msk [vmem:[%s413_s3 + $0x4] sm:$0xf] %vm186_vm0, %v227_v46  ;;  %v60_v59 = vmul.f32 %v307_v1, %v37_v43 }
  0x1f   :  { %189 = vst.msk [vmem:[%s413_s3 + $0x8] sm:$0xf] %vm186_vm0, %v228_v47  ;;  %190 = vst.msk [vmem:[%s413_s3 + $0xc] sm:$0xf] %vm186_vm0, %v229_v48  ;;  %v233_v58 = vpack.c.bf16 %v113_v49, %v113_v49  ;;  %v61_v60 = vmul.f32 %v307_v1, %v38_v44  ;;  %v62_v61 = vmul.f32 %v307_v1, %v39_v45 }
  0x20   :  { %191 = vst.msk [vmem:[%s413_s3 + $0x10] sm:$0xf] %vm186_vm0, %v230_v53  ;;  %192 = vst.msk [vmem:[%s413_s3 + $0x14] sm:$0xf] %vm186_vm0, %v231_v54  ;;  %v82_v62 = vadd.f32 %v312_v2, %v59_v56  ;;  %v63_v63 = vmul.f32 %v307_v1, %v40_v50  ;;  %v64_v0 = vmul.f32 %v307_v1, %v41_v51 }
  0x21   :  { %193 = vst.msk [vmem:[%s413_s3 + $0x18] sm:$0xf] %vm186_vm0, %v232_v55  ;;  %v65_v3 = vmul.f32 %v307_v1, %v42_v52  ;;  %194 = vst.msk [vmem:[%s413_s3 + $0x1c] sm:$0xf] %vm186_vm0, %v233_v58  ;;  %v83_v4 = vadd.f32 %v312_v2, %v60_v59  ;;  %v84_v5 = vadd.f32 %v312_v2, %v61_v60 }
  0x22   :  { %v85_v6 = vadd.f32 %v312_v2, %v62_v61  ;;  %v66_v7 = vmul.f32 %v307_v1, %v43_v57  ;;  %v98_v8 = vmax.f32 %v82_v62, 0.0  ;;  %v86_v9 = vadd.f32 %v312_v2, %v63_v63 }
  0x23   :  { %v87_v10 = vadd.f32 %v312_v2, %v64_v0  ;;  %v88_v11 = vadd.f32 %v312_v2, %v65_v3  ;;  %v99_v12 = vmax.f32 %v83_v4, 0.0  ;;  %v100_v13 = vmax.f32 %v84_v5, 0.0 }
  0x24   :  { %v101_v14 = vmax.f32 %v85_v6, 0.0  ;;  %v89_v15 = vadd.f32 %v312_v2, %v66_v7  ;;  %v114_v16 = vmin.f32 %v98_v8, 6.0  ;;  %v102_v17 = vmax.f32 %v86_v9, 0.0 }
  0x25   :  { %v103_v18 = vmax.f32 %v87_v10, 0.0  ;;  %v104_v19 = vmax.f32 %v88_v11, 0.0  ;;  %v115_v20 = vmin.f32 %v99_v12, 6.0  ;;  %v116_v21 = vmin.f32 %v100_v13, 6.0 }
  0x26   :  { %v117_v22 = vmin.f32 %v101_v14, 6.0  ;;  %v105_v1 = vmax.f32 %v89_v15, 0.0  ;;  %v234_v23 = vpack.c.bf16 %v114_v16, %v114_v16  ;;  %v118_v24 = vmin.f32 %v102_v17, 6.0 }
  0x27   :  { %v119_v25 = vmin.f32 %v103_v18, 6.0  ;;  %v120_v26 = vmin.f32 %v104_v19, 6.0  ;;  %v235_v27 = vpack.c.bf16 %v115_v20, %v115_v20  ;;  %v236_v28 = vpack.c.bf16 %v116_v21, %v116_v21 }
  0x28   :  { %v237_v29 = vpack.c.bf16 %v117_v22, %v117_v22  ;;  %v121_v30 = vmin.f32 %v105_v1, 6.0  ;;  %195 = vst.msk [vmem:[%s413_s3 + $0x20] sm:$0xf] %vm186_vm0, %v234_v23  ;;  %v238_v2 = vpack.c.bf16 %v118_v24, %v118_v24 }
  0x29   :  { %v239_v31 = vpack.c.bf16 %v119_v25, %v119_v25  ;;  %v240_v32 = vpack.c.bf16 %v120_v26, %v120_v26  ;;  %196 = vst.msk [vmem:[%s413_s3 + $0x24] sm:$0xf] %vm186_vm0, %v235_v27  ;;  %197 = vst.msk [vmem:[%s413_s3 + $0x28] sm:$0xf] %vm186_vm0, %v236_v28 }
  0x2a   :  { %198 = vst.msk [vmem:[%s413_s3 + $0x2c] sm:$0xf] %vm186_vm0, %v237_v29  ;;  %v241_v33 = vpack.c.bf16 %v121_v30, %v121_v30  ;;  %199 = vst.msk [vmem:[%s413_s3 + $0x30] sm:$0xf] %vm186_vm0, %v238_v2 }
  0x2b   :  { %200 = vst.msk [vmem:[%s413_s3 + $0x34] sm:$0xf] %vm186_vm0, %v239_v31  ;;  %201 = vst.msk [vmem:[%s413_s3 + $0x38] sm:$0xf] %vm186_vm0, %v240_v32 }
  0x2c   :  { %202 = vst.msk [vmem:[%s413_s3 + $0x3c] sm:$0xf] %vm186_vm0, %v241_v33 }
  0x2d   :  { %207 = vsyncpa [#allocation3], 1 }

// kernel: block_d_forward.8
= control target key start
LH: loop header
LB: loop body
LE: loop exit
PB: predicated region body
PF: predicated region fallthrough
CT: control target
= control target key end

     0   :  { %vm86_vm0 = vcmask 130048   ;;  %vm208_vm1 = vcmask 392192   ;;  %s407_s1 = inlined_call_operand.vmem [shape: bf16[16,48], index: 1, kind: input, shape index: {}]   ;;  %s408_s0 = inlined_call_operand.vmem [shape: bf16[128,16], index: 0, kind: input, shape index: {}]   ;;  %s409_s2 = inlined_call_operand.vmem [shape: f32[1,48], index: 2, kind: input, shape index: {}]   ;;  %s410_s3 = inlined_call_operand.vmem [shape: f32[128,48], index: 3, kind: output, shape index: {}]  }
   0x1   :  { %v276_v0 = vld [vmem:[%s407_s1] sm:$0xff]   ;;  %v279_v3 = vld [vmem:[%s408_s0 + $0x8] sm:$0xff]   ;;  %v281_v5 = vld [vmem:[%s408_s0 + $0x10] sm:$0xff]  }
   0x2   :  { %v277_v1 = vld [vmem:[%s408_s0] sm:$0xff]   ;;  %256 = vmatprep.subr.bf16.mxu0 %v276_v0  ;;  %274 = vmatprep.subr.bf16.mxu1 %v276_v0  ;;  %v280_v4 = vld [vmem:[%s408_s0 + $0x28] sm:$0xff]   ;;  %v282_v6 = vld [vmem:[%s408_s0 + $0x30] sm:$0xff]  }
   0x3   :  { %v278_v2 = vld [vmem:[%s408_s0 + $0x20] sm:$0xff]   ;;  %257 = vmatpush3.bf16.msra.mxu0 %v276_v0  ;;  %275 = vmatpush3.bf16.msra.mxu1 %v276_v0  ;;  %v283_v7 = vld [vmem:[%s408_s0 + $0x18] sm:$0xff]  }
   0x4   :  { %258 = vmatprep.mubr.msk.bf16.mxu0 %vm86_vm0, %v277_v1  ;;  %266 = vmatprep.mubr.msk.bf16.mxu1 %vm86_vm0, %v278_v2  ;;  %v284_v8 = vld [vmem:[%s408_s0 + $0x38] sm:$0xff]   ;;  %v229_v9 = vld [vmem:[%s409_s2] ss:$0 sm:$0xff] }
   0x6   :  { %259 = vmatmul.mubr.msk.bf16.vlgmr.msra.gmra.mrb[0].mxu0 %vm86_vm0, %v279_v3  ;;  %267 = vmatmul.mubr.msk.bf16.vlgmr.msra.gmra.mrb[0].mxu1 %vm86_vm0, %v280_v4 }
   0x7   :  { %262 = vmatprep.mubr.msk.bf16.mxu0 %vm86_vm0, %v281_v5  ;;  %270 = vmatprep.mubr.msk.bf16.mxu1 %vm86_vm0, %v282_v6 }
   0xe   :  { %263 = vmatmul.mubr.msk.bf16.gmra.mrb[4].mxu0 %vm86_vm0, %v283_v7  ;;  %271 = vmatmul.mubr.msk.bf16.gmra.mrb[4].mxu1 %vm86_vm0, %v284_v8 }
  0xd9   :  { %v260_v10 = vpop.f32.mrb[0].mxu0  ;;  %v268_v11 = vpop.f32.mrb[0].mxu1 }
  0xda   :  { %v154_v12 = vadd.f32 %v260_v10, %v229_v9  ;;  %v186_v13 = vadd.f32 %v268_v11, %v229_v9  ;;  %v145_v14 = vpop.f32.mrb[1].mxu0  ;;  %v177_v15 = vpop.f32.mrb[1].mxu1 }
  0xdb   :  { %v146_v16 = vadd.f32 %v229_v9, %v145_v14  ;;  %v178_v17 = vadd.f32 %v229_v9, %v177_v15  ;;  %v261_v18 = vpop.f32.mrb[2].mxu0  ;;  %v269_v19 = vpop.f32.mrb[2].mxu1 }
  0xdc   :  { %211 = vst.msk [vmem:[%s410_s3 + $0x10] sm:$0xff] %vm208_vm1, %v154_v12  ;;  %219 = vst.msk [vmem:[%s410_s3 + $0x50] sm:$0xff] %vm208_vm1, %v186_v13  ;;  %v157_v20 = vadd.f32 %v261_v18, %v229_v9  ;;  %v189_v21 = vadd.f32 %v269_v19, %v229_v9  ;;  %v148_v22 = vpop.f32.mrb[3].mxu0  ;;  %v180_v23 = vpop.f32.mrb[3].mxu1 }
  0xdd   :  { %209 = vst.msk [vmem:[%s410_s3] sm:$0xff] %vm208_vm1, %v146_v16  ;;  %217 = vst.msk [vmem:[%s410_s3 + $0x40] sm:$0xff] %vm208_vm1, %v178_v17  ;;  %v149_v24 = vadd.f32 %v229_v9, %v148_v22  ;;  %v181_v25 = vadd.f32 %v229_v9, %v180_v23 }
  0xde   :  { %212 = vst.msk [vmem:[%s410_s3 + $0x18] sm:$0xff] %vm208_vm1, %v157_v20  ;;  %220 = vst.msk [vmem:[%s410_s3 + $0x58] sm:$0xff] %vm208_vm1, %v189_v21 }
  0xdf   :  { %210 = vst.msk [vmem:[%s410_s3 + $0x8] sm:$0xff] %vm208_vm1, %v149_v24  ;;  %218 = vst.msk [vmem:[%s410_s3 + $0x48] sm:$0xff] %vm208_vm1, %v181_v25 }
  0xe1   :  { %v264_v26 = vpop.f32.mrb[4].mxu0  ;;  %v272_v27 = vpop.f32.mrb[4].mxu1 }
  0xe2   :  { %v170_v28 = vadd.f32 %v264_v26, %v229_v9  ;;  %v202_v29 = vadd.f32 %v272_v27, %v229_v9  ;;  %v161_v30 = vpop.f32.mrb[5].mxu0  ;;  %v193_v31 = vpop.f32.mrb[5].mxu1 }
  0xe3   :  { %v162_v32 = vadd.f32 %v229_v9, %v161_v30  ;;  %v194_v33 = vadd.f32 %v229_v9, %v193_v31  ;;  %v265_v34 = vpop.f32.mrb[6].mxu0  ;;  %v273_v35 = vpop.f32.mrb[6].mxu1 }
  0xe4   :  { %215 = vst.msk [vmem:[%s410_s3 + $0x30] sm:$0xff] %vm208_vm1, %v170_v28  ;;  %223 = vst.msk [vmem:[%s410_s3 + $0x70] sm:$0xff] %vm208_vm1, %v202_v29  ;;  %v173_v36 = vadd.f32 %v265_v34, %v229_v9  ;;  %v205_v37 = vadd.f32 %v273_v35, %v229_v9  ;;  %v164_v38 = vpop.f32.mrb[7].mxu0  ;;  %v196_v39 = vpop.f32.mrb[7].mxu1 }
  0xe5   :  { %213 = vst.msk [vmem:[%s410_s3 + $0x20] sm:$0xff] %vm208_vm1, %v162_v32  ;;  %221 = vst.msk [vmem:[%s410_s3 + $0x60] sm:$0xff] %vm208_vm1, %v194_v33  ;;  %v165_v40 = vadd.f32 %v229_v9, %v164_v38  ;;  %v197_v41 = vadd.f32 %v229_v9, %v196_v39 }
  0xe6   :  { %216 = vst.msk [vmem:[%s410_s3 + $0x38] sm:$0xff] %vm208_vm1, %v173_v36  ;;  %224 = vst.msk [vmem:[%s410_s3 + $0x78] sm:$0xff] %vm208_vm1, %v205_v37 }
  0xe7   :  { %214 = vst.msk [vmem:[%s410_s3 + $0x28] sm:$0xff] %vm208_vm1, %v165_v40  ;;  %222 = vst.msk [vmem:[%s410_s3 + $0x68] sm:$0xff] %vm208_vm1, %v197_v41 }

// kernel: block_d_forward.9
= control target key start
LH: loop header
LB: loop body
LE: loop exit
PB: predicated region body
PF: predicated region fallthrough
CT: control target
= control target key end

     0   :  { %s1535_s12 = smov 0   ;;  %s1882_s0 = inlined_call_operand.vmem [shape: f32[2,2,64,8], index: 0, kind: input, shape index: {}]   ;;  %s1883_s1 = inlined_call_operand.vmem [shape: f32[2,2,64,8], index: 1, kind: input, shape index: {}]   ;;  %s1884_s2 = inlined_call_operand.vmem [shape: f32[2,2,64,8], index: 2, kind: input, shape index: {}]   ;;  %s1885_s3 = inlined_call_operand.vmem [shape: f32[2,2,64,8], index: 3, kind: output, shape index: {}]  }
   0x1 LB: > { %s1112_s13 = sadd.s32 4294967295, %s1513_s12   ;;  %p1116_p0 = scmp.ge.s32.totalorder %s1513_s12, 1  ;;  %s1513_s12 = sphi %s1535_s12, %s13_s12  }
   0x2   : > { %p157_p1 = scmp.lt.s32.totalorder %s1513_s12, 3 }
   0x4   : > { %p158_p2 = pnand %p1116_p0, %p157_p1 }
   0x5   : > { %p191_p3 = scmp.lt.s32.totalorder (!%p158_p2), %s1112_s13, 1  ;;  %vm259_vm0 = vcmask (!%p158_p2), 64512   ;;  %vm582_vm2 = vcmask (!%p158_p2), 523264  }
   0x6   : > { %161 = sbr.rel (%p158_p2) target bundleno = 825 (0x339), region = 32  ;;  %vm1553_vm1 = vmpackc.low (!%p158_p2), %vm259_vm0, %vm259_vm0 }
   0xd   : > { %s1889_s13 = smov (!%p191_p3, %s1112_s13), 1 }
   0xe   : > { %s1543_s14 = sshll.u32 %s1889_s13, 7 }
   0xf   : > { %s1549_s17 = scalar_lea.vmem %s1883_s1, %s1543_s14  ;;  %s1569_s20 = scalar_lea.vmem %s1882_s0, %s1543_s14 }
  0x10   : > { %v227_v1 = vld [vmem:[%s1549_s17] sm:$0xff]  ;;  %v228_v2 = vld [vmem:[%s1549_s17 + $0x8] sm:$0xff]  ;;  %v229_v6 = vld [vmem:[%s1549_s17 + $0x10] sm:$0xff]  ;;  %s1756_s23 = scalar_lea.vmem %s1884_s2, %s1543_s14  ;;  %s1845_s26 = scalar_lea.vmem %s1885_s3, %s1543_s14 }
  0x11   : > { %v235_v3 = vld [vmem:[%s1549_s17 + $0x40] sm:$0xff]  ;;  %v1355_v4 = vpack.c.bf16 %v228_v2, %v227_v1  ;;  %v236_v5 = vld [vmem:[%s1549_s17 + $0x48] sm:$0xff]  ;;  %v230_v7 = vld [vmem:[%s1549_s17 + $0x18] sm:$0xff] }
  0x12   : > { %v1379_v8 = vpack.c.bf16 %v236_v5, %v235_v3  ;;  %v1361_v9 = vpack.c.bf16 %v230_v7, %v229_v6  ;;  %v237_v10 = vld [vmem:[%s1549_s17 + $0x50] sm:$0xff]  ;;  %v238_v11 = vld [vmem:[%s1549_s17 + $0x58] sm:$0xff]  ;;  %v211_v13 = vld [vmem:[%s1569_s20] sm:$0xff] }
  0x13   : > { %1357 = vmatprep.subr.msk.bf16.mxu0 %vm1553_vm1, %v1355_v4  ;;  %v1385_v12 = vpack.c.bf16 %v238_v11, %v237_v10  ;;  %v231_v14 = vld [vmem:[%s1549_s17 + $0x20] sm:$0xff]  ;;  %v232_v15 = vld [vmem:[%s1549_s17 + $0x28] sm:$0xff]  ;;  %1259 = vmatprep.mubr.msk.f32.mxu0 %vm259_vm0, %v211_v13  ;;  %v233_v21 = vld [vmem:[%s1549_s17 + $0x30] sm:$0xff] }
  0x14   : > { %1360 = vmatpush3.bf16.xpose.msk.msra.mxu0 %vm1553_vm1, %v1355_v4  ;;  %1381 = vmatprep.subr.msk.bf16.mxu1 %vm1553_vm1, %v1379_v8  ;;  %v219_v16 = vld [vmem:[%s1569_s20 + $0x40] sm:$0xff]  ;;  %v240_v18 = vld [vmem:[%s1549_s17 + $0x68] sm:$0xff]  ;;  %v1367_v19 = vpack.c.bf16 %v232_v15, %v231_v14  ;;  %v234_v22 = vld [vmem:[%s1549_s17 + $0x38] sm:$0xff] }
  0x15   : > { %1384 = vmatpush3.bf16.xpose.msk.msra.mxu1 %vm1553_vm1, %v1379_v8  ;;  %1363 = vmatprep.subr.msk.bf16.mxu0 %vm1553_vm1, %v1361_v9  ;;  %v239_v17 = vld [vmem:[%s1549_s17 + $0x60] sm:$0xff]  ;;  %v241_v23 = vld [vmem:[%s1549_s17 + $0x70] sm:$0xff]  ;;  %v242_v24 = vld [vmem:[%s1549_s17 + $0x78] sm:$0xff]  ;;  %v1373_v25 = vpack.c.bf16 %v234_v22, %v233_v21 }
  0x16   : > { %1387 = vmatprep.subr.msk.bf16.mxu1 %vm1553_vm1, %v1385_v12  ;;  %1287 = vmatprep.mubr.msk.f32.mxu1 %vm259_vm0, %v219_v16  ;;  %v1391_v20 = vpack.c.bf16 %v240_v18, %v239_v17  ;;  %v1397_v26 = vpack.c.bf16 %v242_v24, %v241_v23  ;;  %v212_v27 = vld [vmem:[%s1569_s20 + $0x8] sm:$0xff]  ;;  %v213_v29 = vld [vmem:[%s1569_s20 + $0x10] sm:$0xff]  ;;  %v214_v31 = vld [vmem:[%s1569_s20 + $0x18] sm:$0xff] }
  0x17   : > { %v220_v28 = vld [vmem:[%s1569_s20 + $0x48] sm:$0xff]  ;;  %v221_v30 = vld [vmem:[%s1569_s20 + $0x50] sm:$0xff]  ;;  %v222_v32 = vld [vmem:[%s1569_s20 + $0x58] sm:$0xff] }
  0x18   : > { %v215_v33 = vld [vmem:[%s1569_s20 + $0x20] sm:$0xff]  ;;  %v216_v35 = vld [vmem:[%s1569_s20 + $0x28] sm:$0xff]  ;;  %v217_v37 = vld [vmem:[%s1569_s20 + $0x30] sm:$0xff] }
  0x19   : > { %v223_v34 = vld [vmem:[%s1569_s20 + $0x60] sm:$0xff]  ;;  %v224_v36 = vld [vmem:[%s1569_s20 + $0x68] sm:$0xff]  ;;  %v225_v38 = vld [vmem:[%s1569_s20 + $0x70] sm:$0xff] }
  0x1a   : > { %v218_v39 = vld [vmem:[%s1569_s20 + $0x38] sm:$0xff] }
  0x1b   : > { %v226_v40 = vld [vmem:[%s1569_s20 + $0x78] sm:$0xff] }
  0x1c   : > { %1366 = vmatpush3.bf16.xpose.msk.msra.mxu0 %vm1553_vm1, %v1361_v9 }
  0x1d   : > { %1390 = vmatpush3.bf16.xpose.msk.msra.mxu1 %vm1553_vm1, %v1385_v12  ;;  %1369 = vmatprep.subr.msk.bf16.mxu0 %vm1553_vm1, %v1367_v19 }
  0x1e   : > { %1393 = vmatprep.subr.msk.bf16.mxu1 %vm1553_vm1, %v1391_v20 }
  0x24   : > { %1372 = vmatpush3.bf16.xpose.msk.msra.mxu0 %vm1553_vm1, %v1367_v19 }
  0x25   : > { %1396 = vmatpush3.bf16.xpose.msk.msra.mxu1 %vm1553_vm1, %v1391_v20  ;;  %1375 = vmatprep.subr.msk.bf16.mxu0 %vm1553_vm1, %v1373_v25 }
  0x26   : > { %1399 = vmatprep.subr.msk.bf16.mxu1 %vm1553_vm1, %v1397_v26 }
  0x2c   : > { %1378 = vmatpush3.bf16.xpose.msk.msra.mxu0 %vm1553_vm1, %v1373_v25 }
  0x2d   : > { %1402 = vmatpush3.bf16.xpose.msk.msra.mxu1 %vm1553_vm1, %v1397_v26 }
  0x33   : > { %1260 = vmatmul.mubr.msk.f32.vlgmr.msra.gmra.mrb[0].mxu0 %vm259_vm0, %v212_v27 }
  0x34   : > { %1288 = vmatmul.mubr.msk.f32.vlgmr.msra.gmra.mrb[0].mxu1 %vm259_vm0, %v220_v28  ;;  %1262 = vmatprep.mubr.msk.f32.mxu0 %vm259_vm0, %v213_v29 }
  0x35   : > { %1290 = vmatprep.mubr.msk.f32.mxu1 %vm259_vm0, %v221_v30 }
  0x37   : > { %1263 = vmatmul.mubr.msk.f32.gmra.mrb[2].mxu0 %vm259_vm0, %v214_v31 }
  0x38   : > { %1291 = vmatmul.mubr.msk.f32.gmra.mrb[2].mxu1 %vm259_vm0, %v222_v32  ;;  %1265 = vmatprep.mubr.msk.f32.mxu0 %vm259_vm0, %v215_v33 }
  0x39   : > { %1293 = vmatprep.mubr.msk.f32.mxu1 %vm259_vm0, %v223_v34 }
  0x3b   : > { %1266 = vmatmul.mubr.msk.f32.gmra.mrb[4].mxu0 %vm259_vm0, %v216_v35 }
  0x3c   : > { %1294 = vmatmul.mubr.msk.f32.gmra.mrb[4].mxu1 %vm259_vm0, %v224_v36  ;;  %1268 = vmatprep.mubr.msk.f32.mxu0 %vm259_vm0, %v217_v37 }
  0x3d   : > { %1296 = vmatprep.mubr.msk.f32.mxu1 %vm259_vm0, %v225_v38 }
  0x3f   : > { %1269 = vmatmul.mubr.msk.f32.gmra.mrb[6].mxu0 %vm259_vm0, %v218_v39 }
  0x40   : > { %1297 = vmatmul.mubr.msk.f32.gmra.mrb[6].mxu1 %vm259_vm0, %v226_v40 }
 0x106   : > { %v1261_v41 = vpop.f32.mrb[0].mxu0 }
 0x107   : > { %v1643_v42 = vmul.f32 0.35355338, %v1261_v41  ;;  %v374_v43 = vpop.f32.mrb[1].mxu0  ;;  %v1289_v44 = vpop.f32.mrb[0].mxu1 }
 0x108   : > { %v1645_v45 = vmul.f32 0.35355338, %v374_v43  ;;  %v1647_v46 = vmul.f32 0.35355338, %v1289_v44  ;;  %v527_v47 = vpop.f32.mrb[1].mxu1 }
 0x109   : > { %v1649_v48 = vmul.f32 0.35355338, %v527_v47  ;;  %v586_v49 = vsel %vm582_vm2, %v1643_v42, -inf }
 0x10a   : > { %587 = vmax.xlane.f32.xlu1 %v586_v49  ;;  %v583_v50 = vsel %vm582_vm2, %v1645_v45, -inf  ;;  %v1264_v51 = vpop.f32.mrb[2].mxu0  ;;  %v610_v53 = vsel %vm582_vm2, %v1647_v46, -inf }
 0x10b   : > { %584 = vmax.xlane.f32.xlu0 %v583_v50  ;;  %v1292_v52 = vpop.f32.mrb[2].mxu1  ;;  %v384_v54 = vpop.f32.mrb[3].mxu0  ;;  %v607_v56 = vsel %vm582_vm2, %v1649_v48, -inf  ;;  %v1661_v57 = vmul.f32 0.35355338, %v1264_v51 }
 0x10c   : > { %v1657_v55 = vmul.f32 0.35355338, %v1292_v52  ;;  %v537_v58 = vpop.f32.mrb[3].mxu1  ;;  %v1667_v0 = vmul.f32 0.35355338, %v384_v54 }
 0x10d   : > { %v1663_v60 = vmul.f32 0.35355338, %v537_v58  ;;  %v592_v1 = vsel %vm582_vm2, %v1661_v57, -inf }
 0x10e   : > { %611 = vmax.xlane.f32.xlu1 %v610_v53  ;;  %v1267_v59 = vpop.f32.mrb[4].mxu0  ;;  %v616_v61 = vsel %vm582_vm2, %v1657_v55, -inf  ;;  %v589_v8 = vsel %vm582_vm2, %v1667_v0, -inf }
 0x10f   : > { %608 = vmax.xlane.f32.xlu0 %v607_v56  ;;  %v1295_v62 = vpop.f32.mrb[4].mxu1  ;;  %v394_v63 = vpop.f32.mrb[5].mxu0  ;;  %v613_v5 = vsel %vm582_vm2, %v1663_v60, -inf  ;;  %v1677_v9 = vmul.f32 0.35355338, %v1267_v59 }
 0x110   : > { %v547_v2 = vpop.f32.mrb[5].mxu1  ;;  %v1671_v4 = vmul.f32 0.35355338, %v1295_v62  ;;  %v1683_v13 = vmul.f32 0.35355338, %v394_v63 }
 0x111   : > { %v1679_v11 = vmul.f32 0.35355338, %v547_v2  ;;  %v598_v14 = vsel %vm582_vm2, %v1677_v9, -inf }
 0x112   : > { %617 = vmax.xlane.f32.xlu1 %v616_v61  ;;  %v1270_v3 = vpop.f32.mrb[6].mxu0  ;;  %v622_v12 = vsel %vm582_vm2, %v1671_v4, -inf  ;;  %v595_v17 = vsel %vm582_vm2, %v1683_v13, -inf }
 0x113   : > { %593 = vmax.xlane.f32.xlu0 %v592_v1  ;;  %v1298_v6 = vpop.f32.mrb[6].mxu1  ;;  %v404_v7 = vpop.f32.mrb[7].mxu0  ;;  %v619_v16 = vsel %vm582_vm2, %v1679_v11, -inf  ;;  %v1701_v22 = vmul.f32 0.35355338, %v1270_v3 }
 0x114   : > { %v557_v10 = vpop.f32.mrb[7].mxu1  ;;  %v1693_v18 = vmul.f32 0.35355338, %v404_v7  ;;  %v1695_v19 = vmul.f32 0.35355338, %v1298_v6 }
 0x115   : > { %v1687_v15 = vmul.f32 0.35355338, %v557_v10  ;;  %v604_v24 = vsel %vm582_vm2, %v1701_v22, -inf }
 0x116   : > { %614 = vmax.xlane.f32.xlu1 %v613_v5  ;;  %v601_v21 = vsel %vm582_vm2, %v1693_v18, -inf  ;;  %v628_v23 = vsel %vm582_vm2, %v1695_v19, -inf }
 0x117   : > { %590 = vmax.xlane.f32.xlu0 %v589_v8  ;;  %v625_v20 = vsel %vm582_vm2, %v1687_v15, -inf }
 0x11a   : > { %623 = vmax.xlane.f32.xlu1 %v622_v12 }
 0x11b   : > { %599 = vmax.xlane.f32.xlu0 %v598_v14 }
 0x11e   : > { %620 = vmax.xlane.f32.xlu1 %v619_v16 }
 0x11f   : > { %596 = vmax.xlane.f32.xlu0 %v595_v17 }
 0x122   : > { %626 = vmax.xlane.f32.xlu1 %v625_v20 }
 0x123   : > { %602 = vmax.xlane.f32.xlu0 %v601_v21 }
 0x126   : > { %629 = vmax.xlane.f32.xlu1 %v628_v23 }
 0x127   : > { %605 = vmax.xlane.f32.xlu0 %v604_v24  ;;  %v243_v24 = vld [vmem:[%s1756_s23] sm:$0xff] }
 0x197   : > { %v588_v25 = vpop.xlane.xlu1 %587 }
 0x198   : > { %v632_v26 = vsub.f32 %v1643_v42, %v588_v25  ;;  %v585_v27 = vpop.xlane.xlu0 %584  ;;  %v244_v25 = vld [vmem:[%s1756_s23 + $0x8] sm:$0xff] }
 0x199   : > { %v631_v28 = vsub.f32 %v1645_v45, %v585_v27 }
 0x19a   : > { %v649_v29 = vmul.f32 1.442695, %v632_v26  ;;  %v1403_v26 = vpack.c.bf16 %v244_v25, %v243_v24 }
 0x19b   : > { %v647_v30 = vmul.f32 1.442695, %v631_v28  ;;  %v612_v31 = vpop.xlane.xlu1 %611 }
 0x19c   : > { %1443 = vpow2.f32 %v649_v29  ;;  %v640_v32 = vsub.f32 %v1647_v46, %v612_v31  ;;  %v609_v33 = vpop.xlane.xlu0 %608  ;;  %1404 = vmatprep.subr.bf16.mxu0 %v1403_v26  ;;  %v245_v31 = vld [vmem:[%s1756_s23 + $0x10] sm:$0xff] }
 0x19d   : > { %v639_v34 = vsub.f32 %v1649_v48, %v609_v33  ;;  %1445 = vpow2.f32 %v647_v30  ;;  %1406 = vmatpush3.bf16.msra.mxu0 %v1403_v26  ;;  %v251_v33 = vld [vmem:[%s1756_s23 + $0x40] sm:$0xff] }
 0x19e   : > { %v665_v35 = vmul.f32 1.442695, %v640_v32  ;;  %v246_v32 = vld [vmem:[%s1756_s23 + $0x18] sm:$0xff] }
 0x19f   : > { %v663_v36 = vmul.f32 1.442695, %v639_v34  ;;  %v618_v37 = vpop.xlane.xlu1 %617 }
 0x1a0   : > { %1447 = vpow2.f32 %v665_v35  ;;  %v642_v38 = vsub.f32 %v1657_v55, %v618_v37  ;;  %v594_v39 = vpop.xlane.xlu0 %593  ;;  %v252_v37 = vld [vmem:[%s1756_s23 + $0x48] sm:$0xff] }
 0x1a1   : > { %v634_v40 = vsub.f32 %v1661_v57, %v594_v39  ;;  %1449 = vpow2.f32 %v663_v36  ;;  %v1407_v36 = vpack.c.bf16 %v246_v32, %v245_v31 }
 0x1a2   : > { %v669_v41 = vmul.f32 1.442695, %v642_v38 }
 0x1a3   : > { %v653_v42 = vmul.f32 1.442695, %v634_v40  ;;  %v615_v43 = vpop.xlane.xlu1 %614  ;;  %v1419_v40 = vpack.c.bf16 %v252_v37, %v251_v33  ;;  %1408 = vmatprep.subr.bf16.mxu0 %v1407_v36 }
 0x1a4   : > { %v641_v44 = vsub.f32 %v1663_v60, %v615_v43  ;;  %v591_v45 = vpop.xlane.xlu0 %590  ;;  %1410 = vmatpush3.bf16.msra.mxu0 %v1407_v36  ;;  %v253_v43 = vld [vmem:[%s1756_s23 + $0x50] sm:$0xff] }
 0x1a5   : > { %1451 = vpow2.f32 %v653_v42  ;;  %v633_v46 = vsub.f32 %v1667_v0, %v591_v45  ;;  %1420 = vmatprep.subr.bf16.mxu1 %v1419_v40  ;;  %v248_v42 = vld [vmem:[%s1756_s23 + $0x28] sm:$0xff] }
 0x1a6   : > { %v1715_v47 = vpop.eup %1443  ;;  %1453 = vpow2.f32 %v669_v41  ;;  %v667_v48 = vmul.f32 1.442695, %v641_v44  ;;  %v247_v41 = vld [vmem:[%s1756_s23 + $0x20] sm:$0xff]  ;;  %1422 = vmatpush3.bf16.msra.mxu1 %v1419_v40 }
 0x1a7   : > { %v651_v49 = vmul.f32 1.442695, %v633_v46  ;;  %v624_v50 = vpop.xlane.xlu1 %623  ;;  %v682_v51 = vsel %vm582_vm2, %v1715_v47, 0.0  ;;  %v1719_v52 = vpop.eup %1445  ;;  %v1411_v46 = vpack.c.bf16 %v248_v42, %v247_v41 }
 0x1a8   : > { %v644_v53 = vsub.f32 %v1671_v4, %v624_v50  ;;  %v600_v54 = vpop.xlane.xlu0 %599  ;;  %683 = vadd.xlane.f32.xlu0 %v682_v51  ;;  %v679_v61 = vsel %vm582_vm2, %v1719_v52, 0.0 }
 0x1a9   : > { %1455 = vpow2.f32 %v651_v49  ;;  %v636_v55 = vsub.f32 %v1677_v9, %v600_v54  ;;  %1412 = vmatprep.subr.bf16.mxu0 %v1411_v46  ;;  %v250_v54 = vld [vmem:[%s1756_s23 + $0x38] sm:$0xff] }
 0x1aa   : > { %v1723_v56 = vpop.eup %1447  ;;  %1457 = vpow2.f32 %v667_v48  ;;  %v673_v57 = vmul.f32 1.442695, %v644_v53  ;;  %v254_v48 = vld [vmem:[%s1756_s23 + $0x58] sm:$0xff]  ;;  %1414 = vmatpush3.bf16.msra.mxu0 %v1411_v46  ;;  %v249_v53 = vld [vmem:[%s1756_s23 + $0x30] sm:$0xff] }
 0x1ab   : > { %v657_v58 = vmul.f32 1.442695, %v636_v55  ;;  %v621_v59 = vpop.xlane.xlu1 %620  ;;  %v706_v60 = vsel %vm582_vm2, %v1723_v56, 0.0  ;;  %v1729_v62 = vpop.eup %1449  ;;  %v1423_v51 = vpack.c.bf16 %v254_v48, %v253_v43  ;;  %v255_v55 = vld [vmem:[%s1756_s23 + $0x60] sm:$0xff] }
 0x1ac   : > { %v643_v63 = vsub.f32 %v1679_v11, %v621_v59  ;;  %707 = vadd.xlane.f32.xlu1 %v706_v60  ;;  %v597_v0 = vpop.xlane.xlu0 %596  ;;  %680 = vadd.xlane.f32.xlu0 %v679_v61  ;;  %v703_v6 = vsel %vm582_vm2, %v1729_v62, 0.0  ;;  %v1415_v59 = vpack.c.bf16 %v250_v54, %v249_v53  ;;  %v256_v60 = vld [vmem:[%s1756_s23 + $0x68] sm:$0xff] }
 0x1ad   : > { %1459 = vpow2.f32 %v657_v58  ;;  %v635_v1 = vsub.f32 %v1683_v13, %v597_v0  ;;  %1424 = vmatprep.subr.bf16.mxu1 %v1423_v51  ;;  %v1427_v0 = vpack.c.bf16 %v256_v60, %v255_v55 }
 0x1ae   : > { %1461 = vpow2.f32 %v673_v57  ;;  %v671_v2 = vmul.f32 1.442695, %v643_v63  ;;  %1426 = vmatpush3.bf16.msra.mxu1 %v1423_v51  ;;  %1416 = vmatprep.subr.bf16.mxu0 %v1415_v59 }
 0x1af   : > { %v1733_v3 = vpop.eup %1451  ;;  %v655_v4 = vmul.f32 1.442695, %v635_v1  ;;  %v627_v5 = vpop.xlane.xlu1 %626  ;;  %1428 = vmatprep.subr.bf16.mxu1 %v1427_v0  ;;  %1418 = vmatpush3.bf16.msra.mxu0 %v1415_v59  ;;  %v257_v1 = vld [vmem:[%s1756_s23 + $0x70] sm:$0xff] }
 0x1b0   : > { %v1737_v7 = vpop.eup %1453  ;;  %v645_v8 = vsub.f32 %v1687_v15, %v627_v5  ;;  %704 = vadd.xlane.f32.xlu1 %v703_v6  ;;  %v603_v9 = vpop.xlane.xlu0 %602  ;;  %v688_v10 = vsel %vm582_vm2, %v1733_v3, 0.0 }
 0x1b1   : > { %1463 = vpow2.f32 %v655_v4  ;;  %v637_v11 = vsub.f32 %v1693_v18, %v603_v9  ;;  %689 = vadd.xlane.f32.xlu0 %v688_v10  ;;  %v712_v17 = vsel %vm582_vm2, %v1737_v7, 0.0 }
 0x1b2   : > { %1465 = vpow2.f32 %v671_v2  ;;  %v675_v12 = vmul.f32 1.442695, %v645_v8  ;;  %v258_v2 = vld [vmem:[%s1756_s23 + $0x78] sm:$0xff]  ;;  %1430 = vmatpush3.bf16.msra.mxu1 %v1427_v0 }
 0x1b3   : > { %v1743_v13 = vpop.eup %1455  ;;  %v659_v14 = vmul.f32 1.442695, %v637_v11  ;;  %v630_v16 = vpop.xlane.xlu1 %629  ;;  %v1431_v5 = vpack.c.bf16 %v258_v2, %v257_v1 }
 0x1b4   : > { %v1747_v15 = vpop.eup %1457  ;;  %v646_v20 = vsub.f32 %v1695_v19, %v630_v16  ;;  %713 = vadd.xlane.f32.xlu1 %v712_v17  ;;  %v606_v21 = vpop.xlane.xlu0 %605  ;;  %v685_v23 = vsel %vm582_vm2, %v1743_v13, 0.0 }
 0x1b5   : > { %1467 = vpow2.f32 %v659_v14  ;;  %v638_v18 = vsub.f32 %v1701_v22, %v606_v21  ;;  %686 = vadd.xlane.f32.xlu0 %v685_v23  ;;  %v709_v29 = vsel %vm582_vm2, %v1747_v15, 0.0  ;;  %1432 = vmatprep.subr.bf16.mxu1 %v1431_v5 }
 0x1b6   : > { %1469 = vpow2.f32 %v675_v12  ;;  %v677_v19 = vmul.f32 1.442695, %v646_v20  ;;  %1434 = vmatpush3.bf16.msra.mxu1 %v1431_v5 }
 0x1b7   : > { %v1761_v27 = vpop.eup %1459  ;;  %v661_v28 = vmul.f32 1.442695, %v638_v18 }
 0x1b8   : > { %v1765_v30 = vpop.eup %1461  ;;  %710 = vadd.xlane.f32.xlu1 %v709_v29  ;;  %v694_v22 = vsel %vm582_vm2, %v1761_v27, 0.0 }
 0x1b9   : > { %1471 = vpow2.f32 %v661_v28  ;;  %695 = vadd.xlane.f32.xlu0 %v694_v22  ;;  %v718_v35 = vsel %vm582_vm2, %v1765_v30, 0.0 }
 0x1ba   : > { %1473 = vpow2.f32 %v677_v19 }
 0x1bb   : > { %v1772_v34 = vpop.eup %1463 }
 0x1bc   : > { %v1777_v38 = vpop.eup %1465  ;;  %719 = vadd.xlane.f32.xlu1 %v718_v35  ;;  %v691_v39 = vsel %vm582_vm2, %v1772_v34, 0.0 }
 0x1bd   : > { %692 = vadd.xlane.f32.xlu0 %v691_v39  ;;  %v715_v45 = vsel %vm582_vm2, %v1777_v38, 0.0 }
 0x1bf   : > { %v1784_v44 = vpop.eup %1467 }
 0x1c0   : > { %v1789_v49 = vpop.eup %1469  ;;  %716 = vadd.xlane.f32.xlu1 %v715_v45  ;;  %v697_v50 = vsel %vm582_vm2, %v1784_v44, 0.0 }
 0x1c1   : > { %698 = vadd.xlane.f32.xlu0 %v697_v50  ;;  %v721_v58 = vsel %vm582_vm2, %v1789_v49, 0.0 }
 0x1c3   : > { %v1796_v57 = vpop.eup %1471 }
 0x1c4   : > { %v1801_v61 = vpop.eup %1473  ;;  %722 = vadd.xlane.f32.xlu1 %v721_v58  ;;  %v700_v63 = vsel %vm582_vm2, %v1796_v57, 0.0 }
 0x1c5   : > { %701 = vadd.xlane.f32.xlu0 %v700_v63  ;;  %v724_v4 = vsel %vm582_vm2, %v1801_v61, 0.0 }
 0x1c8   : > { %725 = vadd.xlane.f32.xlu1 %v724_v4 }
 0x235   : > { %v684_v6 = vpop.xlane.xlu0 %683 }
 0x236   : > { %1475 = vrcp.f32 %v684_v6 }
 0x239   : > { %v708_v8 = vpop.xlane.xlu1 %707  ;;  %v681_v9 = vpop.xlane.xlu0 %680 }
 0x23a   : > { %1477 = vrcp.f32 %v681_v9 }
 0x23b   : > { %1479 = vrcp.f32 %v708_v8 }
 0x23d   : > { %v705_v10 = vpop.xlane.xlu1 %704 }
 0x23e   : > { %1481 = vrcp.f32 %v705_v10  ;;  %v690_v11 = vpop.xlane.xlu0 %689 }
 0x23f   : > { %1483 = vrcp.f32 %v690_v11 }
 0x240   : > { %v1476_v16 = vpop.eup %1475 }
 0x241   : > { %v714_v12 = vpop.xlane.xlu1 %713  ;;  %v744_v24 = vmul.f32 %v1476_v16, %v1715_v47 }
 0x242   : > { %v687_v14 = vpop.xlane.xlu0 %686 }
 0x243   : > { %1485 = vrcp.f32 %v687_v14 }
 0x244   : > { %v1478_v17 = vpop.eup %1477  ;;  %1487 = vrcp.f32 %v714_v12 }
 0x245   : > { %v711_v20 = vpop.xlane.xlu1 %710  ;;  %v743_v23 = vmul.f32 %v1478_v17, %v1719_v52  ;;  %v1480_v18 = vpop.eup %1479 }
 0x246   : > { %1489 = vrcp.f32 %v711_v20  ;;  %v696_v21 = vpop.xlane.xlu0 %695  ;;  %v752_v28 = vmul.f32 %v1480_v18, %v1723_v56 }
 0x247   : > { %1315 = vmatprep.mubr.msk.f32.mxu0 %vm582_vm2, %v743_v23  ;;  %1491 = vrcp.f32 %v696_v21 }
 0x248   : > { %v1482_v25 = vpop.eup %1481  ;;  %1316 = vmatmul.mubr.msk.f32.vlgmr.msra.gmra.mrb[8].mxu0 %vm582_vm2, %v744_v24 }
 0x249   : > { %v720_v19 = vpop.xlane.xlu1 %719  ;;  %v751_v26 = vmul.f32 %v1482_v25, %v1729_v62  ;;  %v1484_v22 = vpop.eup %1483 }
 0x24a   : > { %v693_v29 = vpop.xlane.xlu0 %692  ;;  %v746_v62 = vmul.f32 %v1484_v22, %v1733_v3 }
 0x24b   : > { %1493 = vrcp.f32 %v693_v29  ;;  %1343 = vmatprep.mubr.msk.f32.mxu1 %vm582_vm2, %v751_v26 }
 0x24c   : > { %1344 = vmatmul.mubr.msk.f32.vlgmr.msra.gmra.mrb[8].mxu1 %vm582_vm2, %v752_v28  ;;  %1495 = vrcp.f32 %v720_v19 }
 0x24d   : > { %v1486_v52 = vpop.eup %1485  ;;  %v717_v47 = vpop.xlane.xlu1 %716 }
 0x24e   : > { %1497 = vrcp.f32 %v717_v47  ;;  %v699_v31 = vpop.xlane.xlu0 %698  ;;  %v745_v32 = vmul.f32 %v1486_v52, %v1743_v13  ;;  %v1488_v33 = vpop.eup %1487 }
 0x24f   : > { %1499 = vrcp.f32 %v699_v31  ;;  %v754_v39 = vmul.f32 %v1488_v33, %v1737_v7 }
 0x250   : > { %v1490_v56 = vpop.eup %1489  ;;  %1318 = vmatprep.mubr.msk.f32.mxu0 %vm582_vm2, %v745_v32 }
 0x251   : > { %v723_v35 = vpop.xlane.xlu1 %722  ;;  %1319 = vmatmul.mubr.msk.f32.gmra.mrb[10].mxu0 %vm582_vm2, %v746_v62  ;;  %v753_v36 = vmul.f32 %v1490_v56, %v1747_v15  ;;  %v1492_v13 = vpop.eup %1491 }
 0x252   : > { %1501 = vrcp.f32 %v723_v35  ;;  %v702_v37 = vpop.xlane.xlu0 %701  ;;  %v748_v43 = vmul.f32 %v1492_v13, %v1761_v27 }
 0x253   : > { %1503 = vrcp.f32 %v702_v37  ;;  %1346 = vmatprep.mubr.msk.f32.mxu1 %vm582_vm2, %v753_v36 }
 0x254   : > { %1347 = vmatmul.mubr.msk.f32.gmra.mrb[10].mxu1 %vm582_vm2, %v754_v39 }
 0x255   : > { %v1494_v40 = vpop.eup %1493  ;;  %v726_v3 = vpop.xlane.xlu1 %725 }
 0x256   : > { %1505 = vrcp.f32 %v726_v3  ;;  %v747_v41 = vmul.f32 %v1494_v40, %v1772_v34  ;;  %v1496_v42 = vpop.eup %1495 }
 0x257   : > { %v756_v48 = vmul.f32 %v1496_v42, %v1765_v30 }
 0x258   : > { %v1498_v45 = vpop.eup %1497  ;;  %1321 = vmatprep.mubr.msk.f32.mxu0 %vm582_vm2, %v747_v41 }
 0x259   : > { %v1500_v15 = vpop.eup %1499  ;;  %1322 = vmatmul.mubr.msk.f32.gmra.mrb[12].mxu0 %vm582_vm2, %v748_v43  ;;  %v755_v7 = vmul.f32 %v1498_v45, %v1777_v38 }
 0x25a   : > { %v749_v46 = vmul.f32 %v1500_v15, %v1784_v44 }
 0x25b   : > { %1349 = vmatprep.mubr.msk.f32.mxu1 %vm582_vm2, %v755_v7 }
 0x25c   : > { %v1502_v50 = vpop.eup %1501  ;;  %1324 = vmatprep.mubr.msk.f32.mxu0 %vm582_vm2, %v749_v46  ;;  %1350 = vmatmul.mubr.msk.f32.gmra.mrb[12].mxu1 %vm582_vm2, %v756_v48 }
 0x25d   : > { %v1504_v27 = vpop.eup %1503  ;;  %v757_v34 = vmul.f32 %v1502_v50, %v1789_v49 }
 0x25e   : > { %v750_v51 = vmul.f32 %v1504_v27, %v1796_v57 }
 0x25f   : > { %1352 = vmatprep.mubr.msk.f32.mxu1 %vm582_vm2, %v757_v34 }
 0x260   : > { %v1506_v53 = vpop.eup %1505  ;;  %1325 = vmatmul.mubr.msk.f32.gmra.mrb[14].mxu0 %vm582_vm2, %v750_v51 }
 0x261   : > { %v758_v38 = vmul.f32 %v1506_v53, %v1801_v61 }
 0x263   : > { %1353 = vmatmul.mubr.msk.f32.gmra.mrb[14].mxu1 %vm582_vm2, %v758_v38 }
 0x31b   : > { %v1317_v30 = vpop.f32.mrb[8].mxu0 }
 0x31c   : > { %1018 = vst.msk [vmem:[%s1845_s26 + $0x8] sm:$0xff] %vm259_vm0, %v1317_v30  ;;  %v849_v44 = vpop.f32.mrb[9].mxu0 }
 0x31d   : > { %1017 = vst.msk [vmem:[%s1845_s26] sm:$0xff] %vm259_vm0, %v849_v44 }
 0x31f   : > { %v1345_v49 = vpop.f32.mrb[8].mxu1 }
 0x320   : > { %1026 = vst.msk [vmem:[%s1845_s26 + $0x48] sm:$0xff] %vm259_vm0, %v1345_v49  ;;  %v978_v54 = vpop.f32.mrb[9].mxu1 }
 0x321   : > { %1025 = vst.msk [vmem:[%s1845_s26 + $0x40] sm:$0xff] %vm259_vm0, %v978_v54 }
 0x324   : > { %v1320_v55 = vpop.f32.mrb[10].mxu0 }
 0x325   : > { %1020 = vst.msk [vmem:[%s1845_s26 + $0x18] sm:$0xff] %vm259_vm0, %v1320_v55  ;;  %v859_v57 = vpop.f32.mrb[11].mxu0 }
 0x326   : > { %1019 = vst.msk [vmem:[%s1845_s26 + $0x10] sm:$0xff] %vm259_vm0, %v859_v57 }
 0x327   : > { %v1348_v58 = vpop.f32.mrb[10].mxu1 }
 0x328   : > { %1028 = vst.msk [vmem:[%s1845_s26 + $0x58] sm:$0xff] %vm259_vm0, %v1348_v58  ;;  %v988_v59 = vpop.f32.mrb[11].mxu1 }
 0x329   : > { %1027 = vst.msk [vmem:[%s1845_s26 + $0x50] sm:$0xff] %vm259_vm0, %v988_v59 }
 0x32c   : > { %v1323_v60 = vpop.f32.mrb[12].mxu0 }
 0x32d   : > { %1022 = vst.msk [vmem:[%s1845_s26 + $0x28] sm:$0xff] %vm259_vm0, %v1323_v60  ;;  %v869_v61 = vpop.f32.mrb[13].mxu0 }
 0x32e   : > { %1021 = vst.msk [vmem:[%s1845_s26 + $0x20] sm:$0xff] %vm259_vm0, %v869_v61 }
 0x32f   : > { %v1351_v63 = vpop.f32.mrb[12].mxu1 }
 0x330   : > { %1030 = vst.msk [vmem:[%s1845_s26 + $0x68] sm:$0xff] %vm259_vm0, %v1351_v63  ;;  %v998_v0 = vpop.f32.mrb[13].mxu1 }
 0x331   : > { %1029 = vst.msk [vmem:[%s1845_s26 + $0x60] sm:$0xff] %vm259_vm0, %v998_v0 }
 0x333   : > { %v1326_v1 = vpop.f32.mrb[14].mxu0 }
 0x334   : > { %1024 = vst.msk [vmem:[%s1845_s26 + $0x38] sm:$0xff] %vm259_vm0, %v1326_v1  ;;  %v879_v2 = vpop.f32.mrb[15].mxu0 }
 0x335   : > { %1023 = vst.msk [vmem:[%s1845_s26 + $0x30] sm:$0xff] %vm259_vm0, %v879_v2 }
 0x336   : > { %v1354_v4 = vpop.f32.mrb[14].mxu1 }
 0x337   : > { %1032 = vst.msk [vmem:[%s1845_s26 + $0x78] sm:$0xff] %vm259_vm0, %v1354_v4  ;;  %v1008_v5 = vpop.f32.mrb[15].mxu1 }
 0x338   : > { %1031 = vst.msk [vmem:[%s1845_s26 + $0x70] sm:$0xff] %vm259_vm0, %v1008_v5 }
 0x339 PF: > { %s13_s12 = sadd.s32 1, %s1513_s12  }
 0x33a   : > { %p10_p4 = scmp.ge.s32.totalorder %s13_s12, 4  }
 0x33c   :  { %12 = sbr.rel (!%p10_p4) target bundleno = 1 (0x1), region = 68 }

// kernel: block_d_forward.10
= control target key start
LH: loop header
LB: loop body
LE: loop exit
PB: predicated region body
PF: predicated region fallthrough
CT: control target
= control target key end

     0   :  { %vm86_vm0 = vcmask 130048   ;;  %s406_s1 = inlined_call_operand.vmem [shape: bf16[16,16], index: 1, kind: input, shape index: {}]   ;;  %s407_s0 = inlined_call_operand.vmem [shape: bf16[128,16], index: 0, kind: input, shape index: {}]   ;;  %s408_s2 = inlined_call_operand.vmem [shape: f32[1,16], index: 2, kind: input, shape index: {}]   ;;  %s409_s3 = inlined_call_operand.vmem [shape: f32[128,16], index: 3, kind: output, shape index: {}]  }
   0x1   :  { %v275_v0 = vld [vmem:[%s406_s1] sm:$0xff]   ;;  %v278_v3 = vld [vmem:[%s407_s0 + $0x8] sm:$0xff]   ;;  %v280_v5 = vld [vmem:[%s407_s0 + $0x10] sm:$0xff]  }
   0x2   :  { %v276_v1 = vld [vmem:[%s407_s0] sm:$0xff]   ;;  %255 = vmatprep.subr.bf16.mxu0 %v275_v0  ;;  %273 = vmatprep.subr.bf16.mxu1 %v275_v0  ;;  %v279_v4 = vld [vmem:[%s407_s0 + $0x28] sm:$0xff]   ;;  %v281_v6 = vld [vmem:[%s407_s0 + $0x30] sm:$0xff]  }
   0x3   :  { %v277_v2 = vld [vmem:[%s407_s0 + $0x20] sm:$0xff]   ;;  %256 = vmatpush3.bf16.msra.mxu0 %v275_v0  ;;  %274 = vmatpush3.bf16.msra.mxu1 %v275_v0  ;;  %v282_v7 = vld [vmem:[%s407_s0 + $0x18] sm:$0xff]  }
   0x4   :  { %257 = vmatprep.mubr.msk.bf16.mxu0 %vm86_vm0, %v276_v1  ;;  %265 = vmatprep.mubr.msk.bf16.mxu1 %vm86_vm0, %v277_v2  ;;  %v283_v8 = vld [vmem:[%s407_s0 + $0x38] sm:$0xff]   ;;  %v228_v9 = vld [vmem:[%s408_s2] ss:$0 sm:$0xff] }
   0x6   :  { %258 = vmatmul.mubr.msk.bf16.vlgmr.msra.gmra.mrb[0].mxu0 %vm86_vm0, %v278_v3  ;;  %266 = vmatmul.mubr.msk.bf16.vlgmr.msra.gmra.mrb[0].mxu1 %vm86_vm0, %v279_v4 }
   0x7   :  { %261 = vmatprep.mubr.msk.bf16.mxu0 %vm86_vm0, %v280_v5  ;;  %269 = vmatprep.mubr.msk.bf16.mxu1 %vm86_vm0, %v281_v6 }
   0xe   :  { %262 = vmatmul.mubr.msk.bf16.gmra.mrb[4].mxu0 %vm86_vm0, %v282_v7  ;;  %270 = vmatmul.mubr.msk.bf16.gmra.mrb[4].mxu1 %vm86_vm0, %v283_v8 }
  0xd9   :  { %v259_v10 = vpop.f32.mrb[0].mxu0  ;;  %v267_v11 = vpop.f32.mrb[0].mxu1 }
  0xda   :  { %v154_v12 = vadd.f32 %v259_v10, %v228_v9  ;;  %v186_v13 = vadd.f32 %v267_v11, %v228_v9  ;;  %v145_v14 = vpop.f32.mrb[1].mxu0  ;;  %v177_v15 = vpop.f32.mrb[1].mxu1 }
  0xdb   :  { %v146_v16 = vadd.f32 %v228_v9, %v145_v14  ;;  %v178_v17 = vadd.f32 %v228_v9, %v177_v15  ;;  %v260_v18 = vpop.f32.mrb[2].mxu0  ;;  %v268_v19 = vpop.f32.mrb[2].mxu1 }
  0xdc   :  { %210 = vst.msk [vmem:[%s409_s3 + $0x10] sm:$0xff] %vm86_vm0, %v154_v12  ;;  %218 = vst.msk [vmem:[%s409_s3 + $0x50] sm:$0xff] %vm86_vm0, %v186_v13  ;;  %v157_v20 = vadd.f32 %v260_v18, %v228_v9  ;;  %v189_v21 = vadd.f32 %v268_v19, %v228_v9  ;;  %v148_v22 = vpop.f32.mrb[3].mxu0  ;;  %v180_v23 = vpop.f32.mrb[3].mxu1 }
  0xdd   :  { %208 = vst.msk [vmem:[%s409_s3] sm:$0xff] %vm86_vm0, %v146_v16  ;;  %216 = vst.msk [vmem:[%s409_s3 + $0x40] sm:$0xff] %vm86_vm0, %v178_v17  ;;  %v149_v24 = vadd.f32 %v228_v9, %v148_v22  ;;  %v181_v25 = vadd.f32 %v228_v9, %v180_v23 }
  0xde   :  { %211 = vst.msk [vmem:[%s409_s3 + $0x18] sm:$0xff] %vm86_vm0, %v157_v20  ;;  %219 = vst.msk [vmem:[%s409_s3 + $0x58] sm:$0xff] %vm86_vm0, %v189_v21 }
  0xdf   :  { %209 = vst.msk [vmem:[%s409_s3 + $0x8] sm:$0xff] %vm86_vm0, %v149_v24  ;;  %217 = vst.msk [vmem:[%s409_s3 + $0x48] sm:$0xff] %vm86_vm0, %v181_v25 }
  0xe1   :  { %v263_v26 = vpop.f32.mrb[4].mxu0  ;;  %v271_v27 = vpop.f32.mrb[4].mxu1 }
  0xe2   :  { %v170_v28 = vadd.f32 %v263_v26, %v228_v9  ;;  %v202_v29 = vadd.f32 %v271_v27, %v228_v9  ;;  %v161_v30 = vpop.f32.mrb[5].mxu0  ;;  %v193_v31 = vpop.f32.mrb[5].mxu1 }
  0xe3   :  { %v162_v32 = vadd.f32 %v228_v9, %v161_v30  ;;  %v194_v33 = vadd.f32 %v228_v9, %v193_v31  ;;  %v264_v34 = vpop.f32.mrb[6].mxu0  ;;  %v272_v35 = vpop.f32.mrb[6].mxu1 }
  0xe4   :  { %214 = vst.msk [vmem:[%s409_s3 + $0x30] sm:$0xff] %vm86_vm0, %v170_v28  ;;  %222 = vst.msk [vmem:[%s409_s3 + $0x70] sm:$0xff] %vm86_vm0, %v202_v29  ;;  %v173_v36 = vadd.f32 %v264_v34, %v228_v9  ;;  %v205_v37 = vadd.f32 %v272_v35, %v228_v9  ;;  %v164_v38 = vpop.f32.mrb[7].mxu0  ;;  %v196_v39 = vpop.f32.mrb[7].mxu1 }
  0xe5   :  { %212 = vst.msk [vmem:[%s409_s3 + $0x20] sm:$0xff] %vm86_vm0, %v162_v32  ;;  %220 = vst.msk [vmem:[%s409_s3 + $0x60] sm:$0xff] %vm86_vm0, %v194_v33  ;;  %v165_v40 = vadd.f32 %v228_v9, %v164_v38  ;;  %v197_v41 = vadd.f32 %v228_v9, %v196_v39 }
  0xe6   :  { %215 = vst.msk [vmem:[%s409_s3 + $0x38] sm:$0xff] %vm86_vm0, %v173_v36  ;;  %223 = vst.msk [vmem:[%s409_s3 + $0x78] sm:$0xff] %vm86_vm0, %v205_v37 }
  0xe7   :  { %213 = vst.msk [vmem:[%s409_s3 + $0x28] sm:$0xff] %vm86_vm0, %v165_v40  ;;  %221 = vst.msk [vmem:[%s409_s3 + $0x68] sm:$0xff] %vm86_vm0, %v197_v41 }

// kernel: tile.22
= control target key start
LH: loop header
LB: loop body
LE: loop exit
PB: predicated region body
PF: predicated region fallthrough
CT: control target
= control target key end

     0   :  { %s22_s0 = inlined_call_operand.vmem [shape: f32[16], index: 0, kind: input, shape index: {}]   ;;  %s23_s1 = inlined_call_operand.vmem [shape: f32[4,16], index: 1, kind: output, shape index: {}]  }
   0x1   :  { %v4_v0 = vld [vmem:[%s22_s0] ss:$0 sm:$0xff] }
   0x2   :  { %5 = vst [vmem:[%s23_s1] sm:$0xf] %v4_v0 }

// kernel: tile.28
= control target key start
LH: loop header
LB: loop body
LE: loop exit
PB: predicated region body
PF: predicated region fallthrough
CT: control target
= control target key end

     0   :  { %vm7_vm0 = vcmask 130048   ;;  %s37_s8 = smov 16   ;;  %s38_s9 = smov 32   ;;  %vm13_vm1 = vcmask 523648   ;;  %vm19_vm2 = vcmask 392448   ;;  %vm25_vm3 = vcmask 261248   ;;  %s55_s0 = inlined_call_operand.vmem [shape: f32[4,16], index: 0, kind: input, shape index: {}]   ;;  %s56_s1 = inlined_call_operand.vmem [shape: f32[1,64], index: 1, kind: output, shape index: {}]  }
   0x1   :  { %v4_v0 = vld [vmem:[%s55_s0] sm:$0xf]  ;;  %s36_s0 = smov 48  }
   0x2   :  { %5 = vst [vmem:[#allocation1] sm:$0xf] %v4_v0 }
   0x9   :  { %v10_v1 = vld [vmem:[#allocation1 + $0x3] sm:$0x1]   ;;  %v22_v2 = vld [vmem:[#allocation1 + $0x1] sm:$0x1]   ;;  %v6_v3 = vld [vmem:[#allocation1] sm:$0x1]  }
   0xa   :  { %11 = vrot.lane.b32.xlu0 %v10_v1, %s36_s0  ;;  %23 = vrot.lane.b32.xlu1 %v22_v2, %s37_s8  ;;  %v16_v4 = vld [vmem:[#allocation1 + $0x2] sm:$0x1]   ;;  %8 = vst.msk [vmem:[#allocation0] sm:$0x1] %vm7_vm0, %v6_v3  }
   0xe   :  { %17 = vrot.lane.b32.xlu0 %v16_v4, %s38_s9 }
  0x7c   :  { %v12_v5 = vpop.permute.xlu0 %11   ;;  %v24_v6 = vpop.permute.xlu1 %23  }
  0x7d   :  { %14 = vst.msk [vmem:[#allocation0] sm:$0x1] %vm13_vm1, %v12_v5  }
  0x80   :  { %v18_v7 = vpop.permute.xlu0 %17  }
  0x81   :  { %20 = vst.msk [vmem:[#allocation0] sm:$0x1] %vm19_vm2, %v18_v7  }
  0x82   :  { %26 = vst.msk [vmem:[#allocation0] sm:$0x1] %vm25_vm3, %v24_v6  }
  0x89   :  { %v30_v8 = vld [vmem:[#allocation0] sm:$0x1] }
  0x8a   :  { %32 = vst [vmem:[%s56_s1] sm:$0x1] %v30_v8 }

// kernel: block_d_forward.11
= control target key start
LH: loop header
LB: loop body
LE: loop exit
PB: predicated region body
PF: predicated region fallthrough
CT: control target
= control target key end

     0   :  { %vm119_vm0 = vcmask 523264   ;;  %vm415_vm1 = vcmask 519168   ;;  %s801_s1 = inlined_call_operand.vmem [shape: bf16[64,64], index: 1, kind: input, shape index: {}]   ;;  %s802_s0 = inlined_call_operand.vmem [shape: bf16[128,64], index: 0, kind: input, shape index: {}]   ;;  %s803_s2 = inlined_call_operand.vmem [shape: f32[1,64], index: 2, kind: input, shape index: {}]   ;;  %s804_s3 = inlined_call_operand.vmem [shape: f32[128,64], index: 3, kind: input, shape index: {}]   ;;  %s805_s4 = inlined_call_operand.vmem [shape: f32[1,64], index: 4, kind: input, shape index: {}]   ;;  %s806_s5 = inlined_call_operand.vmem [shape: f32[1,64], index: 5, kind: input, shape index: {}]   ;;  %s807_s6 = inlined_call_operand.vmem [shape: bf16[128,64], index: 6, kind: output, shape index: {}]  }
   0x1   :  { %v535_v0 = vld [vmem:[%s801_s1] sm:$0xff]   ;;  %v536_v1 = vld [vmem:[%s801_s1 + $0x8] sm:$0xff]   ;;  %v537_v2 = vld [vmem:[%s801_s1 + $0x10] sm:$0xff]  }
   0x2   :  { %503 = vmatprep.subr.bf16.mxu0 %v535_v0  ;;  %527 = vmatprep.subr.bf16.mxu1 %v535_v0  ;;  %v539_v3 = vld [vmem:[%s802_s0] sm:$0xff]   ;;  %v538_v5 = vld [vmem:[%s801_s1 + $0x18] sm:$0xff]   ;;  %v541_v6 = vld [vmem:[%s802_s0 + $0x8] sm:$0xff]  }
   0x3   :  { %504 = vmatpush3.bf16.msra.mxu0 %v535_v0  ;;  %531 = vmatpush3.bf16.msra.mxu1 %v535_v0  ;;  %v540_v4 = vld [vmem:[%s802_s0 + $0x20] sm:$0xff]   ;;  %v542_v7 = vld [vmem:[%s802_s0 + $0x28] sm:$0xff]   ;;  %v543_v8 = vld [vmem:[%s802_s0 + $0x10] sm:$0xff]  }
   0x4   :  { %505 = vmatprep.subr.bf16.mxu0 %v536_v1  ;;  %528 = vmatprep.subr.bf16.mxu1 %v536_v1  ;;  %v544_v9 = vld [vmem:[%s802_s0 + $0x30] sm:$0xff]   ;;  %v545_v10 = vld [vmem:[%s802_s0 + $0x18] sm:$0xff]   ;;  %v629_v12 = vld [vmem:[%s803_s2] ss:$0 sm:$0xff] }
   0x5   :  { %511 = vmatprep.mubr.msk.bf16.mxu0 %vm119_vm0, %v539_v3  ;;  %519 = vmatprep.mubr.msk.bf16.mxu1 %vm119_vm0, %v540_v4  ;;  %v546_v11 = vld [vmem:[%s802_s0 + $0x38] sm:$0xff]   ;;  %v243_v14 = vld [vmem:[%s804_s3 + $0x10] sm:$0xff]  ;;  %v241_v20 = vld [vmem:[%s804_s3] sm:$0xff] }
   0x6   :  { %v251_v16 = vld [vmem:[%s804_s3 + $0x50] sm:$0xff]  ;;  %v249_v22 = vld [vmem:[%s804_s3 + $0x40] sm:$0xff]  ;;  %v244_v27 = vld [vmem:[%s804_s3 + $0x18] sm:$0xff] }
   0x7   :  { %506 = vmatpush3.bf16.msra.mxu0 %v536_v1  ;;  %532 = vmatpush3.bf16.msra.mxu1 %v536_v1  ;;  %v648_v23 = vld [vmem:[%s805_s4] ss:$0 sm:$0xff]  ;;  %v252_v29 = vld [vmem:[%s804_s3 + $0x58] sm:$0xff]  ;;  %v242_v35 = vld [vmem:[%s804_s3 + $0x8] sm:$0xff] }
   0x8   :  { %507 = vmatprep.subr.bf16.mxu0 %v537_v2  ;;  %529 = vmatprep.subr.bf16.mxu1 %v537_v2  ;;  %v250_v37 = vld [vmem:[%s804_s3 + $0x48] sm:$0xff]  ;;  %v669_v38 = vld [vmem:[%s806_s5] ss:$0 sm:$0xff] }
   0xb   :  { %508 = vmatpush3.bf16.msra.mxu0 %v537_v2  ;;  %533 = vmatpush3.bf16.msra.mxu1 %v537_v2 }
   0xc   :  { %509 = vmatprep.subr.bf16.mxu0 %v538_v5  ;;  %530 = vmatprep.subr.bf16.mxu1 %v538_v5 }
   0xf   :  { %510 = vmatpush3.bf16.msra.mxu0 %v538_v5  ;;  %534 = vmatpush3.bf16.msra.mxu1 %v538_v5 }
  0x12   :  { %512 = vmatmul.mubr.msk.bf16.vlgmr.msra.gmra.mrb[0].mxu0 %vm119_vm0, %v541_v6  ;;  %520 = vmatmul.mubr.msk.bf16.vlgmr.msra.gmra.mrb[0].mxu1 %vm119_vm0, %v542_v7 }
  0x13   :  { %515 = vmatprep.mubr.msk.bf16.mxu0 %vm119_vm0, %v543_v8  ;;  %523 = vmatprep.mubr.msk.bf16.mxu1 %vm119_vm0, %v544_v9 }
  0x1a   :  { %516 = vmatmul.mubr.msk.bf16.gmra.mrb[4].mxu0 %vm119_vm0, %v545_v10  ;;  %524 = vmatmul.mubr.msk.bf16.gmra.mrb[4].mxu1 %vm119_vm0, %v546_v11 }
  0xe5   :  { %v513_v13 = vpop.f32.mrb[0].mxu0  ;;  %v521_v15 = vpop.f32.mrb[0].mxu1 }
  0xe6   :  { %v187_v17 = vadd.f32 %v513_v13, %v629_v12  ;;  %v219_v18 = vadd.f32 %v521_v15, %v629_v12  ;;  %v178_v19 = vpop.f32.mrb[1].mxu0  ;;  %v210_v21 = vpop.f32.mrb[1].mxu1 }
  0xe7   :  { %v179_v24 = vadd.f32 %v629_v12, %v178_v19  ;;  %v211_v25 = vadd.f32 %v629_v12, %v210_v21  ;;  %v514_v26 = vpop.f32.mrb[2].mxu0  ;;  %v522_v28 = vpop.f32.mrb[2].mxu1 }
  0xe8   :  { %v259_v30 = vadd.f32 %v243_v14, %v187_v17  ;;  %v267_v31 = vadd.f32 %v251_v16, %v219_v18  ;;  %v190_v32 = vadd.f32 %v514_v26, %v629_v12  ;;  %v222_v33 = vadd.f32 %v522_v28, %v629_v12  ;;  %v181_v34 = vpop.f32.mrb[3].mxu0  ;;  %v213_v36 = vpop.f32.mrb[3].mxu1 }
  0xe9   :  { %v257_v39 = vadd.f32 %v241_v20, %v179_v24  ;;  %v265_v40 = vadd.f32 %v249_v22, %v211_v25  ;;  %v182_v41 = vadd.f32 %v629_v12, %v181_v34  ;;  %v214_v42 = vadd.f32 %v629_v12, %v213_v36  ;;  %v253_v36 = vld [vmem:[%s804_s3 + $0x60] sm:$0xff] }
  0xea   :  { %v282_v43 = vmul.f32 %v648_v23, %v259_v30  ;;  %v290_v44 = vmul.f32 %v648_v23, %v267_v31  ;;  %v260_v45 = vadd.f32 %v244_v27, %v190_v32  ;;  %v268_v46 = vadd.f32 %v252_v29, %v222_v33  ;;  %v247_v29 = vld [vmem:[%s804_s3 + $0x30] sm:$0xff] }
  0xeb   :  { %v280_v47 = vmul.f32 %v648_v23, %v257_v39  ;;  %v288_v48 = vmul.f32 %v648_v23, %v265_v40  ;;  %v258_v49 = vadd.f32 %v242_v35, %v182_v41  ;;  %v266_v50 = vadd.f32 %v250_v37, %v214_v42  ;;  %v255_v30 = vld [vmem:[%s804_s3 + $0x70] sm:$0xff]  ;;  %v245_v35 = vld [vmem:[%s804_s3 + $0x20] sm:$0xff]  ;;  %v248_v42 = vld [vmem:[%s804_s3 + $0x38] sm:$0xff] }
  0xec   :  { %v305_v51 = vadd.f32 %v669_v38, %v282_v43  ;;  %v313_v52 = vadd.f32 %v669_v38, %v290_v44  ;;  %v283_v53 = vmul.f32 %v648_v23, %v260_v45  ;;  %v291_v54 = vmul.f32 %v648_v23, %v268_v46  ;;  %v256_v43 = vld [vmem:[%s804_s3 + $0x78] sm:$0xff] }
  0xed   :  { %v303_v55 = vadd.f32 %v669_v38, %v280_v47  ;;  %v311_v56 = vadd.f32 %v669_v38, %v288_v48  ;;  %v281_v57 = vmul.f32 %v648_v23, %v258_v49  ;;  %v289_v58 = vmul.f32 %v648_v23, %v266_v50  ;;  %v517_v59 = vpop.f32.mrb[4].mxu0  ;;  %v525_v60 = vpop.f32.mrb[4].mxu1  ;;  %v246_v48 = vld [vmem:[%s804_s3 + $0x28] sm:$0xff] }
  0xee   :  { %v321_v61 = vmax.f32 %v305_v51, 0.0  ;;  %v329_v62 = vmax.f32 %v313_v52, 0.0  ;;  %v306_v63 = vadd.f32 %v669_v38, %v283_v53  ;;  %v314_v0 = vadd.f32 %v669_v38, %v291_v54  ;;  %v194_v1 = vpop.f32.mrb[5].mxu0  ;;  %v226_v2 = vpop.f32.mrb[5].mxu1  ;;  %v254_v49 = vld [vmem:[%s804_s3 + $0x68] sm:$0xff] }
  0xef   :  { %v319_v3 = vmax.f32 %v303_v55, 0.0  ;;  %v327_v4 = vmax.f32 %v311_v56, 0.0  ;;  %v304_v5 = vadd.f32 %v669_v38, %v281_v57  ;;  %v312_v6 = vadd.f32 %v669_v38, %v289_v58  ;;  %v518_v7 = vpop.f32.mrb[6].mxu0  ;;  %v526_v8 = vpop.f32.mrb[6].mxu1 }
  0xf0   :  { %v337_v9 = vmin.f32 %v321_v61, 6.0  ;;  %v345_v10 = vmin.f32 %v329_v62, 6.0  ;;  %v322_v11 = vmax.f32 %v306_v63, 0.0  ;;  %v330_v13 = vmax.f32 %v314_v0, 0.0  ;;  %v197_v14 = vpop.f32.mrb[7].mxu0  ;;  %v229_v15 = vpop.f32.mrb[7].mxu1 }
  0xf1   :  { %v335_v16 = vmin.f32 %v319_v3, 6.0  ;;  %v343_v17 = vmin.f32 %v327_v4, 6.0  ;;  %v320_v18 = vmax.f32 %v304_v5, 0.0  ;;  %v328_v19 = vmax.f32 %v312_v6, 0.0 }
  0xf2   :  { %v477_v20 = vpack.c.bf16 %v337_v9, %v337_v9  ;;  %v485_v21 = vpack.c.bf16 %v345_v10, %v345_v10  ;;  %v338_v22 = vmin.f32 %v322_v11, 6.0  ;;  %v346_v24 = vmin.f32 %v330_v13, 6.0 }
  0xf3   :  { %v475_v25 = vpack.c.bf16 %v335_v16, %v335_v16  ;;  %v483_v26 = vpack.c.bf16 %v343_v17, %v343_v17  ;;  %v336_v27 = vmin.f32 %v320_v18, 6.0  ;;  %v344_v28 = vmin.f32 %v328_v19, 6.0 }
  0xf4   :  { %418 = vst.msk [vmem:[%s807_s6 + $0x8] sm:$0xf] %vm415_vm1, %v477_v20  ;;  %426 = vst.msk [vmem:[%s807_s6 + $0x28] sm:$0xf] %vm415_vm1, %v485_v21  ;;  %v478_v31 = vpack.c.bf16 %v338_v22, %v338_v22  ;;  %v486_v32 = vpack.c.bf16 %v346_v24, %v346_v24  ;;  %v203_v33 = vadd.f32 %v517_v59, %v629_v12 }
  0xf5   :  { %v235_v34 = vadd.f32 %v525_v60, %v629_v12  ;;  %416 = vst.msk [vmem:[%s807_s6] sm:$0xf] %vm415_vm1, %v475_v25  ;;  %424 = vst.msk [vmem:[%s807_s6 + $0x20] sm:$0xf] %vm415_vm1, %v483_v26  ;;  %v476_v37 = vpack.c.bf16 %v336_v27, %v336_v27  ;;  %v484_v39 = vpack.c.bf16 %v344_v28, %v344_v28 }
  0xf6   :  { %v195_v40 = vadd.f32 %v629_v12, %v194_v1  ;;  %v227_v41 = vadd.f32 %v629_v12, %v226_v2  ;;  %419 = vst.msk [vmem:[%s807_s6 + $0xc] sm:$0xf] %vm415_vm1, %v478_v31  ;;  %427 = vst.msk [vmem:[%s807_s6 + $0x2c] sm:$0xf] %vm415_vm1, %v486_v32  ;;  %v263_v44 = vadd.f32 %v247_v29, %v203_v33 }
  0xf7   :  { %v271_v45 = vadd.f32 %v255_v30, %v235_v34  ;;  %v206_v46 = vadd.f32 %v518_v7, %v629_v12  ;;  %v238_v47 = vadd.f32 %v526_v8, %v629_v12  ;;  %417 = vst.msk [vmem:[%s807_s6 + $0x4] sm:$0xf] %vm415_vm1, %v476_v37  ;;  %425 = vst.msk [vmem:[%s807_s6 + $0x24] sm:$0xf] %vm415_vm1, %v484_v39 }
  0xf8   :  { %v261_v50 = vadd.f32 %v245_v35, %v195_v40  ;;  %v269_v51 = vadd.f32 %v253_v36, %v227_v41  ;;  %v198_v52 = vadd.f32 %v629_v12, %v197_v14  ;;  %v230_v53 = vadd.f32 %v629_v12, %v229_v15 }
  0xf9   :  { %v286_v54 = vmul.f32 %v648_v23, %v263_v44  ;;  %v294_v55 = vmul.f32 %v648_v23, %v271_v45  ;;  %v264_v56 = vadd.f32 %v248_v42, %v206_v46  ;;  %v272_v57 = vadd.f32 %v256_v43, %v238_v47 }
  0xfa   :  { %v284_v58 = vmul.f32 %v648_v23, %v261_v50  ;;  %v292_v59 = vmul.f32 %v648_v23, %v269_v51  ;;  %v262_v60 = vadd.f32 %v246_v48, %v198_v52  ;;  %v270_v61 = vadd.f32 %v254_v49, %v230_v53 }
  0xfb   :  { %v309_v62 = vadd.f32 %v669_v38, %v286_v54  ;;  %v317_v63 = vadd.f32 %v669_v38, %v294_v55  ;;  %v287_v0 = vmul.f32 %v648_v23, %v264_v56  ;;  %v295_v12 = vmul.f32 %v648_v23, %v272_v57 }
  0xfc   :  { %v307_v1 = vadd.f32 %v669_v38, %v284_v58  ;;  %v315_v2 = vadd.f32 %v669_v38, %v292_v59  ;;  %v285_v3 = vmul.f32 %v648_v23, %v262_v60  ;;  %v293_v4 = vmul.f32 %v648_v23, %v270_v61 }
  0xfd   :  { %v325_v5 = vmax.f32 %v309_v62, 0.0  ;;  %v333_v6 = vmax.f32 %v317_v63, 0.0  ;;  %v310_v7 = vadd.f32 %v669_v38, %v287_v0  ;;  %v318_v8 = vadd.f32 %v669_v38, %v295_v12 }
  0xfe   :  { %v323_v9 = vmax.f32 %v307_v1, 0.0  ;;  %v331_v10 = vmax.f32 %v315_v2, 0.0  ;;  %v308_v11 = vadd.f32 %v669_v38, %v285_v3  ;;  %v316_v13 = vadd.f32 %v669_v38, %v293_v4 }
  0xff   :  { %v341_v14 = vmin.f32 %v325_v5, 6.0  ;;  %v349_v15 = vmin.f32 %v333_v6, 6.0  ;;  %v326_v16 = vmax.f32 %v310_v7, 0.0  ;;  %v334_v17 = vmax.f32 %v318_v8, 0.0 }
 0x100   :  { %v339_v18 = vmin.f32 %v323_v9, 6.0  ;;  %v347_v19 = vmin.f32 %v331_v10, 6.0  ;;  %v324_v20 = vmax.f32 %v308_v11, 0.0  ;;  %v332_v23 = vmax.f32 %v316_v13, 0.0 }
 0x101   :  { %v481_v21 = vpack.c.bf16 %v341_v14, %v341_v14  ;;  %v489_v22 = vpack.c.bf16 %v349_v15, %v349_v15  ;;  %v342_v24 = vmin.f32 %v326_v16, 6.0  ;;  %v350_v25 = vmin.f32 %v334_v17, 6.0 }
 0x102   :  { %v479_v26 = vpack.c.bf16 %v339_v18, %v339_v18  ;;  %v487_v27 = vpack.c.bf16 %v347_v19, %v347_v19  ;;  %v340_v28 = vmin.f32 %v324_v20, 6.0  ;;  %v348_v29 = vmin.f32 %v332_v23, 6.0 }
 0x103   :  { %422 = vst.msk [vmem:[%s807_s6 + $0x18] sm:$0xf] %vm415_vm1, %v481_v21  ;;  %430 = vst.msk [vmem:[%s807_s6 + $0x38] sm:$0xf] %vm415_vm1, %v489_v22  ;;  %v482_v38 = vpack.c.bf16 %v342_v24, %v342_v24  ;;  %v490_v30 = vpack.c.bf16 %v350_v25, %v350_v25 }
 0x104   :  { %420 = vst.msk [vmem:[%s807_s6 + $0x10] sm:$0xf] %vm415_vm1, %v479_v26  ;;  %428 = vst.msk [vmem:[%s807_s6 + $0x30] sm:$0xf] %vm415_vm1, %v487_v27  ;;  %v480_v31 = vpack.c.bf16 %v340_v28, %v340_v28  ;;  %v488_v32 = vpack.c.bf16 %v348_v29, %v348_v29 }
 0x105   :  { %423 = vst.msk [vmem:[%s807_s6 + $0x1c] sm:$0xf] %vm415_vm1, %v482_v38  ;;  %431 = vst.msk [vmem:[%s807_s6 + $0x3c] sm:$0xf] %vm415_vm1, %v490_v30 }
 0x106   :  { %421 = vst.msk [vmem:[%s807_s6 + $0x14] sm:$0xf] %vm415_vm1, %v480_v31  ;;  %429 = vst.msk [vmem:[%s807_s6 + $0x34] sm:$0xf] %vm415_vm1, %v488_v32 }

// kernel: block_d_forward.13
= control target key start
LH: loop header
LB: loop body
LE: loop exit
PB: predicated region body
PF: predicated region fallthrough
CT: control target
= control target key end

     0   :  { %v1130_v0 = vmov 0   ;;  %vm446_vm0 = vcmask 130048   ;;  %s1727_s1 = inlined_call_operand.vmem [shape: bf16[144,16], index: 1, kind: input, shape index: {}]   ;;  %s1728_s0 = inlined_call_operand.vmem [shape: bf16[512,144], index: 0, kind: input, shape index: {}]   ;;  %s1729_s2 = inlined_call_operand.vmem [shape: f32[1,16], index: 2, kind: input, shape index: {}]   ;;  %s1730_s3 = inlined_call_operand.vmem [shape: f32[512,16], index: 3, kind: output, shape index: {}]  }
   0x1   :  { %543 = vmatprep.subr.bf16.mxu0 %v1130_v0  ;;  %1006 = vmatprep.subr.bf16.mxu1 %v1130_v0  ;;  %v1025_v1 = vld [vmem:[%s1727_s1] sm:$0xff]   ;;  %v1026_v2 = vld [vmem:[%s1727_s1 + $0x8] sm:$0xff]   ;;  %v1027_v3 = vld [vmem:[%s1727_s1 + $0x10] sm:$0xff]  }
   0x2   :  { %544 = vmatpush1.bf16.msra.mxu0 %v1025_v1  ;;  %1015 = vmatpush1.bf16.msra.mxu1 %v1025_v1  ;;  %v1028_v4 = vld [vmem:[%s1727_s1 + $0x18] sm:$0xff]   ;;  %v1036_v5 = vld [vmem:[%s1728_s0 + $0x4] ss:$8 sps:$4 sm:$0xff]   ;;  %v1031_v9 = vld [vmem:[%s1727_s1 + $0x30] sm:$0xff]  }
   0x3   :  { %545 = vmatprep.subr.bf16.mxu0 %v1130_v0  ;;  %1007 = vmatprep.subr.bf16.mxu1 %v1130_v0  ;;  %v1039_v6 = vld [vmem:[%s1728_s0 + $0x104] ss:$8 sps:$4 sm:$0xff]   ;;  %v1032_v10 = vld [vmem:[%s1727_s1 + $0x38] sm:$0xff]   ;;  %v1034_v12 = vld [vmem:[%s1728_s0] ss:$8 sps:$4 sm:$0xff]  }
   0x4   :  { %974 = vmatprep.mubr.msk.bf16.mxu0 %vm446_vm0, %v1036_v5  ;;  %990 = vmatprep.mubr.msk.bf16.mxu1 %vm446_vm0, %v1039_v6  ;;  %v1029_v7 = vld [vmem:[%s1727_s1 + $0x20] sm:$0xff]   ;;  %v1030_v8 = vld [vmem:[%s1727_s1 + $0x28] sm:$0xff]   ;;  %v1040_v14 = vld [vmem:[%s1728_s0 + $0x14] ss:$8 sps:$4 sm:$0xff]  }
   0x5   :  { %v1033_v11 = vld [vmem:[%s1727_s1 + $0x40] sm:$0xff]   ;;  %v1042_v15 = vld [vmem:[%s1728_s0 + $0x114] ss:$8 sps:$4 sm:$0xff]   ;;  %v1044_v16 = vld [vmem:[%s1728_s0 + $0x10] ss:$8 sps:$4 sm:$0xff]  }
   0x6   :  { %546 = vmatpush1.bf16.msra.mxu0 %v1026_v2  ;;  %1016 = vmatpush1.bf16.msra.mxu1 %v1026_v2  ;;  %v1037_v13 = vld [vmem:[%s1728_s0 + $0x100] ss:$8 sps:$4 sm:$0xff]   ;;  %v1045_v17 = vld [vmem:[%s1728_s0 + $0x110] ss:$8 sps:$4 sm:$0xff]   ;;  %v1046_v18 = vld [vmem:[%s1728_s0 + $0x24] ss:$8 sps:$4 sm:$0xff]  }
   0x7   :  { %547 = vmatprep.subr.bf16.mxu0 %v1130_v0  ;;  %1008 = vmatprep.subr.bf16.mxu1 %v1130_v0  ;;  %v1048_v19 = vld [vmem:[%s1728_s0 + $0x124] ss:$8 sps:$4 sm:$0xff]   ;;  %v1050_v20 = vld [vmem:[%s1728_s0 + $0x20] ss:$8 sps:$4 sm:$0xff]   ;;  %v1052_v22 = vld [vmem:[%s1728_s0 + $0x34] ss:$8 sps:$4 sm:$0xff]  }
   0x8   :  { %v1051_v21 = vld [vmem:[%s1728_s0 + $0x120] ss:$8 sps:$4 sm:$0xff]   ;;  %v1054_v23 = vld [vmem:[%s1728_s0 + $0x134] ss:$8 sps:$4 sm:$0xff]   ;;  %v1056_v24 = vld [vmem:[%s1728_s0 + $0x30] ss:$8 sps:$4 sm:$0xff]  }
   0x9   :  { %v1057_v25 = vld [vmem:[%s1728_s0 + $0x130] ss:$8 sps:$4 sm:$0xff]   ;;  %v1058_v26 = vld [vmem:[%s1728_s0 + $0x44] ss:$8 sps:$4 sm:$0xff]   ;;  %v1062_v28 = vld [vmem:[%s1728_s0 + $0x40] ss:$8 sps:$4 sm:$0xff]  }
   0xa   :  { %548 = vmatpush1.bf16.msra.mxu0 %v1027_v3  ;;  %1017 = vmatpush1.bf16.msra.mxu1 %v1027_v3  ;;  %v1060_v27 = vld [vmem:[%s1728_s0 + $0x144] ss:$8 sps:$4 sm:$0xff]   ;;  %v1063_v29 = vld [vmem:[%s1728_s0 + $0x140] ss:$8 sps:$4 sm:$0xff]   ;;  %v1064_v30 = vld [vmem:[%s1728_s0 + $0x54] ss:$8 sps:$4 sm:$0xff]  }
   0xb   :  { %549 = vmatprep.subr.bf16.mxu0 %v1130_v0  ;;  %1009 = vmatprep.subr.bf16.mxu1 %v1130_v0  ;;  %v1066_v31 = vld [vmem:[%s1728_s0 + $0x154] ss:$8 sps:$4 sm:$0xff]   ;;  %v1068_v32 = vld [vmem:[%s1728_s0 + $0x50] ss:$8 sps:$4 sm:$0xff]   ;;  %v1070_v34 = vld [vmem:[%s1728_s0 + $0x64] ss:$8 sps:$4 sm:$0xff]  }
   0xc   :  { %v1069_v33 = vld [vmem:[%s1728_s0 + $0x150] ss:$8 sps:$4 sm:$0xff]   ;;  %v1072_v35 = vld [vmem:[%s1728_s0 + $0x164] ss:$8 sps:$4 sm:$0xff]   ;;  %v1074_v36 = vld [vmem:[%s1728_s0 + $0x60] ss:$8 sps:$4 sm:$0xff]  }
   0xd   :  { %v1075_v37 = vld [vmem:[%s1728_s0 + $0x160] ss:$8 sps:$4 sm:$0xff]   ;;  %v1076_v38 = vld [vmem:[%s1728_s0 + $0x74] ss:$8 sps:$4 sm:$0xff]   ;;  %v1080_v40 = vld [vmem:[%s1728_s0 + $0x70] ss:$8 sps:$4 sm:$0xff]  }
   0xe   :  { %550 = vmatpush1.bf16.msra.mxu0 %v1028_v4  ;;  %1018 = vmatpush1.bf16.msra.mxu1 %v1028_v4  ;;  %v1078_v39 = vld [vmem:[%s1728_s0 + $0x174] ss:$8 sps:$4 sm:$0xff]   ;;  %v1081_v41 = vld [vmem:[%s1728_s0 + $0x170] ss:$8 sps:$4 sm:$0xff]   ;;  %v1082_v42 = vld [vmem:[%s1728_s0 + $0x84] ss:$8 sps:$4 sm:$0xff]  }
   0xf   :  { %551 = vmatprep.subr.bf16.mxu0 %v1130_v0  ;;  %1010 = vmatprep.subr.bf16.mxu1 %v1130_v0  ;;  %v1084_v43 = vld [vmem:[%s1728_s0 + $0x184] ss:$8 sps:$4 sm:$0xff]   ;;  %v1086_v44 = vld [vmem:[%s1728_s0 + $0x80] ss:$8 sps:$4 sm:$0xff]   ;;  %v1088_v46 = vld [vmem:[%s1728_s0 + $0x94] ss:$8 sps:$4 sm:$0xff]  }
  0x10   :  { %v1087_v45 = vld [vmem:[%s1728_s0 + $0x180] ss:$8 sps:$4 sm:$0xff]   ;;  %v1090_v47 = vld [vmem:[%s1728_s0 + $0x194] ss:$8 sps:$4 sm:$0xff]   ;;  %v1092_v48 = vld [vmem:[%s1728_s0 + $0x90] ss:$8 sps:$4 sm:$0xff]  }
  0x11   :  { %v1093_v49 = vld [vmem:[%s1728_s0 + $0x190] ss:$8 sps:$4 sm:$0xff]   ;;  %v1094_v50 = vld [vmem:[%s1728_s0 + $0xa4] ss:$8 sps:$4 sm:$0xff]   ;;  %v1098_v52 = vld [vmem:[%s1728_s0 + $0xa0] ss:$8 sps:$4 sm:$0xff]  }
  0x12   :  { %552 = vmatpush1.bf16.msra.mxu0 %v1029_v7  ;;  %1019 = vmatpush1.bf16.msra.mxu1 %v1029_v7  ;;  %v1096_v51 = vld [vmem:[%s1728_s0 + $0x1a4] ss:$8 sps:$4 sm:$0xff]   ;;  %v1099_v53 = vld [vmem:[%s1728_s0 + $0x1a0] ss:$8 sps:$4 sm:$0xff]   ;;  %v1100_v54 = vld [vmem:[%s1728_s0 + $0xb4] ss:$8 sps:$4 sm:$0xff]  }
  0x13   :  { %553 = vmatprep.subr.bf16.mxu0 %v1130_v0  ;;  %1011 = vmatprep.subr.bf16.mxu1 %v1130_v0  ;;  %v1102_v55 = vld [vmem:[%s1728_s0 + $0x1b4] ss:$8 sps:$4 sm:$0xff]   ;;  %v1104_v56 = vld [vmem:[%s1728_s0 + $0xb0] ss:$8 sps:$4 sm:$0xff]   ;;  %v1106_v58 = vld [vmem:[%s1728_s0 + $0xc4] ss:$8 sps:$4 sm:$0xff]  }
  0x14   :  { %v1105_v57 = vld [vmem:[%s1728_s0 + $0x1b0] ss:$8 sps:$4 sm:$0xff]   ;;  %v1108_v59 = vld [vmem:[%s1728_s0 + $0x1c4] ss:$8 sps:$4 sm:$0xff]   ;;  %v1110_v60 = vld [vmem:[%s1728_s0 + $0xc0] ss:$8 sps:$4 sm:$0xff]  }
  0x15   :  { %v1111_v61 = vld [vmem:[%s1728_s0 + $0x1c0] ss:$8 sps:$4 sm:$0xff]   ;;  %v1112_v62 = vld [vmem:[%s1728_s0 + $0xd4] ss:$8 sps:$4 sm:$0xff]   ;;  %v1117_v1 = vld [vmem:[%s1728_s0 + $0x1d0] ss:$8 sps:$4 sm:$0xff]  }
  0x16   :  { %554 = vmatpush1.bf16.msra.mxu0 %v1030_v8  ;;  %1020 = vmatpush1.bf16.msra.mxu1 %v1030_v8  ;;  %v1114_v63 = vld [vmem:[%s1728_s0 + $0x1d4] ss:$8 sps:$4 sm:$0xff]   ;;  %v1118_v2 = vld [vmem:[%s1728_s0 + $0xe4] ss:$8 sps:$4 sm:$0xff]   ;;  %v1122_v4 = vld [vmem:[%s1728_s0 + $0xe0] ss:$8 sps:$4 sm:$0xff]  }
  0x17   :  { %555 = vmatprep.subr.bf16.mxu0 %v1130_v0  ;;  %1012 = vmatprep.subr.bf16.mxu1 %v1130_v0  ;;  %v1120_v3 = vld [vmem:[%s1728_s0 + $0x1e4] ss:$8 sps:$4 sm:$0xff]   ;;  %v1123_v5 = vld [vmem:[%s1728_s0 + $0x1e0] ss:$8 sps:$4 sm:$0xff]   ;;  %v1124_v6 = vld [vmem:[%s1728_s0 + $0xf4] ss:$8 sps:$4 sm:$0xff]  }
  0x18   :  { %v1126_v7 = vld [vmem:[%s1728_s0 + $0x1f4] ss:$8 sps:$4 sm:$0xff]   ;;  %v1128_v8 = vld [vmem:[%s1728_s0 + $0xf0] ss:$8 sps:$4 sm:$0xff]  }
  0x1a   :  { %556 = vmatpush1.bf16.msra.mxu0 %v1031_v9  ;;  %1021 = vmatpush1.bf16.msra.mxu1 %v1031_v9  ;;  %v1129_v9 = vld [vmem:[%s1728_s0 + $0x1f0] ss:$8 sps:$4 sm:$0xff]  }
  0x1b   :  { %557 = vmatprep.subr.bf16.mxu0 %v1130_v0  ;;  %1013 = vmatprep.subr.bf16.mxu1 %v1130_v0 }
  0x1e   :  { %558 = vmatpush1.bf16.msra.mxu0 %v1032_v10  ;;  %1022 = vmatpush1.bf16.msra.mxu1 %v1032_v10  ;;  %v1405_v10 = vld [vmem:[%s1729_s2] ss:$0 sm:$0xff] }
  0x1f   :  { %559 = vmatprep.subr.bf16.mxu0 %v1130_v0  ;;  %1014 = vmatprep.subr.bf16.mxu1 %v1130_v0  ;;  %v1116_v0 = vld [vmem:[%s1728_s0 + $0xd0] ss:$8 sps:$4 sm:$0xff]  }
  0x22   :  { %560 = vmatpush1.bf16.msra.mxu0 %v1033_v11  ;;  %1023 = vmatpush1.bf16.msra.mxu1 %v1033_v11 }
  0x25   :  { %576 = vmatmul.mubr.bf16.vlgmr.msra.gmra.mrb[0].mxu0 %v1034_v12  ;;  %704 = vmatmul.mubr.bf16.vlgmr.msra.gmra.mrb[0].mxu1 %v1037_v13 }
  0x26   :  { %975 = vmatprep.mubr.msk.bf16.mxu0 %vm446_vm0, %v1040_v14  ;;  %991 = vmatprep.mubr.msk.bf16.mxu1 %vm446_vm0, %v1042_v15 }
  0x2d   :  { %584 = vmatmul.mubr.bf16.gmra.mrb[4].mxu0 %v1044_v16  ;;  %712 = vmatmul.mubr.bf16.gmra.mrb[4].mxu1 %v1045_v17 }
  0x2e   :  { %976 = vmatprep.mubr.msk.bf16.mxu0 %vm446_vm0, %v1046_v18  ;;  %992 = vmatprep.mubr.msk.bf16.mxu1 %vm446_vm0, %v1048_v19 }
  0x35   :  { %592 = vmatmul.mubr.bf16.gmra.mrb[8].mxu0 %v1050_v20  ;;  %720 = vmatmul.mubr.bf16.gmra.mrb[8].mxu1 %v1051_v21 }
  0x36   :  { %977 = vmatprep.mubr.msk.bf16.mxu0 %vm446_vm0, %v1052_v22  ;;  %993 = vmatprep.mubr.msk.bf16.mxu1 %vm446_vm0, %v1054_v23 }
  0x3d   :  { %600 = vmatmul.mubr.bf16.gmra.mrb[12].mxu0 %v1056_v24  ;;  %728 = vmatmul.mubr.bf16.gmra.mrb[12].mxu1 %v1057_v25 }
  0x3e   :  { %978 = vmatprep.mubr.msk.bf16.mxu0 %vm446_vm0, %v1058_v26  ;;  %994 = vmatprep.mubr.msk.bf16.mxu1 %vm446_vm0, %v1060_v27 }
  0x45   :  { %608 = vmatmul.mubr.bf16.gmra.mrb[16].mxu0 %v1062_v28  ;;  %736 = vmatmul.mubr.bf16.gmra.mrb[16].mxu1 %v1063_v29 }
  0x46   :  { %979 = vmatprep.mubr.msk.bf16.mxu0 %vm446_vm0, %v1064_v30  ;;  %995 = vmatprep.mubr.msk.bf16.mxu1 %vm446_vm0, %v1066_v31 }
  0x4d   :  { %616 = vmatmul.mubr.bf16.gmra.mrb[20].mxu0 %v1068_v32  ;;  %744 = vmatmul.mubr.bf16.gmra.mrb[20].mxu1 %v1069_v33 }
  0x4e   :  { %980 = vmatprep.mubr.msk.bf16.mxu0 %vm446_vm0, %v1070_v34  ;;  %996 = vmatprep.mubr.msk.bf16.mxu1 %vm446_vm0, %v1072_v35 }
  0x55   :  { %624 = vmatmul.mubr.bf16.gmra.mrb[24].mxu0 %v1074_v36  ;;  %752 = vmatmul.mubr.bf16.gmra.mrb[24].mxu1 %v1075_v37 }
  0x56   :  { %981 = vmatprep.mubr.msk.bf16.mxu0 %vm446_vm0, %v1076_v38  ;;  %997 = vmatprep.mubr.msk.bf16.mxu1 %vm446_vm0, %v1078_v39 }
  0x5d   :  { %632 = vmatmul.mubr.bf16.gmra.mrb[28].mxu0 %v1080_v40  ;;  %760 = vmatmul.mubr.bf16.gmra.mrb[28].mxu1 %v1081_v41 }
  0x5e   :  { %982 = vmatprep.mubr.msk.bf16.mxu0 %vm446_vm0, %v1082_v42  ;;  %998 = vmatprep.mubr.msk.bf16.mxu1 %vm446_vm0, %v1084_v43 }
  0x65   :  { %640 = vmatmul.mubr.bf16.gmra.mrb[32].mxu0 %v1086_v44  ;;  %768 = vmatmul.mubr.bf16.gmra.mrb[32].mxu1 %v1087_v45 }
  0x66   :  { %983 = vmatprep.mubr.msk.bf16.mxu0 %vm446_vm0, %v1088_v46  ;;  %999 = vmatprep.mubr.msk.bf16.mxu1 %vm446_vm0, %v1090_v47 }
  0x6d   :  { %648 = vmatmul.mubr.bf16.gmra.mrb[36].mxu0 %v1092_v48  ;;  %776 = vmatmul.mubr.bf16.gmra.mrb[36].mxu1 %v1093_v49 }
  0x6e   :  { %984 = vmatprep.mubr.msk.bf16.mxu0 %vm446_vm0, %v1094_v50  ;;  %1000 = vmatprep.mubr.msk.bf16.mxu1 %vm446_vm0, %v1096_v51 }
  0x75   :  { %656 = vmatmul.mubr.bf16.gmra.mrb[40].mxu0 %v1098_v52  ;;  %784 = vmatmul.mubr.bf16.gmra.mrb[40].mxu1 %v1099_v53 }
  0x76   :  { %985 = vmatprep.mubr.msk.bf16.mxu0 %vm446_vm0, %v1100_v54  ;;  %1001 = vmatprep.mubr.msk.bf16.mxu1 %vm446_vm0, %v1102_v55 }
  0x7d   :  { %664 = vmatmul.mubr.bf16.gmra.mrb[44].mxu0 %v1104_v56  ;;  %792 = vmatmul.mubr.bf16.gmra.mrb[44].mxu1 %v1105_v57 }
  0x7e   :  { %986 = vmatprep.mubr.msk.bf16.mxu0 %vm446_vm0, %v1106_v58  ;;  %1002 = vmatprep.mubr.msk.bf16.mxu1 %vm446_vm0, %v1108_v59 }
  0x85   :  { %672 = vmatmul.mubr.bf16.gmra.mrb[48].mxu0 %v1110_v60  ;;  %800 = vmatmul.mubr.bf16.gmra.mrb[48].mxu1 %v1111_v61 }
  0x86   :  { %987 = vmatprep.mubr.msk.bf16.mxu0 %vm446_vm0, %v1112_v62  ;;  %1003 = vmatprep.mubr.msk.bf16.mxu1 %vm446_vm0, %v1114_v63 }
  0x8d   :  { %680 = vmatmul.mubr.bf16.gmra.mrb[52].mxu0 %v1116_v0  ;;  %808 = vmatmul.mubr.bf16.gmra.mrb[52].mxu1 %v1117_v1 }
  0x8e   :  { %988 = vmatprep.mubr.msk.bf16.mxu0 %vm446_vm0, %v1118_v2  ;;  %1004 = vmatprep.mubr.msk.bf16.mxu1 %vm446_vm0, %v1120_v3 }
  0x95   :  { %688 = vmatmul.mubr.bf16.gmra.mrb[56].mxu0 %v1122_v4  ;;  %816 = vmatmul.mubr.bf16.gmra.mrb[56].mxu1 %v1123_v5 }
  0x96   :  { %989 = vmatprep.mubr.msk.bf16.mxu0 %vm446_vm0, %v1124_v6  ;;  %1005 = vmatprep.mubr.msk.bf16.mxu1 %vm446_vm0, %v1126_v7 }
  0x9d   :  { %696 = vmatmul.mubr.bf16.gmra.mrb[60].mxu0 %v1128_v8  ;;  %824 = vmatmul.mubr.bf16.gmra.mrb[60].mxu1 %v1129_v9 }
  0xf8   :  { %v577_v11 = vpop.f32.mrb[0].mxu0  ;;  %v705_v12 = vpop.f32.mrb[0].mxu1 }
  0xf9   :  { %v578_v13 = vadd.f32 %v1405_v10, %v577_v11  ;;  %v706_v14 = vadd.f32 %v1405_v10, %v705_v12  ;;  %v579_v15 = vpop.f32.mrb[1].mxu0  ;;  %v707_v16 = vpop.f32.mrb[1].mxu1 }
  0xfa   :  { %v580_v17 = vpop.f32.mrb[2].mxu0  ;;  %v708_v18 = vpop.f32.mrb[2].mxu1 }
  0xfb   :  { %832 = vst.msk [vmem:[%s1730_s3] sm:$0xff] %vm446_vm0, %v578_v13  ;;  %864 = vst.msk [vmem:[%s1730_s3 + $0x100] sm:$0xff] %vm446_vm0, %v706_v14  ;;  %v581_v19 = vadd.f32 %v1405_v10, %v580_v17  ;;  %v709_v20 = vadd.f32 %v1405_v10, %v708_v18  ;;  %v582_v21 = vpop.f32.mrb[3].mxu0  ;;  %v710_v22 = vpop.f32.mrb[3].mxu1 }
  0xfd   :  { %833 = vst.msk [vmem:[%s1730_s3 + $0x8] sm:$0xff] %vm446_vm0, %v581_v19  ;;  %865 = vst.msk [vmem:[%s1730_s3 + $0x108] sm:$0xff] %vm446_vm0, %v709_v20 }
 0x100   :  { %v585_v23 = vpop.f32.mrb[4].mxu0  ;;  %v713_v24 = vpop.f32.mrb[4].mxu1 }
 0x101   :  { %v586_v25 = vadd.f32 %v1405_v10, %v585_v23  ;;  %v714_v26 = vadd.f32 %v1405_v10, %v713_v24  ;;  %v587_v27 = vpop.f32.mrb[5].mxu0  ;;  %v715_v28 = vpop.f32.mrb[5].mxu1 }
 0x102   :  { %v588_v29 = vpop.f32.mrb[6].mxu0  ;;  %v716_v30 = vpop.f32.mrb[6].mxu1 }
 0x103   :  { %834 = vst.msk [vmem:[%s1730_s3 + $0x10] sm:$0xff] %vm446_vm0, %v586_v25  ;;  %866 = vst.msk [vmem:[%s1730_s3 + $0x110] sm:$0xff] %vm446_vm0, %v714_v26  ;;  %v589_v31 = vadd.f32 %v1405_v10, %v588_v29  ;;  %v717_v32 = vadd.f32 %v1405_v10, %v716_v30  ;;  %v590_v33 = vpop.f32.mrb[7].mxu0  ;;  %v718_v34 = vpop.f32.mrb[7].mxu1 }
 0x105   :  { %835 = vst.msk [vmem:[%s1730_s3 + $0x18] sm:$0xff] %vm446_vm0, %v589_v31  ;;  %867 = vst.msk [vmem:[%s1730_s3 + $0x118] sm:$0xff] %vm446_vm0, %v717_v32 }
 0x108   :  { %v593_v35 = vpop.f32.mrb[8].mxu0  ;;  %v721_v36 = vpop.f32.mrb[8].mxu1 }
 0x109   :  { %v594_v37 = vadd.f32 %v1405_v10, %v593_v35  ;;  %v722_v38 = vadd.f32 %v1405_v10, %v721_v36  ;;  %v595_v39 = vpop.f32.mrb[9].mxu0  ;;  %v723_v40 = vpop.f32.mrb[9].mxu1 }
 0x10a   :  { %v596_v41 = vpop.f32.mrb[10].mxu0  ;;  %v724_v42 = vpop.f32.mrb[10].mxu1 }
 0x10b   :  { %836 = vst.msk [vmem:[%s1730_s3 + $0x20] sm:$0xff] %vm446_vm0, %v594_v37  ;;  %868 = vst.msk [vmem:[%s1730_s3 + $0x120] sm:$0xff] %vm446_vm0, %v722_v38  ;;  %v597_v43 = vadd.f32 %v1405_v10, %v596_v41  ;;  %v725_v44 = vadd.f32 %v1405_v10, %v724_v42  ;;  %v598_v45 = vpop.f32.mrb[11].mxu0  ;;  %v726_v46 = vpop.f32.mrb[11].mxu1 }
 0x10d   :  { %837 = vst.msk [vmem:[%s1730_s3 + $0x28] sm:$0xff] %vm446_vm0, %v597_v43  ;;  %869 = vst.msk [vmem:[%s1730_s3 + $0x128] sm:$0xff] %vm446_vm0, %v725_v44 }
 0x110   :  { %v601_v47 = vpop.f32.mrb[12].mxu0  ;;  %v729_v48 = vpop.f32.mrb[12].mxu1 }
 0x111   :  { %v602_v49 = vadd.f32 %v1405_v10, %v601_v47  ;;  %v730_v50 = vadd.f32 %v1405_v10, %v729_v48  ;;  %v603_v51 = vpop.f32.mrb[13].mxu0  ;;  %v731_v52 = vpop.f32.mrb[13].mxu1 }
 0x112   :  { %v604_v53 = vpop.f32.mrb[14].mxu0  ;;  %v732_v54 = vpop.f32.mrb[14].mxu1 }
 0x113   :  { %838 = vst.msk [vmem:[%s1730_s3 + $0x30] sm:$0xff] %vm446_vm0, %v602_v49  ;;  %870 = vst.msk [vmem:[%s1730_s3 + $0x130] sm:$0xff] %vm446_vm0, %v730_v50  ;;  %v605_v55 = vadd.f32 %v1405_v10, %v604_v53  ;;  %v733_v56 = vadd.f32 %v1405_v10, %v732_v54  ;;  %v606_v57 = vpop.f32.mrb[15].mxu0  ;;  %v734_v58 = vpop.f32.mrb[15].mxu1 }
 0x115   :  { %839 = vst.msk [vmem:[%s1730_s3 + $0x38] sm:$0xff] %vm446_vm0, %v605_v55  ;;  %871 = vst.msk [vmem:[%s1730_s3 + $0x138] sm:$0xff] %vm446_vm0, %v733_v56 }
 0x118   :  { %v609_v59 = vpop.f32.mrb[16].mxu0  ;;  %v737_v60 = vpop.f32.mrb[16].mxu1 }
 0x119   :  { %v610_v61 = vadd.f32 %v1405_v10, %v609_v59  ;;  %v738_v62 = vadd.f32 %v1405_v10, %v737_v60  ;;  %v611_v63 = vpop.f32.mrb[17].mxu0  ;;  %v739_v0 = vpop.f32.mrb[17].mxu1 }
 0x11a   :  { %v612_v1 = vpop.f32.mrb[18].mxu0  ;;  %v740_v2 = vpop.f32.mrb[18].mxu1 }
 0x11b   :  { %840 = vst.msk [vmem:[%s1730_s3 + $0x40] sm:$0xff] %vm446_vm0, %v610_v61  ;;  %872 = vst.msk [vmem:[%s1730_s3 + $0x140] sm:$0xff] %vm446_vm0, %v738_v62  ;;  %v613_v3 = vadd.f32 %v1405_v10, %v612_v1  ;;  %v741_v4 = vadd.f32 %v1405_v10, %v740_v2  ;;  %v614_v5 = vpop.f32.mrb[19].mxu0  ;;  %v742_v6 = vpop.f32.mrb[19].mxu1 }
 0x11d   :  { %841 = vst.msk [vmem:[%s1730_s3 + $0x48] sm:$0xff] %vm446_vm0, %v613_v3  ;;  %873 = vst.msk [vmem:[%s1730_s3 + $0x148] sm:$0xff] %vm446_vm0, %v741_v4 }
 0x120   :  { %v617_v7 = vpop.f32.mrb[20].mxu0  ;;  %v745_v8 = vpop.f32.mrb[20].mxu1 }
 0x121   :  { %v618_v9 = vadd.f32 %v1405_v10, %v617_v7  ;;  %v746_v11 = vadd.f32 %v1405_v10, %v745_v8  ;;  %v619_v12 = vpop.f32.mrb[21].mxu0  ;;  %v747_v13 = vpop.f32.mrb[21].mxu1 }
 0x122   :  { %v620_v14 = vpop.f32.mrb[22].mxu0  ;;  %v748_v15 = vpop.f32.mrb[22].mxu1 }
 0x123   :  { %842 = vst.msk [vmem:[%s1730_s3 + $0x50] sm:$0xff] %vm446_vm0, %v618_v9  ;;  %874 = vst.msk [vmem:[%s1730_s3 + $0x150] sm:$0xff] %vm446_vm0, %v746_v11  ;;  %v621_v16 = vadd.f32 %v1405_v10, %v620_v14  ;;  %v749_v17 = vadd.f32 %v1405_v10, %v748_v15  ;;  %v622_v18 = vpop.f32.mrb[23].mxu0  ;;  %v750_v19 = vpop.f32.mrb[23].mxu1 }
 0x125   :  { %843 = vst.msk [vmem:[%s1730_s3 + $0x58] sm:$0xff] %vm446_vm0, %v621_v16  ;;  %875 = vst.msk [vmem:[%s1730_s3 + $0x158] sm:$0xff] %vm446_vm0, %v749_v17 }
 0x128   :  { %v625_v20 = vpop.f32.mrb[24].mxu0  ;;  %v753_v21 = vpop.f32.mrb[24].mxu1 }
 0x129   :  { %v626_v22 = vadd.f32 %v1405_v10, %v625_v20  ;;  %v754_v23 = vadd.f32 %v1405_v10, %v753_v21  ;;  %v627_v24 = vpop.f32.mrb[25].mxu0  ;;  %v755_v25 = vpop.f32.mrb[25].mxu1 }
 0x12a   :  { %v628_v26 = vpop.f32.mrb[26].mxu0  ;;  %v756_v27 = vpop.f32.mrb[26].mxu1 }
 0x12b   :  { %844 = vst.msk [vmem:[%s1730_s3 + $0x60] sm:$0xff] %vm446_vm0, %v626_v22  ;;  %876 = vst.msk [vmem:[%s1730_s3 + $0x160] sm:$0xff] %vm446_vm0, %v754_v23  ;;  %v629_v28 = vadd.f32 %v1405_v10, %v628_v26  ;;  %v757_v29 = vadd.f32 %v1405_v10, %v756_v27  ;;  %v630_v30 = vpop.f32.mrb[27].mxu0  ;;  %v758_v31 = vpop.f32.mrb[27].mxu1 }
 0x12d   :  { %845 = vst.msk [vmem:[%s1730_s3 + $0x68] sm:$0xff] %vm446_vm0, %v629_v28  ;;  %877 = vst.msk [vmem:[%s1730_s3 + $0x168] sm:$0xff] %vm446_vm0, %v757_v29 }
 0x130   :  { %v633_v32 = vpop.f32.mrb[28].mxu0  ;;  %v761_v33 = vpop.f32.mrb[28].mxu1 }
 0x131   :  { %v634_v34 = vadd.f32 %v1405_v10, %v633_v32  ;;  %v762_v35 = vadd.f32 %v1405_v10, %v761_v33  ;;  %v635_v36 = vpop.f32.mrb[29].mxu0  ;;  %v763_v37 = vpop.f32.mrb[29].mxu1 }
 0x132   :  { %v636_v38 = vpop.f32.mrb[30].mxu0  ;;  %v764_v39 = vpop.f32.mrb[30].mxu1 }
 0x133   :  { %846 = vst.msk [vmem:[%s1730_s3 + $0x70] sm:$0xff] %vm446_vm0, %v634_v34  ;;  %878 = vst.msk [vmem:[%s1730_s3 + $0x170] sm:$0xff] %vm446_vm0, %v762_v35  ;;  %v637_v40 = vadd.f32 %v1405_v10, %v636_v38  ;;  %v765_v41 = vadd.f32 %v1405_v10, %v764_v39  ;;  %v638_v42 = vpop.f32.mrb[31].mxu0  ;;  %v766_v43 = vpop.f32.mrb[31].mxu1 }
 0x135   :  { %847 = vst.msk [vmem:[%s1730_s3 + $0x78] sm:$0xff] %vm446_vm0, %v637_v40  ;;  %879 = vst.msk [vmem:[%s1730_s3 + $0x178] sm:$0xff] %vm446_vm0, %v765_v41 }
 0x138   :  { %v641_v44 = vpop.f32.mrb[32].mxu0  ;;  %v769_v45 = vpop.f32.mrb[32].mxu1 }
 0x139   :  { %v642_v46 = vadd.f32 %v1405_v10, %v641_v44  ;;  %v770_v47 = vadd.f32 %v1405_v10, %v769_v45  ;;  %v643_v48 = vpop.f32.mrb[33].mxu0  ;;  %v771_v49 = vpop.f32.mrb[33].mxu1 }
 0x13a   :  { %v644_v50 = vpop.f32.mrb[34].mxu0  ;;  %v772_v51 = vpop.f32.mrb[34].mxu1 }
 0x13b   :  { %848 = vst.msk [vmem:[%s1730_s3 + $0x80] sm:$0xff] %vm446_vm0, %v642_v46  ;;  %880 = vst.msk [vmem:[%s1730_s3 + $0x180] sm:$0xff] %vm446_vm0, %v770_v47  ;;  %v645_v52 = vadd.f32 %v1405_v10, %v644_v50  ;;  %v773_v53 = vadd.f32 %v1405_v10, %v772_v51  ;;  %v646_v54 = vpop.f32.mrb[35].mxu0  ;;  %v774_v55 = vpop.f32.mrb[35].mxu1 }
 0x13d   :  { %849 = vst.msk [vmem:[%s1730_s3 + $0x88] sm:$0xff] %vm446_vm0, %v645_v52  ;;  %881 = vst.msk [vmem:[%s1730_s3 + $0x188] sm:$0xff] %vm446_vm0, %v773_v53 }
 0x140   :  { %v649_v56 = vpop.f32.mrb[36].mxu0  ;;  %v777_v57 = vpop.f32.mrb[36].mxu1 }
 0x141   :  { %v650_v58 = vadd.f32 %v1405_v10, %v649_v56  ;;  %v778_v59 = vadd.f32 %v1405_v10, %v777_v57  ;;  %v651_v60 = vpop.f32.mrb[37].mxu0  ;;  %v779_v61 = vpop.f32.mrb[37].mxu1 }
 0x142   :  { %v652_v62 = vpop.f32.mrb[38].mxu0  ;;  %v780_v63 = vpop.f32.mrb[38].mxu1 }
 0x143   :  { %850 = vst.msk [vmem:[%s1730_s3 + $0x90] sm:$0xff] %vm446_vm0, %v650_v58  ;;  %882 = vst.msk [vmem:[%s1730_s3 + $0x190] sm:$0xff] %vm446_vm0, %v778_v59  ;;  %v653_v0 = vadd.f32 %v1405_v10, %v652_v62  ;;  %v781_v1 = vadd.f32 %v1405_v10, %v780_v63  ;;  %v654_v2 = vpop.f32.mrb[39].mxu0  ;;  %v782_v3 = vpop.f32.mrb[39].mxu1 }
 0x145   :  { %851 = vst.msk [vmem:[%s1730_s3 + $0x98] sm:$0xff] %vm446_vm0, %v653_v0  ;;  %883 = vst.msk [vmem:[%s1730_s3 + $0x198] sm:$0xff] %vm446_vm0, %v781_v1 }
 0x148   :  { %v657_v4 = vpop.f32.mrb[40].mxu0  ;;  %v785_v5 = vpop.f32.mrb[40].mxu1 }
 0x149   :  { %v658_v6 = vadd.f32 %v1405_v10, %v657_v4  ;;  %v786_v7 = vadd.f32 %v1405_v10, %v785_v5  ;;  %v659_v8 = vpop.f32.mrb[41].mxu0  ;;  %v787_v9 = vpop.f32.mrb[41].mxu1 }
 0x14a   :  { %v660_v11 = vpop.f32.mrb[42].mxu0  ;;  %v788_v12 = vpop.f32.mrb[42].mxu1 }
 0x14b   :  { %852 = vst.msk [vmem:[%s1730_s3 + $0xa0] sm:$0xff] %vm446_vm0, %v658_v6  ;;  %884 = vst.msk [vmem:[%s1730_s3 + $0x1a0] sm:$0xff] %vm446_vm0, %v786_v7  ;;  %v661_v13 = vadd.f32 %v1405_v10, %v660_v11  ;;  %v789_v14 = vadd.f32 %v1405_v10, %v788_v12  ;;  %v662_v15 = vpop.f32.mrb[43].mxu0  ;;  %v790_v16 = vpop.f32.mrb[43].mxu1 }
 0x14d   :  { %853 = vst.msk [vmem:[%s1730_s3 + $0xa8] sm:$0xff] %vm446_vm0, %v661_v13  ;;  %885 = vst.msk [vmem:[%s1730_s3 + $0x1a8] sm:$0xff] %vm446_vm0, %v789_v14 }
 0x150   :  { %v665_v17 = vpop.f32.mrb[44].mxu0  ;;  %v793_v18 = vpop.f32.mrb[44].mxu1 }
 0x151   :  { %v666_v19 = vadd.f32 %v1405_v10, %v665_v17  ;;  %v794_v20 = vadd.f32 %v1405_v10, %v793_v18  ;;  %v667_v21 = vpop.f32.mrb[45].mxu0  ;;  %v795_v22 = vpop.f32.mrb[45].mxu1 }
 0x152   :  { %v668_v23 = vpop.f32.mrb[46].mxu0  ;;  %v796_v24 = vpop.f32.mrb[46].mxu1 }
 0x153   :  { %854 = vst.msk [vmem:[%s1730_s3 + $0xb0] sm:$0xff] %vm446_vm0, %v666_v19  ;;  %886 = vst.msk [vmem:[%s1730_s3 + $0x1b0] sm:$0xff] %vm446_vm0, %v794_v20  ;;  %v669_v25 = vadd.f32 %v1405_v10, %v668_v23  ;;  %v797_v26 = vadd.f32 %v1405_v10, %v796_v24  ;;  %v670_v27 = vpop.f32.mrb[47].mxu0  ;;  %v798_v28 = vpop.f32.mrb[47].mxu1 }
 0x155   :  { %855 = vst.msk [vmem:[%s1730_s3 + $0xb8] sm:$0xff] %vm446_vm0, %v669_v25  ;;  %887 = vst.msk [vmem:[%s1730_s3 + $0x1b8] sm:$0xff] %vm446_vm0, %v797_v26 }
 0x158   :  { %v673_v29 = vpop.f32.mrb[48].mxu0  ;;  %v801_v30 = vpop.f32.mrb[48].mxu1 }
 0x159   :  { %v674_v31 = vadd.f32 %v1405_v10, %v673_v29  ;;  %v802_v32 = vadd.f32 %v1405_v10, %v801_v30  ;;  %v675_v33 = vpop.f32.mrb[49].mxu0  ;;  %v803_v34 = vpop.f32.mrb[49].mxu1 }
 0x15a   :  { %v676_v35 = vpop.f32.mrb[50].mxu0  ;;  %v804_v36 = vpop.f32.mrb[50].mxu1 }
 0x15b   :  { %856 = vst.msk [vmem:[%s1730_s3 + $0xc0] sm:$0xff] %vm446_vm0, %v674_v31  ;;  %888 = vst.msk [vmem:[%s1730_s3 + $0x1c0] sm:$0xff] %vm446_vm0, %v802_v32  ;;  %v677_v37 = vadd.f32 %v1405_v10, %v676_v35  ;;  %v805_v38 = vadd.f32 %v1405_v10, %v804_v36  ;;  %v678_v39 = vpop.f32.mrb[51].mxu0  ;;  %v806_v40 = vpop.f32.mrb[51].mxu1 }
 0x15d   :  { %857 = vst.msk [vmem:[%s1730_s3 + $0xc8] sm:$0xff] %vm446_vm0, %v677_v37  ;;  %889 = vst.msk [vmem:[%s1730_s3 + $0x1c8] sm:$0xff] %vm446_vm0, %v805_v38 }
 0x160   :  { %v681_v41 = vpop.f32.mrb[52].mxu0  ;;  %v809_v42 = vpop.f32.mrb[52].mxu1 }
 0x161   :  { %v682_v43 = vadd.f32 %v1405_v10, %v681_v41  ;;  %v810_v44 = vadd.f32 %v1405_v10, %v809_v42  ;;  %v683_v45 = vpop.f32.mrb[53].mxu0  ;;  %v811_v46 = vpop.f32.mrb[53].mxu1 }
 0x162   :  { %v684_v47 = vpop.f32.mrb[54].mxu0  ;;  %v812_v48 = vpop.f32.mrb[54].mxu1 }
 0x163   :  { %858 = vst.msk [vmem:[%s1730_s3 + $0xd0] sm:$0xff] %vm446_vm0, %v682_v43  ;;  %890 = vst.msk [vmem:[%s1730_s3 + $0x1d0] sm:$0xff] %vm446_vm0, %v810_v44  ;;  %v685_v49 = vadd.f32 %v1405_v10, %v684_v47  ;;  %v813_v50 = vadd.f32 %v1405_v10, %v812_v48  ;;  %v686_v51 = vpop.f32.mrb[55].mxu0  ;;  %v814_v52 = vpop.f32.mrb[55].mxu1 }
 0x165   :  { %859 = vst.msk [vmem:[%s1730_s3 + $0xd8] sm:$0xff] %vm446_vm0, %v685_v49  ;;  %891 = vst.msk [vmem:[%s1730_s3 + $0x1d8] sm:$0xff] %vm446_vm0, %v813_v50 }
 0x168   :  { %v689_v53 = vpop.f32.mrb[56].mxu0  ;;  %v817_v54 = vpop.f32.mrb[56].mxu1 }
 0x169   :  { %v690_v55 = vadd.f32 %v1405_v10, %v689_v53  ;;  %v818_v56 = vadd.f32 %v1405_v10, %v817_v54  ;;  %v691_v57 = vpop.f32.mrb[57].mxu0  ;;  %v819_v58 = vpop.f32.mrb[57].mxu1 }
 0x16a   :  { %v692_v59 = vpop.f32.mrb[58].mxu0  ;;  %v820_v60 = vpop.f32.mrb[58].mxu1 }
 0x16b   :  { %860 = vst.msk [vmem:[%s1730_s3 + $0xe0] sm:$0xff] %vm446_vm0, %v690_v55  ;;  %892 = vst.msk [vmem:[%s1730_s3 + $0x1e0] sm:$0xff] %vm446_vm0, %v818_v56  ;;  %v693_v61 = vadd.f32 %v1405_v10, %v692_v59  ;;  %v821_v62 = vadd.f32 %v1405_v10, %v820_v60  ;;  %v694_v63 = vpop.f32.mrb[59].mxu0  ;;  %v822_v0 = vpop.f32.mrb[59].mxu1 }
 0x16d   :  { %861 = vst.msk [vmem:[%s1730_s3 + $0xe8] sm:$0xff] %vm446_vm0, %v693_v61  ;;  %893 = vst.msk [vmem:[%s1730_s3 + $0x1e8] sm:$0xff] %vm446_vm0, %v821_v62 }
 0x170   :  { %v697_v1 = vpop.f32.mrb[60].mxu0  ;;  %v825_v2 = vpop.f32.mrb[60].mxu1 }
 0x171   :  { %v698_v3 = vadd.f32 %v1405_v10, %v697_v1  ;;  %v826_v4 = vadd.f32 %v1405_v10, %v825_v2  ;;  %v699_v5 = vpop.f32.mrb[61].mxu0  ;;  %v827_v6 = vpop.f32.mrb[61].mxu1 }
 0x172   :  { %v700_v7 = vpop.f32.mrb[62].mxu0  ;;  %v828_v8 = vpop.f32.mrb[62].mxu1 }
 0x173   :  { %862 = vst.msk [vmem:[%s1730_s3 + $0xf0] sm:$0xff] %vm446_vm0, %v698_v3  ;;  %894 = vst.msk [vmem:[%s1730_s3 + $0x1f0] sm:$0xff] %vm446_vm0, %v826_v4  ;;  %v701_v9 = vadd.f32 %v1405_v10, %v700_v7  ;;  %v829_v11 = vadd.f32 %v1405_v10, %v828_v8  ;;  %v702_v12 = vpop.f32.mrb[63].mxu0  ;;  %v830_v13 = vpop.f32.mrb[63].mxu1 }
 0x175   :  { %863 = vst.msk [vmem:[%s1730_s3 + $0xf8] sm:$0xff] %vm446_vm0, %v701_v9  ;;  %895 = vst.msk [vmem:[%s1730_s3 + $0x1f8] sm:$0xff] %vm446_vm0, %v829_v11 }

// kernel: block_d_forward.12
= control target key start
LH: loop header
LB: loop body
LE: loop exit
PB: predicated region body
PF: predicated region fallthrough
CT: control target
= control target key end

     0   :  { %v1796_v0 = vmov 0   ;;  %vm452_vm0 = vcmask 130048   ;;  %vm1364_vm1 = vcmask 125952   ;;  %s2534_s1 = inlined_call_operand.vmem [shape: bf16[144,16], index: 1, kind: input, shape index: {}]   ;;  %s2535_s0 = inlined_call_operand.vmem [shape: bf16[512,144], index: 0, kind: input, shape index: {}]   ;;  %s2536_s2 = inlined_call_operand.vmem [shape: f32[1,16], index: 2, kind: input, shape index: {}]   ;;  %s2537_s3 = inlined_call_operand.vmem [shape: f32[1,16], index: 3, kind: input, shape index: {}]   ;;  %s2538_s4 = inlined_call_operand.vmem [shape: f32[1,16], index: 4, kind: input, shape index: {}]   ;;  %s2539_s5 = inlined_call_operand.vmem [shape: bf16[512,16], index: 5, kind: output, shape index: {}]  }
   0x1   :  { %549 = vmatprep.subr.bf16.mxu0 %v1796_v0  ;;  %1669 = vmatprep.subr.bf16.mxu1 %v1796_v0  ;;  %v1688_v1 = vld [vmem:[%s2534_s1] sm:$0xff]   ;;  %v1689_v2 = vld [vmem:[%s2534_s1 + $0x8] sm:$0xff]   ;;  %v1690_v3 = vld [vmem:[%s2534_s1 + $0x10] sm:$0xff]  }
   0x2   :  { %550 = vmatpush1.bf16.msra.mxu0 %v1688_v1  ;;  %1678 = vmatpush1.bf16.msra.mxu1 %v1688_v1  ;;  %v1691_v4 = vld [vmem:[%s2534_s1 + $0x18] sm:$0xff]   ;;  %v1699_v5 = vld [vmem:[%s2535_s0 + $0x4] ss:$8 sps:$4 sm:$0xff]   ;;  %v1694_v9 = vld [vmem:[%s2534_s1 + $0x30] sm:$0xff]  }
   0x3   :  { %551 = vmatprep.subr.bf16.mxu0 %v1796_v0  ;;  %1670 = vmatprep.subr.bf16.mxu1 %v1796_v0  ;;  %v1702_v6 = vld [vmem:[%s2535_s0 + $0x104] ss:$8 sps:$4 sm:$0xff]   ;;  %v1695_v10 = vld [vmem:[%s2534_s1 + $0x38] sm:$0xff]   ;;  %v1697_v12 = vld [vmem:[%s2535_s0] ss:$8 sps:$4 sm:$0xff]  }
   0x4   :  { %1507 = vmatprep.mubr.msk.bf16.mxu0 %vm452_vm0, %v1699_v5  ;;  %1523 = vmatprep.mubr.msk.bf16.mxu1 %vm452_vm0, %v1702_v6  ;;  %v1692_v7 = vld [vmem:[%s2534_s1 + $0x20] sm:$0xff]   ;;  %v1693_v8 = vld [vmem:[%s2534_s1 + $0x28] sm:$0xff]   ;;  %v1703_v14 = vld [vmem:[%s2535_s0 + $0x14] ss:$8 sps:$4 sm:$0xff]  }
   0x5   :  { %v1696_v11 = vld [vmem:[%s2534_s1 + $0x40] sm:$0xff]   ;;  %v1705_v15 = vld [vmem:[%s2535_s0 + $0x114] ss:$8 sps:$4 sm:$0xff]   ;;  %v1707_v16 = vld [vmem:[%s2535_s0 + $0x10] ss:$8 sps:$4 sm:$0xff]  }
   0x6   :  { %552 = vmatpush1.bf16.msra.mxu0 %v1689_v2  ;;  %1679 = vmatpush1.bf16.msra.mxu1 %v1689_v2  ;;  %v1700_v13 = vld [vmem:[%s2535_s0 + $0x100] ss:$8 sps:$4 sm:$0xff]   ;;  %v1708_v17 = vld [vmem:[%s2535_s0 + $0x110] ss:$8 sps:$4 sm:$0xff]   ;;  %v1709_v18 = vld [vmem:[%s2535_s0 + $0x24] ss:$8 sps:$4 sm:$0xff]  }
   0x7   :  { %553 = vmatprep.subr.bf16.mxu0 %v1796_v0  ;;  %1671 = vmatprep.subr.bf16.mxu1 %v1796_v0  ;;  %v1711_v19 = vld [vmem:[%s2535_s0 + $0x124] ss:$8 sps:$4 sm:$0xff]   ;;  %v1713_v20 = vld [vmem:[%s2535_s0 + $0x20] ss:$8 sps:$4 sm:$0xff]   ;;  %v1715_v22 = vld [vmem:[%s2535_s0 + $0x34] ss:$8 sps:$4 sm:$0xff]  }
   0x8   :  { %v1714_v21 = vld [vmem:[%s2535_s0 + $0x120] ss:$8 sps:$4 sm:$0xff]   ;;  %v1717_v23 = vld [vmem:[%s2535_s0 + $0x134] ss:$8 sps:$4 sm:$0xff]   ;;  %v1719_v24 = vld [vmem:[%s2535_s0 + $0x30] ss:$8 sps:$4 sm:$0xff]  }
   0x9   :  { %v1720_v25 = vld [vmem:[%s2535_s0 + $0x130] ss:$8 sps:$4 sm:$0xff]   ;;  %v1721_v26 = vld [vmem:[%s2535_s0 + $0x44] ss:$8 sps:$4 sm:$0xff]   ;;  %v1725_v28 = vld [vmem:[%s2535_s0 + $0x40] ss:$8 sps:$4 sm:$0xff]  }
   0xa   :  { %554 = vmatpush1.bf16.msra.mxu0 %v1690_v3  ;;  %1680 = vmatpush1.bf16.msra.mxu1 %v1690_v3  ;;  %v1723_v27 = vld [vmem:[%s2535_s0 + $0x144] ss:$8 sps:$4 sm:$0xff]   ;;  %v1726_v29 = vld [vmem:[%s2535_s0 + $0x140] ss:$8 sps:$4 sm:$0xff]   ;;  %v1727_v30 = vld [vmem:[%s2535_s0 + $0x54] ss:$8 sps:$4 sm:$0xff]  }
   0xb   :  { %555 = vmatprep.subr.bf16.mxu0 %v1796_v0  ;;  %1672 = vmatprep.subr.bf16.mxu1 %v1796_v0  ;;  %v1729_v31 = vld [vmem:[%s2535_s0 + $0x154] ss:$8 sps:$4 sm:$0xff]   ;;  %v1731_v32 = vld [vmem:[%s2535_s0 + $0x50] ss:$8 sps:$4 sm:$0xff]   ;;  %v1733_v34 = vld [vmem:[%s2535_s0 + $0x64] ss:$8 sps:$4 sm:$0xff]  }
   0xc   :  { %v1732_v33 = vld [vmem:[%s2535_s0 + $0x150] ss:$8 sps:$4 sm:$0xff]   ;;  %v1735_v35 = vld [vmem:[%s2535_s0 + $0x164] ss:$8 sps:$4 sm:$0xff]   ;;  %v1737_v36 = vld [vmem:[%s2535_s0 + $0x60] ss:$8 sps:$4 sm:$0xff]  }
   0xd   :  { %v1738_v37 = vld [vmem:[%s2535_s0 + $0x160] ss:$8 sps:$4 sm:$0xff]   ;;  %v1739_v38 = vld [vmem:[%s2535_s0 + $0x74] ss:$8 sps:$4 sm:$0xff]   ;;  %v1743_v40 = vld [vmem:[%s2535_s0 + $0x70] ss:$8 sps:$4 sm:$0xff]  }
   0xe   :  { %556 = vmatpush1.bf16.msra.mxu0 %v1691_v4  ;;  %1681 = vmatpush1.bf16.msra.mxu1 %v1691_v4  ;;  %v1741_v39 = vld [vmem:[%s2535_s0 + $0x174] ss:$8 sps:$4 sm:$0xff]   ;;  %v1744_v41 = vld [vmem:[%s2535_s0 + $0x170] ss:$8 sps:$4 sm:$0xff]   ;;  %v1745_v42 = vld [vmem:[%s2535_s0 + $0x84] ss:$8 sps:$4 sm:$0xff]  }
   0xf   :  { %557 = vmatprep.subr.bf16.mxu0 %v1796_v0  ;;  %1673 = vmatprep.subr.bf16.mxu1 %v1796_v0  ;;  %v1747_v43 = vld [vmem:[%s2535_s0 + $0x184] ss:$8 sps:$4 sm:$0xff]   ;;  %v1749_v44 = vld [vmem:[%s2535_s0 + $0x80] ss:$8 sps:$4 sm:$0xff]   ;;  %v1751_v46 = vld [vmem:[%s2535_s0 + $0x94] ss:$8 sps:$4 sm:$0xff]  }
  0x10   :  { %v1750_v45 = vld [vmem:[%s2535_s0 + $0x180] ss:$8 sps:$4 sm:$0xff]   ;;  %v1753_v47 = vld [vmem:[%s2535_s0 + $0x194] ss:$8 sps:$4 sm:$0xff]   ;;  %v1755_v48 = vld [vmem:[%s2535_s0 + $0x90] ss:$8 sps:$4 sm:$0xff]  }
  0x11   :  { %v1756_v49 = vld [vmem:[%s2535_s0 + $0x190] ss:$8 sps:$4 sm:$0xff]   ;;  %v1757_v50 = vld [vmem:[%s2535_s0 + $0xa4] ss:$8 sps:$4 sm:$0xff]   ;;  %v1761_v52 = vld [vmem:[%s2535_s0 + $0xa0] ss:$8 sps:$4 sm:$0xff]  }
  0x12   :  { %558 = vmatpush1.bf16.msra.mxu0 %v1692_v7  ;;  %1682 = vmatpush1.bf16.msra.mxu1 %v1692_v7  ;;  %v1759_v51 = vld [vmem:[%s2535_s0 + $0x1a4] ss:$8 sps:$4 sm:$0xff]   ;;  %v1762_v53 = vld [vmem:[%s2535_s0 + $0x1a0] ss:$8 sps:$4 sm:$0xff]   ;;  %v1763_v54 = vld [vmem:[%s2535_s0 + $0xb4] ss:$8 sps:$4 sm:$0xff]  }
  0x13   :  { %559 = vmatprep.subr.bf16.mxu0 %v1796_v0  ;;  %1674 = vmatprep.subr.bf16.mxu1 %v1796_v0  ;;  %v1765_v55 = vld [vmem:[%s2535_s0 + $0x1b4] ss:$8 sps:$4 sm:$0xff]   ;;  %v1767_v56 = vld [vmem:[%s2535_s0 + $0xb0] ss:$8 sps:$4 sm:$0xff]   ;;  %v1769_v58 = vld [vmem:[%s2535_s0 + $0xc4] ss:$8 sps:$4 sm:$0xff]  }
  0x14   :  { %v1768_v57 = vld [vmem:[%s2535_s0 + $0x1b0] ss:$8 sps:$4 sm:$0xff]   ;;  %v1771_v59 = vld [vmem:[%s2535_s0 + $0x1c4] ss:$8 sps:$4 sm:$0xff]   ;;  %v1773_v60 = vld [vmem:[%s2535_s0 + $0xc0] ss:$8 sps:$4 sm:$0xff]  }
  0x15   :  { %v1774_v61 = vld [vmem:[%s2535_s0 + $0x1c0] ss:$8 sps:$4 sm:$0xff]   ;;  %v1775_v62 = vld [vmem:[%s2535_s0 + $0xd4] ss:$8 sps:$4 sm:$0xff]   ;;  %v1780_v1 = vld [vmem:[%s2535_s0 + $0x1d0] ss:$8 sps:$4 sm:$0xff]  }
  0x16   :  { %560 = vmatpush1.bf16.msra.mxu0 %v1693_v8  ;;  %1683 = vmatpush1.bf16.msra.mxu1 %v1693_v8  ;;  %v1777_v63 = vld [vmem:[%s2535_s0 + $0x1d4] ss:$8 sps:$4 sm:$0xff]   ;;  %v1781_v2 = vld [vmem:[%s2535_s0 + $0xe4] ss:$8 sps:$4 sm:$0xff]   ;;  %v1785_v4 = vld [vmem:[%s2535_s0 + $0xe0] ss:$8 sps:$4 sm:$0xff]  }
  0x17   :  { %561 = vmatprep.subr.bf16.mxu0 %v1796_v0  ;;  %1675 = vmatprep.subr.bf16.mxu1 %v1796_v0  ;;  %v1783_v3 = vld [vmem:[%s2535_s0 + $0x1e4] ss:$8 sps:$4 sm:$0xff]   ;;  %v1786_v5 = vld [vmem:[%s2535_s0 + $0x1e0] ss:$8 sps:$4 sm:$0xff]   ;;  %v1787_v6 = vld [vmem:[%s2535_s0 + $0xf4] ss:$8 sps:$4 sm:$0xff]  }
  0x18   :  { %v1789_v7 = vld [vmem:[%s2535_s0 + $0x1f4] ss:$8 sps:$4 sm:$0xff]   ;;  %v1791_v8 = vld [vmem:[%s2535_s0 + $0xf0] ss:$8 sps:$4 sm:$0xff]  }
  0x1a   :  { %562 = vmatpush1.bf16.msra.mxu0 %v1694_v9  ;;  %1684 = vmatpush1.bf16.msra.mxu1 %v1694_v9  ;;  %v1792_v9 = vld [vmem:[%s2535_s0 + $0x1f0] ss:$8 sps:$4 sm:$0xff]  }
  0x1b   :  { %563 = vmatprep.subr.bf16.mxu0 %v1796_v0  ;;  %1676 = vmatprep.subr.bf16.mxu1 %v1796_v0 }
  0x1e   :  { %564 = vmatpush1.bf16.msra.mxu0 %v1695_v10  ;;  %1685 = vmatpush1.bf16.msra.mxu1 %v1695_v10  ;;  %v2081_v10 = vld [vmem:[%s2536_s2] ss:$0 sm:$0xff] }
  0x1f   :  { %565 = vmatprep.subr.bf16.mxu0 %v1796_v0  ;;  %1677 = vmatprep.subr.bf16.mxu1 %v1796_v0  ;;  %v1779_v0 = vld [vmem:[%s2535_s0 + $0xd0] ss:$8 sps:$4 sm:$0xff]  }
  0x22   :  { %566 = vmatpush1.bf16.msra.mxu0 %v1696_v11  ;;  %1686 = vmatpush1.bf16.msra.mxu1 %v1696_v11 }
  0x25   :  { %582 = vmatmul.mubr.bf16.vlgmr.msra.gmra.mrb[0].mxu0 %v1697_v12  ;;  %710 = vmatmul.mubr.bf16.vlgmr.msra.gmra.mrb[0].mxu1 %v1700_v13  ;;  %v2086_v12 = vld [vmem:[%s2537_s3] ss:$0 sm:$0xff] }
  0x26   :  { %1508 = vmatprep.mubr.msk.bf16.mxu0 %vm452_vm0, %v1703_v14  ;;  %1524 = vmatprep.mubr.msk.bf16.mxu1 %vm452_vm0, %v1705_v15 }
  0x2d   :  { %590 = vmatmul.mubr.bf16.gmra.mrb[4].mxu0 %v1707_v16  ;;  %718 = vmatmul.mubr.bf16.gmra.mrb[4].mxu1 %v1708_v17 }
  0x2e   :  { %1509 = vmatprep.mubr.msk.bf16.mxu0 %vm452_vm0, %v1709_v18  ;;  %1525 = vmatprep.mubr.msk.bf16.mxu1 %vm452_vm0, %v1711_v19  ;;  %v2093_v18 = vld [vmem:[%s2538_s4] ss:$0 sm:$0xff] }
  0x35   :  { %598 = vmatmul.mubr.bf16.gmra.mrb[8].mxu0 %v1713_v20  ;;  %726 = vmatmul.mubr.bf16.gmra.mrb[8].mxu1 %v1714_v21 }
  0x36   :  { %1510 = vmatprep.mubr.msk.bf16.mxu0 %vm452_vm0, %v1715_v22  ;;  %1526 = vmatprep.mubr.msk.bf16.mxu1 %vm452_vm0, %v1717_v23 }
  0x3d   :  { %606 = vmatmul.mubr.bf16.gmra.mrb[12].mxu0 %v1719_v24  ;;  %734 = vmatmul.mubr.bf16.gmra.mrb[12].mxu1 %v1720_v25 }
  0x3e   :  { %1511 = vmatprep.mubr.msk.bf16.mxu0 %vm452_vm0, %v1721_v26  ;;  %1527 = vmatprep.mubr.msk.bf16.mxu1 %vm452_vm0, %v1723_v27 }
  0x45   :  { %614 = vmatmul.mubr.bf16.gmra.mrb[16].mxu0 %v1725_v28  ;;  %742 = vmatmul.mubr.bf16.gmra.mrb[16].mxu1 %v1726_v29 }
  0x46   :  { %1512 = vmatprep.mubr.msk.bf16.mxu0 %vm452_vm0, %v1727_v30  ;;  %1528 = vmatprep.mubr.msk.bf16.mxu1 %vm452_vm0, %v1729_v31 }
  0x4d   :  { %622 = vmatmul.mubr.bf16.gmra.mrb[20].mxu0 %v1731_v32  ;;  %750 = vmatmul.mubr.bf16.gmra.mrb[20].mxu1 %v1732_v33 }
  0x4e   :  { %1513 = vmatprep.mubr.msk.bf16.mxu0 %vm452_vm0, %v1733_v34  ;;  %1529 = vmatprep.mubr.msk.bf16.mxu1 %vm452_vm0, %v1735_v35 }
  0x55   :  { %630 = vmatmul.mubr.bf16.gmra.mrb[24].mxu0 %v1737_v36  ;;  %758 = vmatmul.mubr.bf16.gmra.mrb[24].mxu1 %v1738_v37 }
  0x56   :  { %1514 = vmatprep.mubr.msk.bf16.mxu0 %vm452_vm0, %v1739_v38  ;;  %1530 = vmatprep.mubr.msk.bf16.mxu1 %vm452_vm0, %v1741_v39 }
  0x5d   :  { %638 = vmatmul.mubr.bf16.gmra.mrb[28].mxu0 %v1743_v40  ;;  %766 = vmatmul.mubr.bf16.gmra.mrb[28].mxu1 %v1744_v41 }
  0x5e   :  { %1515 = vmatprep.mubr.msk.bf16.mxu0 %vm452_vm0, %v1745_v42  ;;  %1531 = vmatprep.mubr.msk.bf16.mxu1 %vm452_vm0, %v1747_v43 }
  0x65   :  { %646 = vmatmul.mubr.bf16.gmra.mrb[32].mxu0 %v1749_v44  ;;  %774 = vmatmul.mubr.bf16.gmra.mrb[32].mxu1 %v1750_v45 }
  0x66   :  { %1516 = vmatprep.mubr.msk.bf16.mxu0 %vm452_vm0, %v1751_v46  ;;  %1532 = vmatprep.mubr.msk.bf16.mxu1 %vm452_vm0, %v1753_v47 }
  0x6d   :  { %654 = vmatmul.mubr.bf16.gmra.mrb[36].mxu0 %v1755_v48  ;;  %782 = vmatmul.mubr.bf16.gmra.mrb[36].mxu1 %v1756_v49 }
  0x6e   :  { %1517 = vmatprep.mubr.msk.bf16.mxu0 %vm452_vm0, %v1757_v50  ;;  %1533 = vmatprep.mubr.msk.bf16.mxu1 %vm452_vm0, %v1759_v51 }
  0x75   :  { %662 = vmatmul.mubr.bf16.gmra.mrb[40].mxu0 %v1761_v52  ;;  %790 = vmatmul.mubr.bf16.gmra.mrb[40].mxu1 %v1762_v53 }
  0x76   :  { %1518 = vmatprep.mubr.msk.bf16.mxu0 %vm452_vm0, %v1763_v54  ;;  %1534 = vmatprep.mubr.msk.bf16.mxu1 %vm452_vm0, %v1765_v55 }
  0x7d   :  { %670 = vmatmul.mubr.bf16.gmra.mrb[44].mxu0 %v1767_v56  ;;  %798 = vmatmul.mubr.bf16.gmra.mrb[44].mxu1 %v1768_v57 }
  0x7e   :  { %1519 = vmatprep.mubr.msk.bf16.mxu0 %vm452_vm0, %v1769_v58  ;;  %1535 = vmatprep.mubr.msk.bf16.mxu1 %vm452_vm0, %v1771_v59 }
  0x85   :  { %678 = vmatmul.mubr.bf16.gmra.mrb[48].mxu0 %v1773_v60  ;;  %806 = vmatmul.mubr.bf16.gmra.mrb[48].mxu1 %v1774_v61 }
  0x86   :  { %1520 = vmatprep.mubr.msk.bf16.mxu0 %vm452_vm0, %v1775_v62  ;;  %1536 = vmatprep.mubr.msk.bf16.mxu1 %vm452_vm0, %v1777_v63 }
  0x8d   :  { %686 = vmatmul.mubr.bf16.gmra.mrb[52].mxu0 %v1779_v0  ;;  %814 = vmatmul.mubr.bf16.gmra.mrb[52].mxu1 %v1780_v1 }
  0x8e   :  { %1521 = vmatprep.mubr.msk.bf16.mxu0 %vm452_vm0, %v1781_v2  ;;  %1537 = vmatprep.mubr.msk.bf16.mxu1 %vm452_vm0, %v1783_v3 }
  0x95   :  { %694 = vmatmul.mubr.bf16.gmra.mrb[56].mxu0 %v1785_v4  ;;  %822 = vmatmul.mubr.bf16.gmra.mrb[56].mxu1 %v1786_v5 }
  0x96   :  { %1522 = vmatprep.mubr.msk.bf16.mxu0 %vm452_vm0, %v1787_v6  ;;  %1538 = vmatprep.mubr.msk.bf16.mxu1 %vm452_vm0, %v1789_v7 }
  0x9d   :  { %702 = vmatmul.mubr.bf16.gmra.mrb[60].mxu0 %v1791_v8  ;;  %830 = vmatmul.mubr.bf16.gmra.mrb[60].mxu1 %v1792_v9 }
  0xf8   :  { %v583_v11 = vpop.f32.mrb[0].mxu0  ;;  %v711_v13 = vpop.f32.mrb[0].mxu1 }
  0xf9   :  { %v584_v14 = vadd.f32 %v2081_v10, %v583_v11  ;;  %v712_v15 = vadd.f32 %v2081_v10, %v711_v13  ;;  %v585_v16 = vpop.f32.mrb[1].mxu0  ;;  %v713_v17 = vpop.f32.mrb[1].mxu1 }
  0xfa   :  { %v586_v19 = vpop.f32.mrb[2].mxu0  ;;  %v714_v20 = vpop.f32.mrb[2].mxu1 }
  0xfb   :  { %v845_v21 = vmul.f32 %v2086_v12, %v584_v14  ;;  %v877_v22 = vmul.f32 %v2086_v12, %v712_v15  ;;  %v587_v23 = vadd.f32 %v2081_v10, %v586_v19  ;;  %v715_v24 = vadd.f32 %v2081_v10, %v714_v20  ;;  %v588_v25 = vpop.f32.mrb[3].mxu0  ;;  %v716_v26 = vpop.f32.mrb[3].mxu1 }
  0xfd   :  { %v916_v27 = vadd.f32 %v2093_v18, %v845_v21  ;;  %v948_v28 = vadd.f32 %v2093_v18, %v877_v22  ;;  %v846_v29 = vmul.f32 %v2086_v12, %v587_v23  ;;  %v878_v30 = vmul.f32 %v2086_v12, %v715_v24 }
  0xff   :  { %v980_v31 = vmax.f32 %v916_v27, 0.0  ;;  %v1012_v32 = vmax.f32 %v948_v28, 0.0  ;;  %v917_v33 = vadd.f32 %v2093_v18, %v846_v29  ;;  %v949_v34 = vadd.f32 %v2093_v18, %v878_v30 }
 0x100   :  { %v591_v35 = vpop.f32.mrb[4].mxu0  ;;  %v719_v36 = vpop.f32.mrb[4].mxu1 }
 0x101   :  { %v1044_v37 = vmin.f32 %v980_v31, 6.0  ;;  %v1076_v38 = vmin.f32 %v1012_v32, 6.0  ;;  %v981_v39 = vmax.f32 %v917_v33, 0.0  ;;  %v1013_v40 = vmax.f32 %v949_v34, 0.0  ;;  %v593_v41 = vpop.f32.mrb[5].mxu0  ;;  %v721_v42 = vpop.f32.mrb[5].mxu1 }
 0x102   :  { %v592_v43 = vadd.f32 %v2081_v10, %v591_v35  ;;  %v720_v44 = vadd.f32 %v2081_v10, %v719_v36  ;;  %v594_v45 = vpop.f32.mrb[6].mxu0  ;;  %v722_v46 = vpop.f32.mrb[6].mxu1 }
 0x103   :  { %v1605_v47 = vpack.c.bf16 %v1044_v37, %v1044_v37  ;;  %v1637_v48 = vpack.c.bf16 %v1076_v38, %v1076_v38  ;;  %v1045_v49 = vmin.f32 %v981_v39, 6.0  ;;  %v1077_v50 = vmin.f32 %v1013_v40, 6.0  ;;  %v596_v51 = vpop.f32.mrb[7].mxu0  ;;  %v724_v52 = vpop.f32.mrb[7].mxu1 }
 0x104   :  { %v847_v53 = vmul.f32 %v2086_v12, %v592_v43  ;;  %v879_v54 = vmul.f32 %v2086_v12, %v720_v44  ;;  %v595_v55 = vadd.f32 %v2081_v10, %v594_v45  ;;  %v723_v56 = vadd.f32 %v2081_v10, %v722_v46 }
 0x105   :  { %1365 = vst.msk [vmem:[%s2539_s5] sm:$0xf] %vm1364_vm1, %v1605_v47  ;;  %1397 = vst.msk [vmem:[%s2539_s5 + $0x80] sm:$0xf] %vm1364_vm1, %v1637_v48  ;;  %v1606_v57 = vpack.c.bf16 %v1045_v49, %v1045_v49  ;;  %v1638_v58 = vpack.c.bf16 %v1077_v50, %v1077_v50 }
 0x106   :  { %v918_v59 = vadd.f32 %v2093_v18, %v847_v53  ;;  %v950_v60 = vadd.f32 %v2093_v18, %v879_v54  ;;  %v848_v61 = vmul.f32 %v2086_v12, %v595_v55  ;;  %v880_v62 = vmul.f32 %v2086_v12, %v723_v56 }
 0x107   :  { %1366 = vst.msk [vmem:[%s2539_s5 + $0x4] sm:$0xf] %vm1364_vm1, %v1606_v57  ;;  %1398 = vst.msk [vmem:[%s2539_s5 + $0x84] sm:$0xf] %vm1364_vm1, %v1638_v58 }
 0x108   :  { %v982_v63 = vmax.f32 %v918_v59, 0.0  ;;  %v1014_v0 = vmax.f32 %v950_v60, 0.0  ;;  %v919_v1 = vadd.f32 %v2093_v18, %v848_v61  ;;  %v951_v2 = vadd.f32 %v2093_v18, %v880_v62  ;;  %v599_v3 = vpop.f32.mrb[8].mxu0  ;;  %v727_v4 = vpop.f32.mrb[8].mxu1 }
 0x109   :  { %v600_v5 = vadd.f32 %v2081_v10, %v599_v3  ;;  %v728_v6 = vadd.f32 %v2081_v10, %v727_v4  ;;  %v601_v7 = vpop.f32.mrb[9].mxu0  ;;  %v729_v8 = vpop.f32.mrb[9].mxu1 }
 0x10a   :  { %v1046_v9 = vmin.f32 %v982_v63, 6.0  ;;  %v1078_v11 = vmin.f32 %v1014_v0, 6.0  ;;  %v983_v13 = vmax.f32 %v919_v1, 0.0  ;;  %v1015_v14 = vmax.f32 %v951_v2, 0.0  ;;  %v602_v15 = vpop.f32.mrb[10].mxu0  ;;  %v730_v16 = vpop.f32.mrb[10].mxu1 }
 0x10b   :  { %v849_v17 = vmul.f32 %v2086_v12, %v600_v5  ;;  %v881_v19 = vmul.f32 %v2086_v12, %v728_v6  ;;  %v603_v20 = vadd.f32 %v2081_v10, %v602_v15  ;;  %v731_v21 = vadd.f32 %v2081_v10, %v730_v16  ;;  %v604_v22 = vpop.f32.mrb[11].mxu0  ;;  %v732_v23 = vpop.f32.mrb[11].mxu1 }
 0x10c   :  { %v1607_v24 = vpack.c.bf16 %v1046_v9, %v1046_v9  ;;  %v1639_v25 = vpack.c.bf16 %v1078_v11, %v1078_v11  ;;  %v1047_v26 = vmin.f32 %v983_v13, 6.0  ;;  %v1079_v27 = vmin.f32 %v1015_v14, 6.0 }
 0x10d   :  { %v920_v28 = vadd.f32 %v2093_v18, %v849_v17  ;;  %v952_v29 = vadd.f32 %v2093_v18, %v881_v19  ;;  %v850_v30 = vmul.f32 %v2086_v12, %v603_v20  ;;  %v882_v31 = vmul.f32 %v2086_v12, %v731_v21 }
 0x10e   :  { %1367 = vst.msk [vmem:[%s2539_s5 + $0x8] sm:$0xf] %vm1364_vm1, %v1607_v24  ;;  %1399 = vst.msk [vmem:[%s2539_s5 + $0x88] sm:$0xf] %vm1364_vm1, %v1639_v25  ;;  %v1608_v32 = vpack.c.bf16 %v1047_v26, %v1047_v26  ;;  %v1640_v33 = vpack.c.bf16 %v1079_v27, %v1079_v27 }
 0x10f   :  { %v984_v34 = vmax.f32 %v920_v28, 0.0  ;;  %v1016_v35 = vmax.f32 %v952_v29, 0.0  ;;  %v921_v36 = vadd.f32 %v2093_v18, %v850_v30  ;;  %v953_v37 = vadd.f32 %v2093_v18, %v882_v31 }
 0x110   :  { %1368 = vst.msk [vmem:[%s2539_s5 + $0xc] sm:$0xf] %vm1364_vm1, %v1608_v32  ;;  %1400 = vst.msk [vmem:[%s2539_s5 + $0x8c] sm:$0xf] %vm1364_vm1, %v1640_v33  ;;  %v607_v38 = vpop.f32.mrb[12].mxu0  ;;  %v735_v39 = vpop.f32.mrb[12].mxu1 }
 0x111   :  { %v1048_v40 = vmin.f32 %v984_v34, 6.0  ;;  %v1080_v41 = vmin.f32 %v1016_v35, 6.0  ;;  %v985_v42 = vmax.f32 %v921_v36, 0.0  ;;  %v1017_v43 = vmax.f32 %v953_v37, 0.0  ;;  %v609_v44 = vpop.f32.mrb[13].mxu0  ;;  %v737_v45 = vpop.f32.mrb[13].mxu1 }
 0x112   :  { %v608_v46 = vadd.f32 %v2081_v10, %v607_v38  ;;  %v736_v47 = vadd.f32 %v2081_v10, %v735_v39  ;;  %v610_v48 = vpop.f32.mrb[14].mxu0  ;;  %v738_v49 = vpop.f32.mrb[14].mxu1 }
 0x113   :  { %v1609_v50 = vpack.c.bf16 %v1048_v40, %v1048_v40  ;;  %v1641_v51 = vpack.c.bf16 %v1080_v41, %v1080_v41  ;;  %v1049_v52 = vmin.f32 %v985_v42, 6.0  ;;  %v1081_v53 = vmin.f32 %v1017_v43, 6.0  ;;  %v612_v54 = vpop.f32.mrb[15].mxu0  ;;  %v740_v55 = vpop.f32.mrb[15].mxu1 }
 0x114   :  { %v851_v56 = vmul.f32 %v2086_v12, %v608_v46  ;;  %v883_v57 = vmul.f32 %v2086_v12, %v736_v47  ;;  %v611_v58 = vadd.f32 %v2081_v10, %v610_v48  ;;  %v739_v59 = vadd.f32 %v2081_v10, %v738_v49 }
 0x115   :  { %1369 = vst.msk [vmem:[%s2539_s5 + $0x10] sm:$0xf] %vm1364_vm1, %v1609_v50  ;;  %1401 = vst.msk [vmem:[%s2539_s5 + $0x90] sm:$0xf] %vm1364_vm1, %v1641_v51  ;;  %v1610_v60 = vpack.c.bf16 %v1049_v52, %v1049_v52  ;;  %v1642_v61 = vpack.c.bf16 %v1081_v53, %v1081_v53 }
 0x116   :  { %v922_v62 = vadd.f32 %v2093_v18, %v851_v56  ;;  %v954_v63 = vadd.f32 %v2093_v18, %v883_v57  ;;  %v852_v0 = vmul.f32 %v2086_v12, %v611_v58  ;;  %v884_v1 = vmul.f32 %v2086_v12, %v739_v59 }
 0x117   :  { %1370 = vst.msk [vmem:[%s2539_s5 + $0x14] sm:$0xf] %vm1364_vm1, %v1610_v60  ;;  %1402 = vst.msk [vmem:[%s2539_s5 + $0x94] sm:$0xf] %vm1364_vm1, %v1642_v61 }
 0x118   :  { %v986_v2 = vmax.f32 %v922_v62, 0.0  ;;  %v1018_v3 = vmax.f32 %v954_v63, 0.0  ;;  %v923_v4 = vadd.f32 %v2093_v18, %v852_v0  ;;  %v955_v5 = vadd.f32 %v2093_v18, %v884_v1  ;;  %v615_v6 = vpop.f32.mrb[16].mxu0  ;;  %v743_v7 = vpop.f32.mrb[16].mxu1 }
 0x119   :  { %v616_v8 = vadd.f32 %v2081_v10, %v615_v6  ;;  %v744_v9 = vadd.f32 %v2081_v10, %v743_v7  ;;  %v617_v11 = vpop.f32.mrb[17].mxu0  ;;  %v745_v13 = vpop.f32.mrb[17].mxu1 }
 0x11a   :  { %v1050_v14 = vmin.f32 %v986_v2, 6.0  ;;  %v1082_v15 = vmin.f32 %v1018_v3, 6.0  ;;  %v987_v16 = vmax.f32 %v923_v4, 0.0  ;;  %v1019_v17 = vmax.f32 %v955_v5, 0.0  ;;  %v618_v19 = vpop.f32.mrb[18].mxu0  ;;  %v746_v20 = vpop.f32.mrb[18].mxu1 }
 0x11b   :  { %v853_v21 = vmul.f32 %v2086_v12, %v616_v8  ;;  %v885_v22 = vmul.f32 %v2086_v12, %v744_v9  ;;  %v619_v23 = vadd.f32 %v2081_v10, %v618_v19  ;;  %v747_v24 = vadd.f32 %v2081_v10, %v746_v20  ;;  %v620_v25 = vpop.f32.mrb[19].mxu0  ;;  %v748_v26 = vpop.f32.mrb[19].mxu1 }
 0x11c   :  { %v1611_v27 = vpack.c.bf16 %v1050_v14, %v1050_v14  ;;  %v1643_v28 = vpack.c.bf16 %v1082_v15, %v1082_v15  ;;  %v1051_v29 = vmin.f32 %v987_v16, 6.0  ;;  %v1083_v30 = vmin.f32 %v1019_v17, 6.0 }
 0x11d   :  { %v924_v31 = vadd.f32 %v2093_v18, %v853_v21  ;;  %v956_v32 = vadd.f32 %v2093_v18, %v885_v22  ;;  %v854_v33 = vmul.f32 %v2086_v12, %v619_v23  ;;  %v886_v34 = vmul.f32 %v2086_v12, %v747_v24 }
 0x11e   :  { %1371 = vst.msk [vmem:[%s2539_s5 + $0x18] sm:$0xf] %vm1364_vm1, %v1611_v27  ;;  %1403 = vst.msk [vmem:[%s2539_s5 + $0x98] sm:$0xf] %vm1364_vm1, %v1643_v28  ;;  %v1612_v35 = vpack.c.bf16 %v1051_v29, %v1051_v29  ;;  %v1644_v36 = vpack.c.bf16 %v1083_v30, %v1083_v30 }
 0x11f   :  { %v988_v37 = vmax.f32 %v924_v31, 0.0  ;;  %v1020_v38 = vmax.f32 %v956_v32, 0.0  ;;  %v925_v39 = vadd.f32 %v2093_v18, %v854_v33  ;;  %v957_v40 = vadd.f32 %v2093_v18, %v886_v34 }
 0x120   :  { %1372 = vst.msk [vmem:[%s2539_s5 + $0x1c] sm:$0xf] %vm1364_vm1, %v1612_v35  ;;  %1404 = vst.msk [vmem:[%s2539_s5 + $0x9c] sm:$0xf] %vm1364_vm1, %v1644_v36  ;;  %v623_v41 = vpop.f32.mrb[20].mxu0  ;;  %v751_v42 = vpop.f32.mrb[20].mxu1 }
 0x121   :  { %v1052_v43 = vmin.f32 %v988_v37, 6.0  ;;  %v1084_v44 = vmin.f32 %v1020_v38, 6.0  ;;  %v989_v45 = vmax.f32 %v925_v39, 0.0  ;;  %v1021_v46 = vmax.f32 %v957_v40, 0.0  ;;  %v625_v47 = vpop.f32.mrb[21].mxu0  ;;  %v753_v48 = vpop.f32.mrb[21].mxu1 }
 0x122   :  { %v624_v49 = vadd.f32 %v2081_v10, %v623_v41  ;;  %v752_v50 = vadd.f32 %v2081_v10, %v751_v42  ;;  %v626_v51 = vpop.f32.mrb[22].mxu0  ;;  %v754_v52 = vpop.f32.mrb[22].mxu1 }
 0x123   :  { %v1613_v53 = vpack.c.bf16 %v1052_v43, %v1052_v43  ;;  %v1645_v54 = vpack.c.bf16 %v1084_v44, %v1084_v44  ;;  %v1053_v55 = vmin.f32 %v989_v45, 6.0  ;;  %v1085_v56 = vmin.f32 %v1021_v46, 6.0  ;;  %v628_v57 = vpop.f32.mrb[23].mxu0  ;;  %v756_v58 = vpop.f32.mrb[23].mxu1 }
 0x124   :  { %v855_v59 = vmul.f32 %v2086_v12, %v624_v49  ;;  %v887_v60 = vmul.f32 %v2086_v12, %v752_v50  ;;  %v627_v61 = vadd.f32 %v2081_v10, %v626_v51  ;;  %v755_v62 = vadd.f32 %v2081_v10, %v754_v52 }
 0x125   :  { %1373 = vst.msk [vmem:[%s2539_s5 + $0x20] sm:$0xf] %vm1364_vm1, %v1613_v53  ;;  %1405 = vst.msk [vmem:[%s2539_s5 + $0xa0] sm:$0xf] %vm1364_vm1, %v1645_v54  ;;  %v1614_v63 = vpack.c.bf16 %v1053_v55, %v1053_v55  ;;  %v1646_v0 = vpack.c.bf16 %v1085_v56, %v1085_v56 }
 0x126   :  { %v926_v1 = vadd.f32 %v2093_v18, %v855_v59  ;;  %v958_v2 = vadd.f32 %v2093_v18, %v887_v60  ;;  %v856_v3 = vmul.f32 %v2086_v12, %v627_v61  ;;  %v888_v4 = vmul.f32 %v2086_v12, %v755_v62 }
 0x127   :  { %1374 = vst.msk [vmem:[%s2539_s5 + $0x24] sm:$0xf] %vm1364_vm1, %v1614_v63  ;;  %1406 = vst.msk [vmem:[%s2539_s5 + $0xa4] sm:$0xf] %vm1364_vm1, %v1646_v0 }
 0x128   :  { %v990_v5 = vmax.f32 %v926_v1, 0.0  ;;  %v1022_v6 = vmax.f32 %v958_v2, 0.0  ;;  %v927_v7 = vadd.f32 %v2093_v18, %v856_v3  ;;  %v959_v8 = vadd.f32 %v2093_v18, %v888_v4  ;;  %v631_v9 = vpop.f32.mrb[24].mxu0  ;;  %v759_v11 = vpop.f32.mrb[24].mxu1 }
 0x129   :  { %v632_v13 = vadd.f32 %v2081_v10, %v631_v9  ;;  %v760_v14 = vadd.f32 %v2081_v10, %v759_v11  ;;  %v633_v15 = vpop.f32.mrb[25].mxu0  ;;  %v761_v16 = vpop.f32.mrb[25].mxu1 }
 0x12a   :  { %v1054_v17 = vmin.f32 %v990_v5, 6.0  ;;  %v1086_v19 = vmin.f32 %v1022_v6, 6.0  ;;  %v991_v20 = vmax.f32 %v927_v7, 0.0  ;;  %v1023_v21 = vmax.f32 %v959_v8, 0.0  ;;  %v634_v22 = vpop.f32.mrb[26].mxu0  ;;  %v762_v23 = vpop.f32.mrb[26].mxu1 }
 0x12b   :  { %v857_v24 = vmul.f32 %v2086_v12, %v632_v13  ;;  %v889_v25 = vmul.f32 %v2086_v12, %v760_v14  ;;  %v635_v26 = vadd.f32 %v2081_v10, %v634_v22  ;;  %v763_v27 = vadd.f32 %v2081_v10, %v762_v23  ;;  %v636_v28 = vpop.f32.mrb[27].mxu0  ;;  %v764_v29 = vpop.f32.mrb[27].mxu1 }
 0x12c   :  { %v1615_v30 = vpack.c.bf16 %v1054_v17, %v1054_v17  ;;  %v1647_v31 = vpack.c.bf16 %v1086_v19, %v1086_v19  ;;  %v1055_v32 = vmin.f32 %v991_v20, 6.0  ;;  %v1087_v33 = vmin.f32 %v1023_v21, 6.0 }
 0x12d   :  { %v928_v34 = vadd.f32 %v2093_v18, %v857_v24  ;;  %v960_v35 = vadd.f32 %v2093_v18, %v889_v25  ;;  %v858_v36 = vmul.f32 %v2086_v12, %v635_v26  ;;  %v890_v37 = vmul.f32 %v2086_v12, %v763_v27 }
 0x12e   :  { %1375 = vst.msk [vmem:[%s2539_s5 + $0x28] sm:$0xf] %vm1364_vm1, %v1615_v30  ;;  %1407 = vst.msk [vmem:[%s2539_s5 + $0xa8] sm:$0xf] %vm1364_vm1, %v1647_v31  ;;  %v1616_v38 = vpack.c.bf16 %v1055_v32, %v1055_v32  ;;  %v1648_v39 = vpack.c.bf16 %v1087_v33, %v1087_v33 }
 0x12f   :  { %v992_v40 = vmax.f32 %v928_v34, 0.0  ;;  %v1024_v41 = vmax.f32 %v960_v35, 0.0  ;;  %v929_v42 = vadd.f32 %v2093_v18, %v858_v36  ;;  %v961_v43 = vadd.f32 %v2093_v18, %v890_v37 }
 0x130   :  { %1376 = vst.msk [vmem:[%s2539_s5 + $0x2c] sm:$0xf] %vm1364_vm1, %v1616_v38  ;;  %1408 = vst.msk [vmem:[%s2539_s5 + $0xac] sm:$0xf] %vm1364_vm1, %v1648_v39  ;;  %v639_v44 = vpop.f32.mrb[28].mxu0  ;;  %v767_v45 = vpop.f32.mrb[28].mxu1 }
 0x131   :  { %v1056_v46 = vmin.f32 %v992_v40, 6.0  ;;  %v1088_v47 = vmin.f32 %v1024_v41, 6.0  ;;  %v993_v48 = vmax.f32 %v929_v42, 0.0  ;;  %v1025_v49 = vmax.f32 %v961_v43, 0.0  ;;  %v641_v50 = vpop.f32.mrb[29].mxu0  ;;  %v769_v51 = vpop.f32.mrb[29].mxu1 }
 0x132   :  { %v640_v52 = vadd.f32 %v2081_v10, %v639_v44  ;;  %v768_v53 = vadd.f32 %v2081_v10, %v767_v45  ;;  %v642_v54 = vpop.f32.mrb[30].mxu0  ;;  %v770_v55 = vpop.f32.mrb[30].mxu1 }
 0x133   :  { %v1617_v56 = vpack.c.bf16 %v1056_v46, %v1056_v46  ;;  %v1649_v57 = vpack.c.bf16 %v1088_v47, %v1088_v47  ;;  %v1057_v58 = vmin.f32 %v993_v48, 6.0  ;;  %v1089_v59 = vmin.f32 %v1025_v49, 6.0  ;;  %v644_v60 = vpop.f32.mrb[31].mxu0  ;;  %v772_v61 = vpop.f32.mrb[31].mxu1 }
 0x134   :  { %v859_v62 = vmul.f32 %v2086_v12, %v640_v52  ;;  %v891_v63 = vmul.f32 %v2086_v12, %v768_v53  ;;  %v643_v0 = vadd.f32 %v2081_v10, %v642_v54  ;;  %v771_v1 = vadd.f32 %v2081_v10, %v770_v55 }
 0x135   :  { %1377 = vst.msk [vmem:[%s2539_s5 + $0x30] sm:$0xf] %vm1364_vm1, %v1617_v56  ;;  %1409 = vst.msk [vmem:[%s2539_s5 + $0xb0] sm:$0xf] %vm1364_vm1, %v1649_v57  ;;  %v1618_v2 = vpack.c.bf16 %v1057_v58, %v1057_v58  ;;  %v1650_v3 = vpack.c.bf16 %v1089_v59, %v1089_v59 }
 0x136   :  { %v930_v4 = vadd.f32 %v2093_v18, %v859_v62  ;;  %v962_v5 = vadd.f32 %v2093_v18, %v891_v63  ;;  %v860_v6 = vmul.f32 %v2086_v12, %v643_v0  ;;  %v892_v7 = vmul.f32 %v2086_v12, %v771_v1 }
 0x137   :  { %1378 = vst.msk [vmem:[%s2539_s5 + $0x34] sm:$0xf] %vm1364_vm1, %v1618_v2  ;;  %1410 = vst.msk [vmem:[%s2539_s5 + $0xb4] sm:$0xf] %vm1364_vm1, %v1650_v3 }
 0x138   :  { %v994_v8 = vmax.f32 %v930_v4, 0.0  ;;  %v1026_v9 = vmax.f32 %v962_v5, 0.0  ;;  %v931_v11 = vadd.f32 %v2093_v18, %v860_v6  ;;  %v963_v13 = vadd.f32 %v2093_v18, %v892_v7  ;;  %v647_v14 = vpop.f32.mrb[32].mxu0  ;;  %v775_v15 = vpop.f32.mrb[32].mxu1 }
 0x139   :  { %v648_v16 = vadd.f32 %v2081_v10, %v647_v14  ;;  %v776_v17 = vadd.f32 %v2081_v10, %v775_v15  ;;  %v649_v19 = vpop.f32.mrb[33].mxu0  ;;  %v777_v20 = vpop.f32.mrb[33].mxu1 }
 0x13a   :  { %v1058_v21 = vmin.f32 %v994_v8, 6.0  ;;  %v1090_v22 = vmin.f32 %v1026_v9, 6.0  ;;  %v995_v23 = vmax.f32 %v931_v11, 0.0  ;;  %v1027_v24 = vmax.f32 %v963_v13, 0.0  ;;  %v650_v25 = vpop.f32.mrb[34].mxu0  ;;  %v778_v26 = vpop.f32.mrb[34].mxu1 }
 0x13b   :  { %v861_v27 = vmul.f32 %v2086_v12, %v648_v16  ;;  %v893_v28 = vmul.f32 %v2086_v12, %v776_v17  ;;  %v651_v29 = vadd.f32 %v2081_v10, %v650_v25  ;;  %v779_v30 = vadd.f32 %v2081_v10, %v778_v26  ;;  %v652_v31 = vpop.f32.mrb[35].mxu0  ;;  %v780_v32 = vpop.f32.mrb[35].mxu1 }
 0x13c   :  { %v1619_v33 = vpack.c.bf16 %v1058_v21, %v1058_v21  ;;  %v1651_v34 = vpack.c.bf16 %v1090_v22, %v1090_v22  ;;  %v1059_v35 = vmin.f32 %v995_v23, 6.0  ;;  %v1091_v36 = vmin.f32 %v1027_v24, 6.0 }
 0x13d   :  { %v932_v37 = vadd.f32 %v2093_v18, %v861_v27  ;;  %v964_v38 = vadd.f32 %v2093_v18, %v893_v28  ;;  %v862_v39 = vmul.f32 %v2086_v12, %v651_v29  ;;  %v894_v40 = vmul.f32 %v2086_v12, %v779_v30 }
 0x13e   :  { %1379 = vst.msk [vmem:[%s2539_s5 + $0x38] sm:$0xf] %vm1364_vm1, %v1619_v33  ;;  %1411 = vst.msk [vmem:[%s2539_s5 + $0xb8] sm:$0xf] %vm1364_vm1, %v1651_v34  ;;  %v1620_v41 = vpack.c.bf16 %v1059_v35, %v1059_v35  ;;  %v1652_v42 = vpack.c.bf16 %v1091_v36, %v1091_v36 }
 0x13f   :  { %v996_v43 = vmax.f32 %v932_v37, 0.0  ;;  %v1028_v44 = vmax.f32 %v964_v38, 0.0  ;;  %v933_v45 = vadd.f32 %v2093_v18, %v862_v39  ;;  %v965_v46 = vadd.f32 %v2093_v18, %v894_v40 }
 0x140   :  { %1380 = vst.msk [vmem:[%s2539_s5 + $0x3c] sm:$0xf] %vm1364_vm1, %v1620_v41  ;;  %1412 = vst.msk [vmem:[%s2539_s5 + $0xbc] sm:$0xf] %vm1364_vm1, %v1652_v42  ;;  %v655_v47 = vpop.f32.mrb[36].mxu0  ;;  %v783_v48 = vpop.f32.mrb[36].mxu1 }
 0x141   :  { %v1060_v49 = vmin.f32 %v996_v43, 6.0  ;;  %v1092_v50 = vmin.f32 %v1028_v44, 6.0  ;;  %v997_v51 = vmax.f32 %v933_v45, 0.0  ;;  %v1029_v52 = vmax.f32 %v965_v46, 0.0  ;;  %v657_v53 = vpop.f32.mrb[37].mxu0  ;;  %v785_v54 = vpop.f32.mrb[37].mxu1 }
 0x142   :  { %v656_v55 = vadd.f32 %v2081_v10, %v655_v47  ;;  %v784_v56 = vadd.f32 %v2081_v10, %v783_v48  ;;  %v658_v57 = vpop.f32.mrb[38].mxu0  ;;  %v786_v58 = vpop.f32.mrb[38].mxu1 }
 0x143   :  { %v1621_v59 = vpack.c.bf16 %v1060_v49, %v1060_v49  ;;  %v1653_v60 = vpack.c.bf16 %v1092_v50, %v1092_v50  ;;  %v1061_v61 = vmin.f32 %v997_v51, 6.0  ;;  %v1093_v62 = vmin.f32 %v1029_v52, 6.0  ;;  %v660_v63 = vpop.f32.mrb[39].mxu0  ;;  %v788_v0 = vpop.f32.mrb[39].mxu1 }
 0x144   :  { %v863_v1 = vmul.f32 %v2086_v12, %v656_v55  ;;  %v895_v2 = vmul.f32 %v2086_v12, %v784_v56  ;;  %v659_v3 = vadd.f32 %v2081_v10, %v658_v57  ;;  %v787_v4 = vadd.f32 %v2081_v10, %v786_v58 }
 0x145   :  { %1381 = vst.msk [vmem:[%s2539_s5 + $0x40] sm:$0xf] %vm1364_vm1, %v1621_v59  ;;  %1413 = vst.msk [vmem:[%s2539_s5 + $0xc0] sm:$0xf] %vm1364_vm1, %v1653_v60  ;;  %v1622_v5 = vpack.c.bf16 %v1061_v61, %v1061_v61  ;;  %v1654_v6 = vpack.c.bf16 %v1093_v62, %v1093_v62 }
 0x146   :  { %v934_v7 = vadd.f32 %v2093_v18, %v863_v1  ;;  %v966_v8 = vadd.f32 %v2093_v18, %v895_v2  ;;  %v864_v9 = vmul.f32 %v2086_v12, %v659_v3  ;;  %v896_v11 = vmul.f32 %v2086_v12, %v787_v4 }
 0x147   :  { %1382 = vst.msk [vmem:[%s2539_s5 + $0x44] sm:$0xf] %vm1364_vm1, %v1622_v5  ;;  %1414 = vst.msk [vmem:[%s2539_s5 + $0xc4] sm:$0xf] %vm1364_vm1, %v1654_v6 }
 0x148   :  { %v998_v13 = vmax.f32 %v934_v7, 0.0  ;;  %v1030_v14 = vmax.f32 %v966_v8, 0.0  ;;  %v935_v15 = vadd.f32 %v2093_v18, %v864_v9  ;;  %v967_v16 = vadd.f32 %v2093_v18, %v896_v11  ;;  %v663_v17 = vpop.f32.mrb[40].mxu0  ;;  %v791_v19 = vpop.f32.mrb[40].mxu1 }
 0x149   :  { %v664_v20 = vadd.f32 %v2081_v10, %v663_v17  ;;  %v792_v21 = vadd.f32 %v2081_v10, %v791_v19  ;;  %v665_v22 = vpop.f32.mrb[41].mxu0  ;;  %v793_v23 = vpop.f32.mrb[41].mxu1 }
 0x14a   :  { %v1062_v24 = vmin.f32 %v998_v13, 6.0  ;;  %v1094_v25 = vmin.f32 %v1030_v14, 6.0  ;;  %v999_v26 = vmax.f32 %v935_v15, 0.0  ;;  %v1031_v27 = vmax.f32 %v967_v16, 0.0  ;;  %v666_v28 = vpop.f32.mrb[42].mxu0  ;;  %v794_v29 = vpop.f32.mrb[42].mxu1 }
 0x14b   :  { %v865_v30 = vmul.f32 %v2086_v12, %v664_v20  ;;  %v897_v31 = vmul.f32 %v2086_v12, %v792_v21  ;;  %v667_v32 = vadd.f32 %v2081_v10, %v666_v28  ;;  %v795_v33 = vadd.f32 %v2081_v10, %v794_v29  ;;  %v668_v34 = vpop.f32.mrb[43].mxu0  ;;  %v796_v35 = vpop.f32.mrb[43].mxu1 }
 0x14c   :  { %v1623_v36 = vpack.c.bf16 %v1062_v24, %v1062_v24  ;;  %v1655_v37 = vpack.c.bf16 %v1094_v25, %v1094_v25  ;;  %v1063_v38 = vmin.f32 %v999_v26, 6.0  ;;  %v1095_v39 = vmin.f32 %v1031_v27, 6.0 }
 0x14d   :  { %v936_v40 = vadd.f32 %v2093_v18, %v865_v30  ;;  %v968_v41 = vadd.f32 %v2093_v18, %v897_v31  ;;  %v866_v42 = vmul.f32 %v2086_v12, %v667_v32  ;;  %v898_v43 = vmul.f32 %v2086_v12, %v795_v33 }
 0x14e   :  { %1383 = vst.msk [vmem:[%s2539_s5 + $0x48] sm:$0xf] %vm1364_vm1, %v1623_v36  ;;  %1415 = vst.msk [vmem:[%s2539_s5 + $0xc8] sm:$0xf] %vm1364_vm1, %v1655_v37  ;;  %v1624_v44 = vpack.c.bf16 %v1063_v38, %v1063_v38  ;;  %v1656_v45 = vpack.c.bf16 %v1095_v39, %v1095_v39 }
 0x14f   :  { %v1000_v46 = vmax.f32 %v936_v40, 0.0  ;;  %v1032_v47 = vmax.f32 %v968_v41, 0.0  ;;  %v937_v48 = vadd.f32 %v2093_v18, %v866_v42  ;;  %v969_v49 = vadd.f32 %v2093_v18, %v898_v43 }
 0x150   :  { %1384 = vst.msk [vmem:[%s2539_s5 + $0x4c] sm:$0xf] %vm1364_vm1, %v1624_v44  ;;  %1416 = vst.msk [vmem:[%s2539_s5 + $0xcc] sm:$0xf] %vm1364_vm1, %v1656_v45  ;;  %v671_v50 = vpop.f32.mrb[44].mxu0  ;;  %v799_v51 = vpop.f32.mrb[44].mxu1 }
 0x151   :  { %v1064_v52 = vmin.f32 %v1000_v46, 6.0  ;;  %v1096_v53 = vmin.f32 %v1032_v47, 6.0  ;;  %v1001_v54 = vmax.f32 %v937_v48, 0.0  ;;  %v1033_v55 = vmax.f32 %v969_v49, 0.0  ;;  %v673_v56 = vpop.f32.mrb[45].mxu0  ;;  %v801_v57 = vpop.f32.mrb[45].mxu1 }
 0x152   :  { %v672_v58 = vadd.f32 %v2081_v10, %v671_v50  ;;  %v800_v59 = vadd.f32 %v2081_v10, %v799_v51  ;;  %v674_v60 = vpop.f32.mrb[46].mxu0  ;;  %v802_v61 = vpop.f32.mrb[46].mxu1 }
 0x153   :  { %v1625_v62 = vpack.c.bf16 %v1064_v52, %v1064_v52  ;;  %v1657_v63 = vpack.c.bf16 %v1096_v53, %v1096_v53  ;;  %v1065_v0 = vmin.f32 %v1001_v54, 6.0  ;;  %v1097_v1 = vmin.f32 %v1033_v55, 6.0  ;;  %v676_v2 = vpop.f32.mrb[47].mxu0  ;;  %v804_v3 = vpop.f32.mrb[47].mxu1 }
 0x154   :  { %v867_v4 = vmul.f32 %v2086_v12, %v672_v58  ;;  %v899_v5 = vmul.f32 %v2086_v12, %v800_v59  ;;  %v675_v6 = vadd.f32 %v2081_v10, %v674_v60  ;;  %v803_v7 = vadd.f32 %v2081_v10, %v802_v61 }
 0x155   :  { %1385 = vst.msk [vmem:[%s2539_s5 + $0x50] sm:$0xf] %vm1364_vm1, %v1625_v62  ;;  %1417 = vst.msk [vmem:[%s2539_s5 + $0xd0] sm:$0xf] %vm1364_vm1, %v1657_v63  ;;  %v1626_v8 = vpack.c.bf16 %v1065_v0, %v1065_v0  ;;  %v1658_v9 = vpack.c.bf16 %v1097_v1, %v1097_v1 }
 0x156   :  { %v938_v11 = vadd.f32 %v2093_v18, %v867_v4  ;;  %v970_v13 = vadd.f32 %v2093_v18, %v899_v5  ;;  %v868_v14 = vmul.f32 %v2086_v12, %v675_v6  ;;  %v900_v15 = vmul.f32 %v2086_v12, %v803_v7 }
 0x157   :  { %1386 = vst.msk [vmem:[%s2539_s5 + $0x54] sm:$0xf] %vm1364_vm1, %v1626_v8  ;;  %1418 = vst.msk [vmem:[%s2539_s5 + $0xd4] sm:$0xf] %vm1364_vm1, %v1658_v9 }
 0x158   :  { %v1002_v16 = vmax.f32 %v938_v11, 0.0  ;;  %v1034_v17 = vmax.f32 %v970_v13, 0.0  ;;  %v939_v19 = vadd.f32 %v2093_v18, %v868_v14  ;;  %v971_v20 = vadd.f32 %v2093_v18, %v900_v15  ;;  %v679_v21 = vpop.f32.mrb[48].mxu0  ;;  %v807_v22 = vpop.f32.mrb[48].mxu1 }
 0x159   :  { %v680_v23 = vadd.f32 %v2081_v10, %v679_v21  ;;  %v808_v24 = vadd.f32 %v2081_v10, %v807_v22  ;;  %v681_v25 = vpop.f32.mrb[49].mxu0  ;;  %v809_v26 = vpop.f32.mrb[49].mxu1 }
 0x15a   :  { %v1066_v27 = vmin.f32 %v1002_v16, 6.0  ;;  %v1098_v28 = vmin.f32 %v1034_v17, 6.0  ;;  %v1003_v29 = vmax.f32 %v939_v19, 0.0  ;;  %v1035_v30 = vmax.f32 %v971_v20, 0.0  ;;  %v682_v31 = vpop.f32.mrb[50].mxu0  ;;  %v810_v32 = vpop.f32.mrb[50].mxu1 }
 0x15b   :  { %v869_v33 = vmul.f32 %v2086_v12, %v680_v23  ;;  %v901_v34 = vmul.f32 %v2086_v12, %v808_v24  ;;  %v683_v35 = vadd.f32 %v2081_v10, %v682_v31  ;;  %v811_v36 = vadd.f32 %v2081_v10, %v810_v32  ;;  %v684_v37 = vpop.f32.mrb[51].mxu0  ;;  %v812_v38 = vpop.f32.mrb[51].mxu1 }
 0x15c   :  { %v1627_v39 = vpack.c.bf16 %v1066_v27, %v1066_v27  ;;  %v1659_v40 = vpack.c.bf16 %v1098_v28, %v1098_v28  ;;  %v1067_v41 = vmin.f32 %v1003_v29, 6.0  ;;  %v1099_v42 = vmin.f32 %v1035_v30, 6.0 }
 0x15d   :  { %v940_v43 = vadd.f32 %v2093_v18, %v869_v33  ;;  %v972_v44 = vadd.f32 %v2093_v18, %v901_v34  ;;  %v870_v45 = vmul.f32 %v2086_v12, %v683_v35  ;;  %v902_v46 = vmul.f32 %v2086_v12, %v811_v36 }
 0x15e   :  { %1387 = vst.msk [vmem:[%s2539_s5 + $0x58] sm:$0xf] %vm1364_vm1, %v1627_v39  ;;  %1419 = vst.msk [vmem:[%s2539_s5 + $0xd8] sm:$0xf] %vm1364_vm1, %v1659_v40  ;;  %v1628_v47 = vpack.c.bf16 %v1067_v41, %v1067_v41  ;;  %v1660_v48 = vpack.c.bf16 %v1099_v42, %v1099_v42 }
 0x15f   :  { %v1004_v49 = vmax.f32 %v940_v43, 0.0  ;;  %v1036_v50 = vmax.f32 %v972_v44, 0.0  ;;  %v941_v51 = vadd.f32 %v2093_v18, %v870_v45  ;;  %v973_v52 = vadd.f32 %v2093_v18, %v902_v46 }
 0x160   :  { %1388 = vst.msk [vmem:[%s2539_s5 + $0x5c] sm:$0xf] %vm1364_vm1, %v1628_v47  ;;  %1420 = vst.msk [vmem:[%s2539_s5 + $0xdc] sm:$0xf] %vm1364_vm1, %v1660_v48  ;;  %v687_v53 = vpop.f32.mrb[52].mxu0  ;;  %v815_v54 = vpop.f32.mrb[52].mxu1 }
 0x161   :  { %v1068_v55 = vmin.f32 %v1004_v49, 6.0  ;;  %v1100_v56 = vmin.f32 %v1036_v50, 6.0  ;;  %v1005_v57 = vmax.f32 %v941_v51, 0.0  ;;  %v1037_v58 = vmax.f32 %v973_v52, 0.0  ;;  %v689_v59 = vpop.f32.mrb[53].mxu0  ;;  %v817_v60 = vpop.f32.mrb[53].mxu1 }
 0x162   :  { %v688_v61 = vadd.f32 %v2081_v10, %v687_v53  ;;  %v816_v62 = vadd.f32 %v2081_v10, %v815_v54  ;;  %v690_v63 = vpop.f32.mrb[54].mxu0  ;;  %v818_v0 = vpop.f32.mrb[54].mxu1  ;;  %v1793_v48 = vld [vmem:[%s2537_s3] ss:$0 sm:$0xff] }
 0x163   :  { %v1629_v1 = vpack.c.bf16 %v1068_v55, %v1068_v55  ;;  %v1661_v2 = vpack.c.bf16 %v1100_v56, %v1100_v56  ;;  %v1069_v3 = vmin.f32 %v1005_v57, 6.0  ;;  %v1101_v4 = vmin.f32 %v1037_v58, 6.0  ;;  %v692_v5 = vpop.f32.mrb[55].mxu0  ;;  %v820_v6 = vpop.f32.mrb[55].mxu1  ;;  %v1794_v52 = vld [vmem:[%s2538_s4] ss:$0 sm:$0xff] }
 0x164   :  { %v871_v7 = vmul.f32 %v2086_v12, %v688_v61  ;;  %v903_v8 = vmul.f32 %v2086_v12, %v816_v62  ;;  %v691_v9 = vadd.f32 %v2081_v10, %v690_v63  ;;  %v819_v11 = vadd.f32 %v2081_v10, %v818_v0  ;;  %v1795_v63 = vld [vmem:[%s2536_s2] ss:$0 sm:$0xff] }
 0x165   :  { %1389 = vst.msk [vmem:[%s2539_s5 + $0x60] sm:$0xf] %vm1364_vm1, %v1629_v1  ;;  %1421 = vst.msk [vmem:[%s2539_s5 + $0xe0] sm:$0xf] %vm1364_vm1, %v1661_v2  ;;  %v1630_v13 = vpack.c.bf16 %v1069_v3, %v1069_v3  ;;  %v1662_v14 = vpack.c.bf16 %v1101_v4, %v1101_v4 }
 0x166   :  { %v942_v15 = vadd.f32 %v2093_v18, %v871_v7  ;;  %v974_v16 = vadd.f32 %v2093_v18, %v903_v8  ;;  %v872_v17 = vmul.f32 %v2086_v12, %v691_v9  ;;  %v904_v19 = vmul.f32 %v2086_v12, %v819_v11 }
 0x167   :  { %1390 = vst.msk [vmem:[%s2539_s5 + $0x64] sm:$0xf] %vm1364_vm1, %v1630_v13  ;;  %1422 = vst.msk [vmem:[%s2539_s5 + $0xe4] sm:$0xf] %vm1364_vm1, %v1662_v14 }
 0x168   :  { %v1006_v20 = vmax.f32 %v942_v15, 0.0  ;;  %v1038_v21 = vmax.f32 %v974_v16, 0.0  ;;  %v943_v22 = vadd.f32 %v2093_v18, %v872_v17  ;;  %v975_v23 = vadd.f32 %v2093_v18, %v904_v19  ;;  %v695_v24 = vpop.f32.mrb[56].mxu0  ;;  %v823_v25 = vpop.f32.mrb[56].mxu1 }
 0x169   :  { %v696_v26 = vadd.f32 %v2081_v10, %v695_v24  ;;  %v824_v27 = vadd.f32 %v2081_v10, %v823_v25  ;;  %v697_v28 = vpop.f32.mrb[57].mxu0  ;;  %v825_v29 = vpop.f32.mrb[57].mxu1 }
 0x16a   :  { %v1070_v30 = vmin.f32 %v1006_v20, 6.0  ;;  %v1102_v31 = vmin.f32 %v1038_v21, 6.0  ;;  %v1007_v32 = vmax.f32 %v943_v22, 0.0  ;;  %v1039_v33 = vmax.f32 %v975_v23, 0.0  ;;  %v698_v34 = vpop.f32.mrb[58].mxu0  ;;  %v826_v35 = vpop.f32.mrb[58].mxu1 }
 0x16b   :  { %v873_v36 = vmul.f32 %v2086_v12, %v696_v26  ;;  %v905_v37 = vmul.f32 %v2086_v12, %v824_v27  ;;  %v699_v38 = vadd.f32 %v2081_v10, %v698_v34  ;;  %v827_v39 = vadd.f32 %v2081_v10, %v826_v35  ;;  %v700_v40 = vpop.f32.mrb[59].mxu0  ;;  %v828_v41 = vpop.f32.mrb[59].mxu1 }
 0x16c   :  { %v1631_v42 = vpack.c.bf16 %v1070_v30, %v1070_v30  ;;  %v1663_v43 = vpack.c.bf16 %v1102_v31, %v1102_v31  ;;  %v1071_v44 = vmin.f32 %v1007_v32, 6.0  ;;  %v1103_v45 = vmin.f32 %v1039_v33, 6.0 }
 0x16d   :  { %v944_v46 = vadd.f32 %v2093_v18, %v873_v36  ;;  %v976_v47 = vadd.f32 %v2093_v18, %v905_v37  ;;  %v874_v49 = vmul.f32 %v1793_v48, %v699_v38  ;;  %v906_v12 = vmul.f32 %v1793_v48, %v827_v39 }
 0x16e   :  { %1391 = vst.msk [vmem:[%s2539_s5 + $0x68] sm:$0xf] %vm1364_vm1, %v1631_v42  ;;  %1423 = vst.msk [vmem:[%s2539_s5 + $0xe8] sm:$0xf] %vm1364_vm1, %v1663_v43  ;;  %v1632_v10 = vpack.c.bf16 %v1071_v44, %v1071_v44  ;;  %v1664_v50 = vpack.c.bf16 %v1103_v45, %v1103_v45 }
 0x16f   :  { %v1008_v51 = vmax.f32 %v944_v46, 0.0  ;;  %v1040_v18 = vmax.f32 %v976_v47, 0.0  ;;  %v945_v53 = vadd.f32 %v1794_v52, %v874_v49  ;;  %v977_v54 = vadd.f32 %v1794_v52, %v906_v12 }
 0x170   :  { %1392 = vst.msk [vmem:[%s2539_s5 + $0x6c] sm:$0xf] %vm1364_vm1, %v1632_v10  ;;  %1424 = vst.msk [vmem:[%s2539_s5 + $0xec] sm:$0xf] %vm1364_vm1, %v1664_v50  ;;  %v703_v55 = vpop.f32.mrb[60].mxu0  ;;  %v831_v56 = vpop.f32.mrb[60].mxu1 }
 0x171   :  { %v1072_v57 = vmin.f32 %v1008_v51, 6.0  ;;  %v1104_v58 = vmin.f32 %v1040_v18, 6.0  ;;  %v1009_v59 = vmax.f32 %v945_v53, 0.0  ;;  %v1041_v60 = vmax.f32 %v977_v54, 0.0  ;;  %v705_v61 = vpop.f32.mrb[61].mxu0  ;;  %v833_v62 = vpop.f32.mrb[61].mxu1 }
 0x172   :  { %v704_v0 = vadd.f32 %v1795_v63, %v703_v55  ;;  %v832_v1 = vadd.f32 %v1795_v63, %v831_v56  ;;  %v706_v2 = vpop.f32.mrb[62].mxu0  ;;  %v834_v3 = vpop.f32.mrb[62].mxu1 }
 0x173   :  { %v1633_v4 = vpack.c.bf16 %v1072_v57, %v1072_v57  ;;  %v1665_v5 = vpack.c.bf16 %v1104_v58, %v1104_v58  ;;  %v1073_v6 = vmin.f32 %v1009_v59, 6.0  ;;  %v1105_v7 = vmin.f32 %v1041_v60, 6.0  ;;  %v708_v8 = vpop.f32.mrb[63].mxu0  ;;  %v836_v9 = vpop.f32.mrb[63].mxu1 }
 0x174   :  { %v875_v11 = vmul.f32 %v1793_v48, %v704_v0  ;;  %v907_v13 = vmul.f32 %v1793_v48, %v832_v1  ;;  %v707_v14 = vadd.f32 %v1795_v63, %v706_v2  ;;  %v835_v15 = vadd.f32 %v1795_v63, %v834_v3 }
 0x175   :  { %1393 = vst.msk [vmem:[%s2539_s5 + $0x70] sm:$0xf] %vm1364_vm1, %v1633_v4  ;;  %1425 = vst.msk [vmem:[%s2539_s5 + $0xf0] sm:$0xf] %vm1364_vm1, %v1665_v5  ;;  %v1634_v16 = vpack.c.bf16 %v1073_v6, %v1073_v6  ;;  %v1666_v17 = vpack.c.bf16 %v1105_v7, %v1105_v7 }
 0x176   :  { %v946_v19 = vadd.f32 %v1794_v52, %v875_v11  ;;  %v978_v20 = vadd.f32 %v1794_v52, %v907_v13  ;;  %v876_v21 = vmul.f32 %v1793_v48, %v707_v14  ;;  %v908_v22 = vmul.f32 %v1793_v48, %v835_v15 }
 0x177   :  { %1394 = vst.msk [vmem:[%s2539_s5 + $0x74] sm:$0xf] %vm1364_vm1, %v1634_v16  ;;  %1426 = vst.msk [vmem:[%s2539_s5 + $0xf4] sm:$0xf] %vm1364_vm1, %v1666_v17 }
 0x178   :  { %v1010_v23 = vmax.f32 %v946_v19, 0.0  ;;  %v1042_v24 = vmax.f32 %v978_v20, 0.0  ;;  %v947_v25 = vadd.f32 %v1794_v52, %v876_v21  ;;  %v979_v26 = vadd.f32 %v1794_v52, %v908_v22 }
 0x17a   :  { %v1074_v27 = vmin.f32 %v1010_v23, 6.0  ;;  %v1106_v28 = vmin.f32 %v1042_v24, 6.0  ;;  %v1011_v29 = vmax.f32 %v947_v25, 0.0  ;;  %v1043_v30 = vmax.f32 %v979_v26, 0.0 }
 0x17c   :  { %v1635_v31 = vpack.c.bf16 %v1074_v27, %v1074_v27  ;;  %v1667_v32 = vpack.c.bf16 %v1106_v28, %v1106_v28  ;;  %v1075_v33 = vmin.f32 %v1011_v29, 6.0  ;;  %v1107_v34 = vmin.f32 %v1043_v30, 6.0 }
 0x17e   :  { %1395 = vst.msk [vmem:[%s2539_s5 + $0x78] sm:$0xf] %vm1364_vm1, %v1635_v31  ;;  %1427 = vst.msk [vmem:[%s2539_s5 + $0xf8] sm:$0xf] %vm1364_vm1, %v1667_v32  ;;  %v1636_v35 = vpack.c.bf16 %v1075_v33, %v1075_v33  ;;  %v1668_v36 = vpack.c.bf16 %v1107_v34, %v1107_v34 }
 0x180   :  { %1396 = vst.msk [vmem:[%s2539_s5 + $0x7c] sm:$0xf] %vm1364_vm1, %v1636_v35  ;;  %1428 = vst.msk [vmem:[%s2539_s5 + $0xfc] sm:$0xf] %vm1364_vm1, %v1668_v36 }

</bundles_post_ra>
